<compile_context>
chip_gen: v7x
topology: tpu7x:2x2x1
jax: 0.10.0
libtpu: 0.0.40
codegen_flags: <defaults>
</compile_context>

<pallas_src>
import functools

import jax
import jax.numpy as jnp
from jax.experimental import pallas as pl
from jax.experimental.pallas import tpu as pltpu


# ----------------------------------------------------------------------------
# Small helpers
# ----------------------------------------------------------------------------
def _round_up(x, m):
    return ((x + m - 1) // m) * m


def _unroll_for(T):
    """Partial unroll factor for the time loop (full unroll only for short T)."""
    if T <= 16:
        return T
    for u in (8, 4, 2):
        if T % u == 0:
            return u
    return 1


def _padded_f32_bytes(shape):
    r, c = shape
    return _round_up(r, 8) * _round_up(c, 128) * 4


def _vmem_limit_bytes(shapes):
    est = sum(_padded_f32_bytes(s) for s in shapes)
    est = int(est * 1.3) + (4 << 20)          # headroom for compiler-internal scratch
    return int(min(max(est, 8 << 20), 96 << 20))


def _reorder_gate_rows(a):
    """PyTorch gate-major order [i, f, g, o] -> [i, f, o, g] along axis 0."""
    H4 = a.shape[0]
    H = H4 // 4
    return jnp.concatenate([a[0:H], a[H:2 * H], a[3 * H:4 * H], a[2 * H:3 * H]], axis=0)


def _prep_direction(dir_params):
    """-> (wih (Din,4H), whh (H,4H), bias (1,4H)) with gate columns ordered [i,f,o,g]."""
    w_ih, w_hh, b_ih, b_hh = dir_params
    wih = jnp.transpose(_reorder_gate_rows(w_ih.astype(jnp.float32)))
    whh = jnp.transpose(_reorder_gate_rows(w_hh.astype(jnp.float32)))
    b = _reorder_gate_rows((b_ih + b_hh).astype(jnp.float32)).reshape(1, -1)
    return wih, whh, b


# ----------------------------------------------------------------------------
# Kernel 1: one full bidirectional LSTM layer (all T steps, both directions).
# Activations are time-major & flattened: row t*B + b  <->  (time t, batch b), B = padded batch.
# Gate column order (per direction) is [i, f, o, g]; fused layout is [fwd 4H | bwd 4H].
# ----------------------------------------------------------------------------
def _bilstm_layer_kernel(x_ref, wih_ref, whh_ref, b_ref, out_ref,
                         gx_sc, hf_sc, hb_sc, *, T, B, H):
    H2, H3, H4, H8 = 2 * H, 3 * H, 4 * H, 8 * H

    # Fused input projection for BOTH directions, all timesteps: one (TB, Din) @ (Din, 8H).
    gx_sc[...] = jnp.dot(x_ref[...], wih_ref[...],
                         preferred_element_type=jnp.float32) + b_ref[...]

    def step(t, carry):
        h_cat, c_f, c_b = carry                            # (B,2H), (B,H), (B,H) in vregs
        # One fused recurrent MXU push: [h_f | h_b] @ blockdiag(Whh_f, Whh_b).
        rec = jnp.dot(h_cat, whh_ref[...], preferred_element_type=jnp.float32)   # (B, 8H)

        rf = pl.multiple_of(t * B, B)                      # fwd processes time t
        rb = pl.multiple_of((T - 1 - t) * B, B)            # bwd processes time T-1-t
        gxf = gx_sc[pl.ds(rf, B), :]                       # (B, 8H), aligned (B % 8 == 0)
        gxb = gx_sc[pl.ds(rb, B), :]
        gates_f = gxf[:, 0:H4] + rec[:, 0:H4]
        gates_b = gxb[:, H4:H8] + rec[:, H4:H8]

        # Split activations: sigmoid only on [i|f|o], tanh only on [g].
        sg_f = jax.nn.sigmoid(gates_f[:, 0:H3])
        g_f = jnp.tanh(gates_f[:, H3:H4])
        sg_b = jax.nn.sigmoid(gates_b[:, 0:H3])
        g_b = jnp.tanh(gates_b[:, H3:H4])

        c_f = sg_f[:, H:H2] * c_f + sg_f[:, 0:H] * g_f
        c_b = sg_b[:, H:H2] * c_b + sg_b[:, 0:H] * g_b
        h_f = sg_f[:, H2:H3] * jnp.tanh(c_f)
        h_b = sg_b[:, H2:H3] * jnp.tanh(c_b)

        # Buffer per-direction outputs (aligned, offset-0 stores); combined once at the end.
        hf_sc[pl.ds(rf, B), :] = h_f
        hb_sc[pl.ds(rb, B), :] = h_b
        return (jnp.concatenate([h_f, h_b], axis=-1), c_f, c_b)

    zh = jnp.zeros((B, H), jnp.float32)
    init = (jnp.zeros((B, H2), jnp.float32), zh, zh)
    jax.lax.fori_loop(0, T, step, init, unroll=_unroll_for(T))

    # Single bulk store of the full output slab (PyTorch concat order [fwd | bwd]).
    out_ref[...] = jnp.concatenate([hf_sc[...], hb_sc[...]], axis=-1)


def bilstm_layer(x2d, T, B, fwd_params, bwd_params):
    """x2d: (T*B, Din) time-major flattened -> (T*B, 2H)."""
    TB, Din = x2d.shape
    wih_f, whh_f, bf = _prep_direction(fwd_params)
    wih_b, whh_b, bb = _prep_direction(bwd_params)
    H = whh_f.shape[0]

    wih_big = jnp.concatenate([wih_f, wih_b], axis=1)          # (Din, 8H)
    b_big = jnp.concatenate([bf, bb], axis=1)                  # (1, 8H)
    z = jnp.zeros((H, 4 * H), jnp.float32)
    whh_big = jnp.concatenate(
        [jnp.concatenate([whh_f, z], axis=1),
         jnp.concatenate([z, whh_b], axis=1)], axis=0)         # (2H, 8H) block-diagonal

    vmem = _vmem_limit_bytes([
        (TB, Din), (Din, 8 * H), (2 * H, 8 * H), (1, 8 * H),   # inputs
        (TB, 2 * H),                                           # output
        (TB, 8 * H), (TB, H), (TB, H),                         # scratch
    ])

    return pl.pallas_call(
        functools.partial(_bilstm_layer_kernel, T=T, B=B, H=H),
        out_shape=jax.ShapeDtypeStruct((TB, 2 * H), jnp.float32),
        in_specs=[
            pl.BlockSpec((TB, Din), lambda: (0, 0)),
            pl.BlockSpec((Din, 8 * H), lambda: (0, 0)),
            pl.BlockSpec((2 * H, 8 * H), lambda: (0, 0)),
            pl.BlockSpec((1, 8 * H), lambda: (0, 0)),
        ],
        out_specs=pl.BlockSpec((TB, 2 * H), lambda: (0, 0)),
        scratch_shapes=[
            pltpu.VMEM((TB, 8 * H), jnp.float32),   # fused gx (both directions)
            pltpu.VMEM((TB, H), jnp.float32),       # fwd h buffer
            pltpu.VMEM((TB, H), jnp.float32),       # bwd h buffer
        ],
        compiler_params=pltpu.CompilerParams(vmem_limit_bytes=vmem),
    )(x2d, wih_big, whh_big, b_big)


# ----------------------------------------------------------------------------
# Kernel 2: final LSTM layer fused with the FC head.
# Only out[:, -1, :] is consumed:
#   * forward direction: full recurrence, keep only final h (carried in vregs, no writeback)
#   * backward direction: exactly ONE step on x_{T-1} from zero state (h0=0 -> no W_hh term)
#   * FC (2H -> F) + bias fused into the epilogue. Dropout in eval mode is identity.
# ----------------------------------------------------------------------------
def _last_bilstm_fc_kernel(x_ref, wih_f_ref, whh_f_ref, bf_ref,
                           wih_b_ref, bb_ref, fcw_ref, fcb_ref,
                           out_ref, gx_sc, *, T, B, H):
    H2, H3, H4 = 2 * H, 3 * H, 4 * H

    gx_sc[...] = jnp.dot(x_ref[...], wih_f_ref[...],
                         preferred_element_type=jnp.float32) + bf_ref[...]

    def step(t, carry):
        h, c = carry
        r = pl.multiple_of(t * B, B)
        gates = gx_sc[pl.ds(r, B), :] + jnp.dot(
            h, whh_f_ref[...], preferred_element_type=jnp.float32)
        sg = jax.nn.sigmoid(gates[:, 0:H3])
        g = jnp.tanh(gates[:, H3:H4])
        c = sg[:, H:H2] * c + sg[:, 0:H] * g
        h = sg[:, H2:H3] * jnp.tanh(c)
        return (h, c)

    zh = jnp.zeros((B, H), jnp.float32)
    h_f, _ = jax.lax.fori_loop(0, T, step, (zh, zh), unroll=_unroll_for(T))

    # Backward direction: single step on x_{T-1} from zero state.
    x_last = x_ref[(T - 1) * B:T * B, :]
    gates_b = jnp.dot(x_last, wih_b_ref[...],
                      preferred_element_type=jnp.float32) + bb_ref[...]
    sg_b = jax.nn.sigmoid(gates_b[:, 0:H3])
    g_b = jnp.tanh(gates_b[:, H3:H4])
    c_b = sg_b[:, 0:H] * g_b                      # f_b * c0 with c0 == 0
    h_b = sg_b[:, H2:H3] * jnp.tanh(c_b)

    last = jnp.concatenate([h_f, h_b], axis=-1)   # (B, 2H), PyTorch concat order
    out_ref[...] = jnp.dot(last, fcw_ref[...],
                           preferred_element_type=jnp.float32) + fcb_ref[...]


def last_layer_with_fc(x2d, T, B, fwd_params, bwd_params, fc_w, fc_b):
    TB, Din = x2d.shape
    wih_f, whh_f, bf = _prep_direction(fwd_params)
    wih_b, _whh_b, bb = _prep_direction(bwd_params)   # W_hh_b unused (single step from h=0)
    H = whh_f.shape[0]
    F = fc_w.shape[0]

    fcw = jnp.transpose(fc_w.astype(jnp.float32))     # (2H, F)
    fcb = fc_b.astype(jnp.float32).reshape(1, F)

    vmem = _vmem_limit_bytes([
        (TB, Din), (Din, 4 * H), (H, 4 * H), (1, 4 * H),
        (Din, 4 * H), (1, 4 * H), (2 * H, F), (1, F),
        (B, F), (TB, 4 * H),
    ])

    return pl.pallas_call(
        functools.partial(_last_bilstm_fc_kernel, T=T, B=B, H=H),
        out_shape=jax.ShapeDtypeStruct((B, F), jnp.float32),
        in_specs=[
            pl.BlockSpec((TB, Din), lambda: (0, 0)),
            pl.BlockSpec((Din, 4 * H), lambda: (0, 0)),
            pl.BlockSpec((H, 4 * H), lambda: (0, 0)),
            pl.BlockSpec((1, 4 * H), lambda: (0, 0)),
            pl.BlockSpec((Din, 4 * H), lambda: (0, 0)),
            pl.BlockSpec((1, 4 * H), lambda: (0, 0)),
            pl.BlockSpec((2 * H, F), lambda: (0, 0)),
            pl.BlockSpec((1, F), lambda: (0, 0)),
        ],
        out_specs=pl.BlockSpec((B, F), lambda: (0, 0)),
        scratch_shapes=[pltpu.VMEM((TB, 4 * H), jnp.float32)],   # fwd gx
        compiler_params=pltpu.CompilerParams(vmem_limit_bytes=vmem),
    )(x2d, wih_f, whh_f, bf, wih_b, bb, fcw, fcb)


# ----------------------------------------------------------------------------
# Full model forward (eval mode: dropout == identity).
# ----------------------------------------------------------------------------
def lstm_model_multistep_forward(x_btd, params):
    # x_btd: (B, T, input_size) -- batch_first, like the PyTorch module.
    B, T, _ = x_btd.shape
    B_pad = _round_up(max(B, 8), 8)            # sublane-aligned batch
    x = jnp.transpose(x_btd, (1, 0, 2)).astype(jnp.float32)   # (T, B, D) time-major
    if B_pad != B:
        x = jnp.pad(x, ((0, 0), (0, B_pad - B), (0, 0)))
    x2d = x.reshape(T * B_pad, x.shape[-1])    # row t*B_pad + b <-> (t, b)

    for layer in params["lstm"][:-1]:
        x2d = bilstm_layer(x2d, T, B_pad, layer["fwd"], layer["bwd"])
        # inter-layer dropout: eval mode -> identity

    last = params["lstm"][-1]
    out = last_layer_with_fc(x2d, T, B_pad, last["fwd"], last["bwd"],
                             params["fc_w"], params["fc_b"])
    return out[:B]


# ----------------------------------------------------------------------------
# Deterministic parameter init (PyTorch-style uniform(-1/sqrt(H), 1/sqrt(H))).
# ----------------------------------------------------------------------------
def init_params(key, input_size, hidden_size, num_layers, forecast_length):
    params = {"lstm": []}
    k = 1.0 / jnp.sqrt(hidden_size)
    keys = jax.random.split(key, num_layers * 2 * 4 + 2)
    ki = 0
    for layer in range(num_layers):
        d_in = input_size if layer == 0 else 2 * hidden_size
        layer_params = {}
        for name in ("fwd", "bwd"):
            w_ih = jax.random.uniform(keys[ki], (4 * hidden_size, d_in),
                                      jnp.float32, -k, k); ki += 1
            w_hh = jax.random.uniform(keys[ki], (4 * hidden_size, hidden_size),
                                      jnp.float32, -k, k); ki += 1
            b_ih = jax.random.uniform(keys[ki], (4 * hidden_size,),
                                      jnp.float32, -k, k); ki += 1
            b_hh = jax.random.uniform(keys[ki], (4 * hidden_size,),
                                      jnp.float32, -k, k); ki += 1
            layer_params[name] = (w_ih, w_hh, b_ih, b_hh)
        params["lstm"].append(layer_params)
    kf = 1.0 / jnp.sqrt(2 * hidden_size)
    params["fc_w"] = jax.random.uniform(keys[ki], (forecast_length, 2 * hidden_size),
                                        jnp.float32, -kf, kf); ki += 1
    params["fc_b"] = jax.random.uniform(keys[ki], (forecast_length,),
                                        jnp.float32, -kf, kf)
    return params


# ----------------------------------------------------------------------------
# Pure-JAX reference (lax.scan) for a sanity check.
# ----------------------------------------------------------------------------
def _ref_lstm_dir(x_tbd, w_ih, w_hh, b_ih, b_hh):
    T, B, _ = x_tbd.shape
    H = w_hh.shape[1]

    def step(carry, x_t):
        h, c = carry
        gates = x_t @ w_ih.T + h @ w_hh.T + b_ih + b_hh
        i, f, g, o = jnp.split(gates, 4, axis=-1)
        i, f, o = jax.nn.sigmoid(i), jax.nn.sigmoid(f), jax.nn.sigmoid(o)
        g = jnp.tanh(g)
        c = f * c + i * g
        h = o * jnp.tanh(c)
        return (h, c), h

    init = (jnp.zeros((B, H), jnp.float32), jnp.zeros((B, H), jnp.float32))
    _, hs = jax.lax.scan(step, init, x_tbd)
    return hs


def ref_forward(x_btd, params):
    x = jnp.transpose(x_btd, (1, 0, 2)).astype(jnp.float32)
    for layer in params["lstm"]:
        out_f = _ref_lstm_dir(x, *layer["fwd"])
        out_b = _ref_lstm_dir(x[::-1], *layer["bwd"])[::-1]
        x = jnp.concatenate([out_f, out_b], axis=-1)
    last = x[-1]
    return last @ params["fc_w"].T + params["fc_b"]


if __name__ == "__main__":
    # Small shapes consistent with the module's forward pass.
    batch, seq_len = 2, 8
    input_size, hidden_size, num_layers = 4, 32, 2
    forecast_length, dropout = 6, 0.1   # dropout is identity in eval mode

    key = jax.random.PRNGKey(0)
    kx, kp = jax.random.split(key)
    x = jax.random.normal(kx, (batch, seq_len, input_size), jnp.float32)
    params = init_params(kp, input_size, hidden_size, num_layers, forecast_length)

    fwd = jax.jit(lstm_model_multistep_forward)
    out = jax.block_until_ready(fwd(x, params))
    assert out.shape == (batch, forecast_length), out.shape

    ref = jax.block_until_ready(ref_forward(x, params))
    assert jnp.allclose(out, ref, atol=5e-4, rtol=5e-4), (out, ref)

    print("KERNEL_OK")
</pallas_src>

<mosaic_0001>
module attributes {stable_mosaic.version = 11 : i64} {
  func.func @_bilstm_layer_kernel(%arg0: memref<64x4xf32, #tpu.memory_space<vmem>>, %arg1: memref<4x256xf32, #tpu.memory_space<vmem>>, %arg2: memref<64x256xf32, #tpu.memory_space<vmem>>, %arg3: memref<1x256xf32, #tpu.memory_space<vmem>>, %arg4: memref<64x64xf32, #tpu.memory_space<vmem>>, %arg5: memref<64x256xf32, #tpu.memory_space<vmem>>, %arg6: memref<64x32xf32, #tpu.memory_space<vmem>>, %arg7: memref<64x32xf32, #tpu.memory_space<vmem>>) attributes {dimension_semantics = [], scalar_prefetch = 0 : i64, scratch_operands = 3 : i64, tpu.core_type = #tpu.core_type<tc>} {
    %c0 = arith.constant 0 : index
    %c0_0 = arith.constant 0 : index
    %0 = vector.load %arg0[%c0, %c0_0] : memref<64x4xf32, #tpu.memory_space<vmem>>, vector<64x4xf32>
    %c0_1 = arith.constant 0 : index
    %c0_2 = arith.constant 0 : index
    %1 = vector.load %arg1[%c0_1, %c0_2] : memref<4x256xf32, #tpu.memory_space<vmem>>, vector<4x256xf32>
    %cst = arith.constant dense<0.000000e+00> : vector<64x256xf32>
    %2 = tpu.matmul %0, %1, %cst {dimension_numbers = #tpu.dot_dimension_numbers<[1], [0], [0], [1], [0, 0, 1, 1], [], []>} : vector<64x4xf32>, vector<4x256xf32>, vector<64x256xf32> -> vector<64x256xf32>
    %c0_3 = arith.constant 0 : index
    %c0_4 = arith.constant 0 : index
    %3 = vector.load %arg3[%c0_3, %c0_4] : memref<1x256xf32, #tpu.memory_space<vmem>>, vector<1x256xf32>
    %4 = vector.broadcast %3 : vector<1x256xf32> to vector<64x256xf32>
    %5 = arith.addf %2, %4 : vector<64x256xf32>
    %c0_5 = arith.constant 0 : index
    %c0_6 = arith.constant 0 : index
    %6 = vector.load %arg5[%c0_5, %c0_6] : memref<64x256xf32, #tpu.memory_space<vmem>>, vector<64x256xf32>
    tpu.vector_store %arg5[%c0_5, %c0_6], %5 {strides = array<i32>} : memref<64x256xf32, #tpu.memory_space<vmem>>, vector<64x256xf32>,
    %cst_7 = arith.constant 0.000000e+00 : f32
    %7 = vector.broadcast %cst_7 : f32 to vector<8x32xf32>
    %cst_8 = arith.constant 0.000000e+00 : f32
    %8 = vector.broadcast %cst_8 : f32 to vector<8x64xf32>
    %c0_i32 = arith.constant 0 : i32
    %c0_9 = arith.constant 0 : index
    %c0_10 = arith.constant 0 : index
    %9 = vector.load %arg2[%c0_9, %c0_10] : memref<64x256xf32, #tpu.memory_space<vmem>>, vector<64x256xf32>
    %cst_11 = arith.constant dense<0.000000e+00> : vector<8x256xf32>
    %10 = tpu.matmul %8, %9, %cst_11 {dimension_numbers = #tpu.dot_dimension_numbers<[1], [0], [0], [1], [0, 0, 1, 1], [], []>} : vector<8x64xf32>, vector<64x256xf32>, vector<8x256xf32> -> vector<8x256xf32>
    %c8_i32 = arith.constant 8 : i32
    %11 = arith.muli %c0_i32, %c8_i32 : i32
    %12 = tpu.assume_multiple %11, 8 : i32
    %c7_i32 = arith.constant 7 : i32
    %13 = arith.subi %c7_i32, %c0_i32 : i32
    %c8_i32_12 = arith.constant 8 : i32
    %14 = arith.muli %13, %c8_i32_12 : i32
    %15 = tpu.assume_multiple %14, 8 : i32
    %16 = arith.index_cast %12 : i32 to index
    %c0_13 = arith.constant 0 : index
    %17 = vector.load %arg5[%16, %c0_13] : memref<64x256xf32, #tpu.memory_space<vmem>>, vector<8x256xf32>
    %18 = arith.index_cast %15 : i32 to index
    %c0_14 = arith.constant 0 : index
    %19 = vector.load %arg5[%18, %c0_14] : memref<64x256xf32, #tpu.memory_space<vmem>>, vector<8x256xf32>
    %20 = vector.extract_strided_slice %17 {offsets = [0, 0], sizes = [8, 128], strides = [1, 1]} : vector<8x256xf32> to vector<8x128xf32>
    %21 = vector.extract_strided_slice %10 {offsets = [0, 0], sizes = [8, 128], strides = [1, 1]} : vector<8x256xf32> to vector<8x128xf32>
    %22 = arith.addf %20, %21 : vector<8x128xf32>
    %23 = vector.extract_strided_slice %19 {offsets = [0, 128], sizes = [8, 128], strides = [1, 1]} : vector<8x256xf32> to vector<8x128xf32>
    %24 = vector.extract_strided_slice %10 {offsets = [0, 128], sizes = [8, 128], strides = [1, 1]} : vector<8x256xf32> to vector<8x128xf32>
    %25 = arith.addf %23, %24 : vector<8x128xf32>
    %26 = vector.extract_strided_slice %22 {offsets = [0, 0], sizes = [8, 96], strides = [1, 1]} : vector<8x128xf32> to vector<8x96xf32>
    %27 = arith.negf %26 : vector<8x96xf32>
    %28 = math.exp %27 : vector<8x96xf32>
    %cst_15 = arith.constant 1.000000e+00 : f32
    %29 = vector.broadcast %cst_15 : f32 to vector<8x96xf32>
    %30 = arith.addf %29, %28 : vector<8x96xf32>
    %31 = arith.divf %29, %30 : vector<8x96xf32>
    %32 = vector.extract_strided_slice %22 {offsets = [0, 96], sizes = [8, 32], strides = [1, 1]} : vector<8x128xf32> to vector<8x32xf32>
    %33 = math.tanh %32 : vector<8x32xf32>
    %34 = vector.extract_strided_slice %25 {offsets = [0, 0], sizes = [8, 96], strides = [1, 1]} : vector<8x128xf32> to vector<8x96xf32>
    %35 = arith.negf %34 : vector<8x96xf32>
    %36 = math.exp %35 : vector<8x96xf32>
    %cst_16 = arith.constant 1.000000e+00 : f32
    %37 = vector.broadcast %cst_16 : f32 to vector<8x96xf32>
    %38 = arith.addf %37, %36 : vector<8x96xf32>
    %39 = arith.divf %37, %38 : vector<8x96xf32>
    %40 = vector.extract_strided_slice %25 {offsets = [0, 96], sizes = [8, 32], strides = [1, 1]} : vector<8x128xf32> to vector<8x32xf32>
    %41 = math.tanh %40 : vector<8x32xf32>
    %42 = vector.extract_strided_slice %31 {offsets = [0, 32], sizes = [8, 32], strides = [1, 1]} : vector<8x96xf32> to vector<8x32xf32>
    %43 = arith.mulf %42, %7 : vector<8x32xf32>
    %44 = vector.extract_strided_slice %31 {offsets = [0, 0], sizes = [8, 32], strides = [1, 1]} : vector<8x96xf32> to vector<8x32xf32>
    %45 = arith.mulf %44, %33 : vector<8x32xf32>
    %46 = arith.addf %43, %45 : vector<8x32xf32>
    %47 = vector.extract_strided_slice %39 {offsets = [0, 32], sizes = [8, 32], strides = [1, 1]} : vector<8x96xf32> to vector<8x32xf32>
    %48 = arith.mulf %47, %7 : vector<8x32xf32>
    %49 = vector.extract_strided_slice %39 {offsets = [0, 0], sizes = [8, 32], strides = [1, 1]} : vector<8x96xf32> to vector<8x32xf32>
    %50 = arith.mulf %49, %41 : vector<8x32xf32>
    %51 = arith.addf %48, %50 : vector<8x32xf32>
    %52 = vector.extract_strided_slice %31 {offsets = [0, 64], sizes = [8, 32], strides = [1, 1]} : vector<8x96xf32> to vector<8x32xf32>
    %53 = math.tanh %46 : vector<8x32xf32>
    %54 = arith.mulf %52, %53 : vector<8x32xf32>
    %55 = vector.extract_strided_slice %39 {offsets = [0, 64], sizes = [8, 32], strides = [1, 1]} : vector<8x96xf32> to vector<8x32xf32>
    %56 = math.tanh %51 : vector<8x32xf32>
    %57 = arith.mulf %55, %56 : vector<8x32xf32>
    %58 = arith.index_cast %12 : i32 to index
    %c0_17 = arith.constant 0 : index
    %59 = vector.load %arg6[%58, %c0_17] : memref<64x32xf32, #tpu.memory_space<vmem>>, vector<8x32xf32>
    tpu.vector_store %arg6[%58, %c0_17], %54 {strides = array<i32>} : memref<64x32xf32, #tpu.memory_space<vmem>>, vector<8x32xf32>,
    %60 = arith.index_cast %15 : i32 to index
    %c0_18 = arith.constant 0 : index
    %61 = vector.load %arg7[%60, %c0_18] : memref<64x32xf32, #tpu.memory_space<vmem>>, vector<8x32xf32>
    tpu.vector_store %arg7[%60, %c0_18], %57 {strides = array<i32>} : memref<64x32xf32, #tpu.memory_space<vmem>>, vector<8x32xf32>,
    %62 = tpu.concatenate %54, %57 in 1 : vector<8x32xf32>, vector<8x32xf32> -> vector<8x64xf32>
    %c1_i32 = arith.constant 1 : i32
    %c0_19 = arith.constant 0 : index
    %c0_20 = arith.constant 0 : index
    %63 = vector.load %arg2[%c0_19, %c0_20] : memref<64x256xf32, #tpu.memory_space<vmem>>, vector<64x256xf32>
    %cst_21 = arith.constant dense<0.000000e+00> : vector<8x256xf32>
    %64 = tpu.matmul %62, %63, %cst_21 {dimension_numbers = #tpu.dot_dimension_numbers<[1], [0], [0], [1], [0, 0, 1, 1], [], []>} : vector<8x64xf32>, vector<64x256xf32>, vector<8x256xf32> -> vector<8x256xf32>
    %c8_i32_22 = arith.constant 8 : i32
    %65 = arith.muli %c1_i32, %c8_i32_22 : i32
    %66 = tpu.assume_multiple %65, 8 : i32
    %c7_i32_23 = arith.constant 7 : i32
    %67 = arith.subi %c7_i32_23, %c1_i32 : i32
    %c8_i32_24 = arith.constant 8 : i32
    %68 = arith.muli %67, %c8_i32_24 : i32
    %69 = tpu.assume_multiple %68, 8 : i32
    %70 = arith.index_cast %66 : i32 to index
    %c0_25 = arith.constant 0 : index
    %71 = vector.load %arg5[%70, %c0_25] : memref<64x256xf32, #tpu.memory_space<vmem>>, vector<8x256xf32>
    %72 = arith.index_cast %69 : i32 to index
    %c0_26 = arith.constant 0 : index
    %73 = vector.load %arg5[%72, %c0_26] : memref<64x256xf32, #tpu.memory_space<vmem>>, vector<8x256xf32>
    %74 = vector.extract_strided_slice %71 {offsets = [0, 0], sizes = [8, 128], strides = [1, 1]} : vector<8x256xf32> to vector<8x128xf32>
    %75 = vector.extract_strided_slice %64 {offsets = [0, 0], sizes = [8, 128], strides = [1, 1]} : vector<8x256xf32> to vector<8x128xf32>
    %76 = arith.addf %74, %75 : vector<8x128xf32>
    %77 = vector.extract_strided_slice %73 {offsets = [0, 128], sizes = [8, 128], strides = [1, 1]} : vector<8x256xf32> to vector<8x128xf32>
    %78 = vector.extract_strided_slice %64 {offsets = [0, 128], sizes = [8, 128], strides = [1, 1]} : vector<8x256xf32> to vector<8x128xf32>
    %79 = arith.addf %77, %78 : vector<8x128xf32>
    %80 = vector.extract_strided_slice %76 {offsets = [0, 0], sizes = [8, 96], strides = [1, 1]} : vector<8x128xf32> to vector<8x96xf32>
    %81 = arith.negf %80 : vector<8x96xf32>
    %82 = math.exp %81 : vector<8x96xf32>
    %cst_27 = arith.constant 1.000000e+00 : f32
    %83 = vector.broadcast %cst_27 : f32 to vector<8x96xf32>
    %84 = arith.addf %83, %82 : vector<8x96xf32>
    %85 = arith.divf %83, %84 : vector<8x96xf32>
    %86 = vector.extract_strided_slice %76 {offsets = [0, 96], sizes = [8, 32], strides = [1, 1]} : vector<8x128xf32> to vector<8x32xf32>
    %87 = math.tanh %86 : vector<8x32xf32>
    %88 = vector.extract_strided_slice %79 {offsets = [0, 0], sizes = [8, 96], strides = [1, 1]} : vector<8x128xf32> to vector<8x96xf32>
    %89 = arith.negf %88 : vector<8x96xf32>
    %90 = math.exp %89 : vector<8x96xf32>
    %cst_28 = arith.constant 1.000000e+00 : f32
    %91 = vector.broadcast %cst_28 : f32 to vector<8x96xf32>
    %92 = arith.addf %91, %90 : vector<8x96xf32>
    %93 = arith.divf %91, %92 : vector<8x96xf32>
    %94 = vector.extract_strided_slice %79 {offsets = [0, 96], sizes = [8, 32], strides = [1, 1]} : vector<8x128xf32> to vector<8x32xf32>
    %95 = math.tanh %94 : vector<8x32xf32>
    %96 = vector.extract_strided_slice %85 {offsets = [0, 32], sizes = [8, 32], strides = [1, 1]} : vector<8x96xf32> to vector<8x32xf32>
    %97 = arith.mulf %96, %46 : vector<8x32xf32>
    %98 = vector.extract_strided_slice %85 {offsets = [0, 0], sizes = [8, 32], strides = [1, 1]} : vector<8x96xf32> to vector<8x32xf32>
    %99 = arith.mulf %98, %87 : vector<8x32xf32>
    %100 = arith.addf %97, %99 : vector<8x32xf32>
    %101 = vector.extract_strided_slice %93 {offsets = [0, 32], sizes = [8, 32], strides = [1, 1]} : vector<8x96xf32> to vector<8x32xf32>
    %102 = arith.mulf %101, %51 : vector<8x32xf32>
    %103 = vector.extract_strided_slice %93 {offsets = [0, 0], sizes = [8, 32], strides = [1, 1]} : vector<8x96xf32> to vector<8x32xf32>
    %104 = arith.mulf %103, %95 : vector<8x32xf32>
    %105 = arith.addf %102, %104 : vector<8x32xf32>
    %106 = vector.extract_strided_slice %85 {offsets = [0, 64], sizes = [8, 32], strides = [1, 1]} : vector<8x96xf32> to vector<8x32xf32>
    %107 = math.tanh %100 : vector<8x32xf32>
    %108 = arith.mulf %106, %107 : vector<8x32xf32>
    %109 = vector.extract_strided_slice %93 {offsets = [0, 64], sizes = [8, 32], strides = [1, 1]} : vector<8x96xf32> to vector<8x32xf32>
    %110 = math.tanh %105 : vector<8x32xf32>
    %111 = arith.mulf %109, %110 : vector<8x32xf32>
    %112 = arith.index_cast %66 : i32 to index
    %c0_29 = arith.constant 0 : index
    %113 = vector.load %arg6[%112, %c0_29] : memref<64x32xf32, #tpu.memory_space<vmem>>, vector<8x32xf32>
    tpu.vector_store %arg6[%112, %c0_29], %108 {strides = array<i32>} : memref<64x32xf32, #tpu.memory_space<vmem>>, vector<8x32xf32>,
    %114 = arith.index_cast %69 : i32 to index
    %c0_30 = arith.constant 0 : index
    %115 = vector.load %arg7[%114, %c0_30] : memref<64x32xf32, #tpu.memory_space<vmem>>, vector<8x32xf32>
    tpu.vector_store %arg7[%114, %c0_30], %111 {strides = array<i32>} : memref<64x32xf32, #tpu.memory_space<vmem>>, vector<8x32xf32>,
    %116 = tpu.concatenate %108, %111 in 1 : vector<8x32xf32>, vector<8x32xf32> -> vector<8x64xf32>
    %c2_i32 = arith.constant 2 : i32
    %c0_31 = arith.constant 0 : index
    %c0_32 = arith.constant 0 : index
    %117 = vector.load %arg2[%c0_31, %c0_32] : memref<64x256xf32, #tpu.memory_space<vmem>>, vector<64x256xf32>
    %cst_33 = arith.constant dense<0.000000e+00> : vector<8x256xf32>
    %118 = tpu.matmul %116, %117, %cst_33 {dimension_numbers = #tpu.dot_dimension_numbers<[1], [0], [0], [1], [0, 0, 1, 1], [], []>} : vector<8x64xf32>, vector<64x256xf32>, vector<8x256xf32> -> vector<8x256xf32>
    %c8_i32_34 = arith.constant 8 : i32
    %119 = arith.muli %c2_i32, %c8_i32_34 : i32
    %120 = tpu.assume_multiple %119, 8 : i32
    %c7_i32_35 = arith.constant 7 : i32
    %121 = arith.subi %c7_i32_35, %c2_i32 : i32
    %c8_i32_36 = arith.constant 8 : i32
    %122 = arith.muli %121, %c8_i32_36 : i32
    %123 = tpu.assume_multiple %122, 8 : i32
    %124 = arith.index_cast %120 : i32 to index
    %c0_37 = arith.constant 0 : index
    %125 = vector.load %arg5[%124, %c0_37] : memref<64x256xf32, #tpu.memory_space<vmem>>, vector<8x256xf32>
    %126 = arith.index_cast %123 : i32 to index
    %c0_38 = arith.constant 0 : index
    %127 = vector.load %arg5[%126, %c0_38] : memref<64x256xf32, #tpu.memory_space<vmem>>, vector<8x256xf32>
    %128 = vector.extract_strided_slice %125 {offsets = [0, 0], sizes = [8, 128], strides = [1, 1]} : vector<8x256xf32> to vector<8x128xf32>
    %129 = vector.extract_strided_slice %118 {offsets = [0, 0], sizes = [8, 128], strides = [1, 1]} : vector<8x256xf32> to vector<8x128xf32>
    %130 = arith.addf %128, %129 : vector<8x128xf32>
    %131 = vector.extract_strided_slice %127 {offsets = [0, 128], sizes = [8, 128], strides = [1, 1]} : vector<8x256xf32> to vector<8x128xf32>
    %132 = vector.extract_strided_slice %118 {offsets = [0, 128], sizes = [8, 128], strides = [1, 1]} : vector<8x256xf32> to vector<8x128xf32>
    %133 = arith.addf %131, %132 : vector<8x128xf32>
    %134 = vector.extract_strided_slice %130 {offsets = [0, 0], sizes = [8, 96], strides = [1, 1]} : vector<8x128xf32> to vector<8x96xf32>
    %135 = arith.negf %134 : vector<8x96xf32>
    %136 = math.exp %135 : vector<8x96xf32>
    %cst_39 = arith.constant 1.000000e+00 : f32
    %137 = vector.broadcast %cst_39 : f32 to vector<8x96xf32>
    %138 = arith.addf %137, %136 : vector<8x96xf32>
    %139 = arith.divf %137, %138 : vector<8x96xf32>
    %140 = vector.extract_strided_slice %130 {offsets = [0, 96], sizes = [8, 32], strides = [1, 1]} : vector<8x128xf32> to vector<8x32xf32>
    %141 = math.tanh %140 : vector<8x32xf32>
    %142 = vector.extract_strided_slice %133 {offsets = [0, 0], sizes = [8, 96], strides = [1, 1]} : vector<8x128xf32> to vector<8x96xf32>
    %143 = arith.negf %142 : vector<8x96xf32>
    %144 = math.exp %143 : vector<8x96xf32>
    %cst_40 = arith.constant 1.000000e+00 : f32
    %145 = vector.broadcast %cst_40 : f32 to vector<8x96xf32>
    %146 = arith.addf %145, %144 : vector<8x96xf32>
    %147 = arith.divf %145, %146 : vector<8x96xf32>
    %148 = vector.extract_strided_slice %133 {offsets = [0, 96], sizes = [8, 32], strides = [1, 1]} : vector<8x128xf32> to vector<8x32xf32>
    %149 = math.tanh %148 : vector<8x32xf32>
    %150 = vector.extract_strided_slice %139 {offsets = [0, 32], sizes = [8, 32], strides = [1, 1]} : vector<8x96xf32> to vector<8x32xf32>
    %151 = arith.mulf %150, %100 : vector<8x32xf32>
    %152 = vector.extract_strided_slice %139 {offsets = [0, 0], sizes = [8, 32], strides = [1, 1]} : vector<8x96xf32> to vector<8x32xf32>
    %153 = arith.mulf %152, %141 : vector<8x32xf32>
    %154 = arith.addf %151, %153 : vector<8x32xf32>
    %155 = vector.extract_strided_slice %147 {offsets = [0, 32], sizes = [8, 32], strides = [1, 1]} : vector<8x96xf32> to vector<8x32xf32>
    %156 = arith.mulf %155, %105 : vector<8x32xf32>
    %157 = vector.extract_strided_slice %147 {offsets = [0, 0], sizes = [8, 32], strides = [1, 1]} : vector<8x96xf32> to vector<8x32xf32>
    %158 = arith.mulf %157, %149 : vector<8x32xf32>
    %159 = arith.addf %156, %158 : vector<8x32xf32>
    %160 = vector.extract_strided_slice %139 {offsets = [0, 64], sizes = [8, 32], strides = [1, 1]} : vector<8x96xf32> to vector<8x32xf32>
    %161 = math.tanh %154 : vector<8x32xf32>
    %162 = arith.mulf %160, %161 : vector<8x32xf32>
    %163 = vector.extract_strided_slice %147 {offsets = [0, 64], sizes = [8, 32], strides = [1, 1]} : vector<8x96xf32> to vector<8x32xf32>
    %164 = math.tanh %159 : vector<8x32xf32>
    %165 = arith.mulf %163, %164 : vector<8x32xf32>
    %166 = arith.index_cast %120 : i32 to index
    %c0_41 = arith.constant 0 : index
    %167 = vector.load %arg6[%166, %c0_41] : memref<64x32xf32, #tpu.memory_space<vmem>>, vector<8x32xf32>
    tpu.vector_store %arg6[%166, %c0_41], %162 {strides = array<i32>} : memref<64x32xf32, #tpu.memory_space<vmem>>, vector<8x32xf32>,
    %168 = arith.index_cast %123 : i32 to index
    %c0_42 = arith.constant 0 : index
    %169 = vector.load %arg7[%168, %c0_42] : memref<64x32xf32, #tpu.memory_space<vmem>>, vector<8x32xf32>
    tpu.vector_store %arg7[%168, %c0_42], %165 {strides = array<i32>} : memref<64x32xf32, #tpu.memory_space<vmem>>, vector<8x32xf32>,
    %170 = tpu.concatenate %162, %165 in 1 : vector<8x32xf32>, vector<8x32xf32> -> vector<8x64xf32>
    %c3_i32 = arith.constant 3 : i32
    %c0_43 = arith.constant 0 : index
    %c0_44 = arith.constant 0 : index
    %171 = vector.load %arg2[%c0_43, %c0_44] : memref<64x256xf32, #tpu.memory_space<vmem>>, vector<64x256xf32>
    %cst_45 = arith.constant dense<0.000000e+00> : vector<8x256xf32>
    %172 = tpu.matmul %170, %171, %cst_45 {dimension_numbers = #tpu.dot_dimension_numbers<[1], [0], [0], [1], [0, 0, 1, 1], [], []>} : vector<8x64xf32>, vector<64x256xf32>, vector<8x256xf32> -> vector<8x256xf32>
    %c8_i32_46 = arith.constant 8 : i32
    %173 = arith.muli %c3_i32, %c8_i32_46 : i32
    %174 = tpu.assume_multiple %173, 8 : i32
    %c7_i32_47 = arith.constant 7 : i32
    %175 = arith.subi %c7_i32_47, %c3_i32 : i32
    %c8_i32_48 = arith.constant 8 : i32
    %176 = arith.muli %175, %c8_i32_48 : i32
    %177 = tpu.assume_multiple %176, 8 : i32
    %178 = arith.index_cast %174 : i32 to index
    %c0_49 = arith.constant 0 : index
    %179 = vector.load %arg5[%178, %c0_49] : memref<64x256xf32, #tpu.memory_space<vmem>>, vector<8x256xf32>
    %180 = arith.index_cast %177 : i32 to index
    %c0_50 = arith.constant 0 : index
    %181 = vector.load %arg5[%180, %c0_50] : memref<64x256xf32, #tpu.memory_space<vmem>>, vector<8x256xf32>
    %182 = vector.extract_strided_slice %179 {offsets = [0, 0], sizes = [8, 128], strides = [1, 1]} : vector<8x256xf32> to vector<8x128xf32>
    %183 = vector.extract_strided_slice %172 {offsets = [0, 0], sizes = [8, 128], strides = [1, 1]} : vector<8x256xf32> to vector<8x128xf32>
    %184 = arith.addf %182, %183 : vector<8x128xf32>
    %185 = vector.extract_strided_slice %181 {offsets = [0, 128], sizes = [8, 128], strides = [1, 1]} : vector<8x256xf32> to vector<8x128xf32>
    %186 = vector.extract_strided_slice %172 {offsets = [0, 128], sizes = [8, 128], strides = [1, 1]} : vector<8x256xf32> to vector<8x128xf32>
    %187 = arith.addf %185, %186 : vector<8x128xf32>
    %188 = vector.extract_strided_slice %184 {offsets = [0, 0], sizes = [8, 96], strides = [1, 1]} : vector<8x128xf32> to vector<8x96xf32>
    %189 = arith.negf %188 : vector<8x96xf32>
    %190 = math.exp %189 : vector<8x96xf32>
    %cst_51 = arith.constant 1.000000e+00 : f32
    %191 = vector.broadcast %cst_51 : f32 to vector<8x96xf32>
    %192 = arith.addf %191, %190 : vector<8x96xf32>
    %193 = arith.divf %191, %192 : vector<8x96xf32>
    %194 = vector.extract_strided_slice %184 {offsets = [0, 96], sizes = [8, 32], strides = [1, 1]} : vector<8x128xf32> to vector<8x32xf32>
    %195 = math.tanh %194 : vector<8x32xf32>
    %196 = vector.extract_strided_slice %187 {offsets = [0, 0], sizes = [8, 96], strides = [1, 1]} : vector<8x128xf32> to vector<8x96xf32>
    %197 = arith.negf %196 : vector<8x96xf32>
    %198 = math.exp %197 : vector<8x96xf32>
    %cst_52 = arith.constant 1.000000e+00 : f32
    %199 = vector.broadcast %cst_52 : f32 to vector<8x96xf32>
    %200 = arith.addf %199, %198 : vector<8x96xf32>
    %201 = arith.divf %199, %200 : vector<8x96xf32>
    %202 = vector.extract_strided_slice %187 {offsets = [0, 96], sizes = [8, 32], strides = [1, 1]} : vector<8x128xf32> to vector<8x32xf32>
    %203 = math.tanh %202 : vector<8x32xf32>
    %204 = vector.extract_strided_slice %193 {offsets = [0, 32], sizes = [8, 32], strides = [1, 1]} : vector<8x96xf32> to vector<8x32xf32>
    %205 = arith.mulf %204, %154 : vector<8x32xf32>
    %206 = vector.extract_strided_slice %193 {offsets = [0, 0], sizes = [8, 32], strides = [1, 1]} : vector<8x96xf32> to vector<8x32xf32>
    %207 = arith.mulf %206, %195 : vector<8x32xf32>
    %208 = arith.addf %205, %207 : vector<8x32xf32>
    %209 = vector.extract_strided_slice %201 {offsets = [0, 32], sizes = [8, 32], strides = [1, 1]} : vector<8x96xf32> to vector<8x32xf32>
    %210 = arith.mulf %209, %159 : vector<8x32xf32>
    %211 = vector.extract_strided_slice %201 {offsets = [0, 0], sizes = [8, 32], strides = [1, 1]} : vector<8x96xf32> to vector<8x32xf32>
    %212 = arith.mulf %211, %203 : vector<8x32xf32>
    %213 = arith.addf %210, %212 : vector<8x32xf32>
    %214 = vector.extract_strided_slice %193 {offsets = [0, 64], sizes = [8, 32], strides = [1, 1]} : vector<8x96xf32> to vector<8x32xf32>
    %215 = math.tanh %208 : vector<8x32xf32>
    %216 = arith.mulf %214, %215 : vector<8x32xf32>
    %217 = vector.extract_strided_slice %201 {offsets = [0, 64], sizes = [8, 32], strides = [1, 1]} : vector<8x96xf32> to vector<8x32xf32>
    %218 = math.tanh %213 : vector<8x32xf32>
    %219 = arith.mulf %217, %218 : vector<8x32xf32>
    %220 = arith.index_cast %174 : i32 to index
    %c0_53 = arith.constant 0 : index
    %221 = vector.load %arg6[%220, %c0_53] : memref<64x32xf32, #tpu.memory_space<vmem>>, vector<8x32xf32>
    tpu.vector_store %arg6[%220, %c0_53], %216 {strides = array<i32>} : memref<64x32xf32, #tpu.memory_space<vmem>>, vector<8x32xf32>,
    %222 = arith.index_cast %177 : i32 to index
    %c0_54 = arith.constant 0 : index
    %223 = vector.load %arg7[%222, %c0_54] : memref<64x32xf32, #tpu.memory_space<vmem>>, vector<8x32xf32>
    tpu.vector_store %arg7[%222, %c0_54], %219 {strides = array<i32>} : memref<64x32xf32, #tpu.memory_space<vmem>>, vector<8x32xf32>,
    %224 = tpu.concatenate %216, %219 in 1 : vector<8x32xf32>, vector<8x32xf32> -> vector<8x64xf32>
    %c4_i32 = arith.constant 4 : i32
    %c0_55 = arith.constant 0 : index
    %c0_56 = arith.constant 0 : index
    %225 = vector.load %arg2[%c0_55, %c0_56] : memref<64x256xf32, #tpu.memory_space<vmem>>, vector<64x256xf32>
    %cst_57 = arith.constant dense<0.000000e+00> : vector<8x256xf32>
    %226 = tpu.matmul %224, %225, %cst_57 {dimension_numbers = #tpu.dot_dimension_numbers<[1], [0], [0], [1], [0, 0, 1, 1], [], []>} : vector<8x64xf32>, vector<64x256xf32>, vector<8x256xf32> -> vector<8x256xf32>
    %c8_i32_58 = arith.constant 8 : i32
    %227 = arith.muli %c4_i32, %c8_i32_58 : i32
    %228 = tpu.assume_multiple %227, 8 : i32
    %c7_i32_59 = arith.constant 7 : i32
    %229 = arith.subi %c7_i32_59, %c4_i32 : i32
    %c8_i32_60 = arith.constant 8 : i32
    %230 = arith.muli %229, %c8_i32_60 : i32
    %231 = tpu.assume_multiple %230, 8 : i32
    %232 = arith.index_cast %228 : i32 to index
    %c0_61 = arith.constant 0 : index
    %233 = vector.load %arg5[%232, %c0_61] : memref<64x256xf32, #tpu.memory_space<vmem>>, vector<8x256xf32>
    %234 = arith.index_cast %231 : i32 to index
    %c0_62 = arith.constant 0 : index
    %235 = vector.load %arg5[%234, %c0_62] : memref<64x256xf32, #tpu.memory_space<vmem>>, vector<8x256xf32>
    %236 = vector.extract_strided_slice %233 {offsets = [0, 0], sizes = [8, 128], strides = [1, 1]} : vector<8x256xf32> to vector<8x128xf32>
    %237 = vector.extract_strided_slice %226 {offsets = [0, 0], sizes = [8, 128], strides = [1, 1]} : vector<8x256xf32> to vector<8x128xf32>
    %238 = arith.addf %236, %237 : vector<8x128xf32>
    %239 = vector.extract_strided_slice %235 {offsets = [0, 128], sizes = [8, 128], strides = [1, 1]} : vector<8x256xf32> to vector<8x128xf32>
    %240 = vector.extract_strided_slice %226 {offsets = [0, 128], sizes = [8, 128], strides = [1, 1]} : vector<8x256xf32> to vector<8x128xf32>
    %241 = arith.addf %239, %240 : vector<8x128xf32>
    %242 = vector.extract_strided_slice %238 {offsets = [0, 0], sizes = [8, 96], strides = [1, 1]} : vector<8x128xf32> to vector<8x96xf32>
    %243 = arith.negf %242 : vector<8x96xf32>
    %244 = math.exp %243 : vector<8x96xf32>
    %cst_63 = arith.constant 1.000000e+00 : f32
    %245 = vector.broadcast %cst_63 : f32 to vector<8x96xf32>
    %246 = arith.addf %245, %244 : vector<8x96xf32>
    %247 = arith.divf %245, %246 : vector<8x96xf32>
    %248 = vector.extract_strided_slice %238 {offsets = [0, 96], sizes = [8, 32], strides = [1, 1]} : vector<8x128xf32> to vector<8x32xf32>
    %249 = math.tanh %248 : vector<8x32xf32>
    %250 = vector.extract_strided_slice %241 {offsets = [0, 0], sizes = [8, 96], strides = [1, 1]} : vector<8x128xf32> to vector<8x96xf32>
    %251 = arith.negf %250 : vector<8x96xf32>
    %252 = math.exp %251 : vector<8x96xf32>
    %cst_64 = arith.constant 1.000000e+00 : f32
    %253 = vector.broadcast %cst_64 : f32 to vector<8x96xf32>
    %254 = arith.addf %253, %252 : vector<8x96xf32>
    %255 = arith.divf %253, %254 : vector<8x96xf32>
    %256 = vector.extract_strided_slice %241 {offsets = [0, 96], sizes = [8, 32], strides = [1, 1]} : vector<8x128xf32> to vector<8x32xf32>
    %257 = math.tanh %256 : vector<8x32xf32>
    %258 = vector.extract_strided_slice %247 {offsets = [0, 32], sizes = [8, 32], strides = [1, 1]} : vector<8x96xf32> to vector<8x32xf32>
    %259 = arith.mulf %258, %208 : vector<8x32xf32>
    %260 = vector.extract_strided_slice %247 {offsets = [0, 0], sizes = [8, 32], strides = [1, 1]} : vector<8x96xf32> to vector<8x32xf32>
    %261 = arith.mulf %260, %249 : vector<8x32xf32>
    %262 = arith.addf %259, %261 : vector<8x32xf32>
    %263 = vector.extract_strided_slice %255 {offsets = [0, 32], sizes = [8, 32], strides = [1, 1]} : vector<8x96xf32> to vector<8x32xf32>
    %264 = arith.mulf %263, %213 : vector<8x32xf32>
    %265 = vector.extract_strided_slice %255 {offsets = [0, 0], sizes = [8, 32], strides = [1, 1]} : vector<8x96xf32> to vector<8x32xf32>
    %266 = arith.mulf %265, %257 : vector<8x32xf32>
    %267 = arith.addf %264, %266 : vector<8x32xf32>
    %268 = vector.extract_strided_slice %247 {offsets = [0, 64], sizes = [8, 32], strides = [1, 1]} : vector<8x96xf32> to vector<8x32xf32>
    %269 = math.tanh %262 : vector<8x32xf32>
    %270 = arith.mulf %268, %269 : vector<8x32xf32>
    %271 = vector.extract_strided_slice %255 {offsets = [0, 64], sizes = [8, 32], strides = [1, 1]} : vector<8x96xf32> to vector<8x32xf32>
    %272 = math.tanh %267 : vector<8x32xf32>
    %273 = arith.mulf %271, %272 : vector<8x32xf32>
    %274 = arith.index_cast %228 : i32 to index
    %c0_65 = arith.constant 0 : index
    %275 = vector.load %arg6[%274, %c0_65] : memref<64x32xf32, #tpu.memory_space<vmem>>, vector<8x32xf32>
    tpu.vector_store %arg6[%274, %c0_65], %270 {strides = array<i32>} : memref<64x32xf32, #tpu.memory_space<vmem>>, vector<8x32xf32>,
    %276 = arith.index_cast %231 : i32 to index
    %c0_66 = arith.constant 0 : index
    %277 = vector.load %arg7[%276, %c0_66] : memref<64x32xf32, #tpu.memory_space<vmem>>, vector<8x32xf32>
    tpu.vector_store %arg7[%276, %c0_66], %273 {strides = array<i32>} : memref<64x32xf32, #tpu.memory_space<vmem>>, vector<8x32xf32>,
    %278 = tpu.concatenate %270, %273 in 1 : vector<8x32xf32>, vector<8x32xf32> -> vector<8x64xf32>
    %c5_i32 = arith.constant 5 : i32
    %c0_67 = arith.constant 0 : index
    %c0_68 = arith.constant 0 : index
    %279 = vector.load %arg2[%c0_67, %c0_68] : memref<64x256xf32, #tpu.memory_space<vmem>>, vector<64x256xf32>
    %cst_69 = arith.constant dense<0.000000e+00> : vector<8x256xf32>
    %280 = tpu.matmul %278, %279, %cst_69 {dimension_numbers = #tpu.dot_dimension_numbers<[1], [0], [0], [1], [0, 0, 1, 1], [], []>} : vector<8x64xf32>, vector<64x256xf32>, vector<8x256xf32> -> vector<8x256xf32>
    %c8_i32_70 = arith.constant 8 : i32
    %281 = arith.muli %c5_i32, %c8_i32_70 : i32
    %282 = tpu.assume_multiple %281, 8 : i32
    %c7_i32_71 = arith.constant 7 : i32
    %283 = arith.subi %c7_i32_71, %c5_i32 : i32
    %c8_i32_72 = arith.constant 8 : i32
    %284 = arith.muli %283, %c8_i32_72 : i32
    %285 = tpu.assume_multiple %284, 8 : i32
    %286 = arith.index_cast %282 : i32 to index
    %c0_73 = arith.constant 0 : index
    %287 = vector.load %arg5[%286, %c0_73] : memref<64x256xf32, #tpu.memory_space<vmem>>, vector<8x256xf32>
    %288 = arith.index_cast %285 : i32 to index
    %c0_74 = arith.constant 0 : index
    %289 = vector.load %arg5[%288, %c0_74] : memref<64x256xf32, #tpu.memory_space<vmem>>, vector<8x256xf32>
    %290 = vector.extract_strided_slice %287 {offsets = [0, 0], sizes = [8, 128], strides = [1, 1]} : vector<8x256xf32> to vector<8x128xf32>
    %291 = vector.extract_strided_slice %280 {offsets = [0, 0], sizes = [8, 128], strides = [1, 1]} : vector<8x256xf32> to vector<8x128xf32>
    %292 = arith.addf %290, %291 : vector<8x128xf32>
    %293 = vector.extract_strided_slice %289 {offsets = [0, 128], sizes = [8, 128], strides = [1, 1]} : vector<8x256xf32> to vector<8x128xf32>
    %294 = vector.extract_strided_slice %280 {offsets = [0, 128], sizes = [8, 128], strides = [1, 1]} : vector<8x256xf32> to vector<8x128xf32>
    %295 = arith.addf %293, %294 : vector<8x128xf32>
    %296 = vector.extract_strided_slice %292 {offsets = [0, 0], sizes = [8, 96], strides = [1, 1]} : vector<8x128xf32> to vector<8x96xf32>
    %297 = arith.negf %296 : vector<8x96xf32>
    %298 = math.exp %297 : vector<8x96xf32>
    %cst_75 = arith.constant 1.000000e+00 : f32
    %299 = vector.broadcast %cst_75 : f32 to vector<8x96xf32>
    %300 = arith.addf %299, %298 : vector<8x96xf32>
    %301 = arith.divf %299, %300 : vector<8x96xf32>
    %302 = vector.extract_strided_slice %292 {offsets = [0, 96], sizes = [8, 32], strides = [1, 1]} : vector<8x128xf32> to vector<8x32xf32>
    %303 = math.tanh %302 : vector<8x32xf32>
    %304 = vector.extract_strided_slice %295 {offsets = [0, 0], sizes = [8, 96], strides = [1, 1]} : vector<8x128xf32> to vector<8x96xf32>
    %305 = arith.negf %304 : vector<8x96xf32>
    %306 = math.exp %305 : vector<8x96xf32>
    %cst_76 = arith.constant 1.000000e+00 : f32
    %307 = vector.broadcast %cst_76 : f32 to vector<8x96xf32>
    %308 = arith.addf %307, %306 : vector<8x96xf32>
    %309 = arith.divf %307, %308 : vector<8x96xf32>
    %310 = vector.extract_strided_slice %295 {offsets = [0, 96], sizes = [8, 32], strides = [1, 1]} : vector<8x128xf32> to vector<8x32xf32>
    %311 = math.tanh %310 : vector<8x32xf32>
    %312 = vector.extract_strided_slice %301 {offsets = [0, 32], sizes = [8, 32], strides = [1, 1]} : vector<8x96xf32> to vector<8x32xf32>
    %313 = arith.mulf %312, %262 : vector<8x32xf32>
    %314 = vector.extract_strided_slice %301 {offsets = [0, 0], sizes = [8, 32], strides = [1, 1]} : vector<8x96xf32> to vector<8x32xf32>
    %315 = arith.mulf %314, %303 : vector<8x32xf32>
    %316 = arith.addf %313, %315 : vector<8x32xf32>
    %317 = vector.extract_strided_slice %309 {offsets = [0, 32], sizes = [8, 32], strides = [1, 1]} : vector<8x96xf32> to vector<8x32xf32>
    %318 = arith.mulf %317, %267 : vector<8x32xf32>
    %319 = vector.extract_strided_slice %309 {offsets = [0, 0], sizes = [8, 32], strides = [1, 1]} : vector<8x96xf32> to vector<8x32xf32>
    %320 = arith.mulf %319, %311 : vector<8x32xf32>
    %321 = arith.addf %318, %320 : vector<8x32xf32>
    %322 = vector.extract_strided_slice %301 {offsets = [0, 64], sizes = [8, 32], strides = [1, 1]} : vector<8x96xf32> to vector<8x32xf32>
    %323 = math.tanh %316 : vector<8x32xf32>
    %324 = arith.mulf %322, %323 : vector<8x32xf32>
    %325 = vector.extract_strided_slice %309 {offsets = [0, 64], sizes = [8, 32], strides = [1, 1]} : vector<8x96xf32> to vector<8x32xf32>
    %326 = math.tanh %321 : vector<8x32xf32>
    %327 = arith.mulf %325, %326 : vector<8x32xf32>
    %328 = arith.index_cast %282 : i32 to index
    %c0_77 = arith.constant 0 : index
    %329 = vector.load %arg6[%328, %c0_77] : memref<64x32xf32, #tpu.memory_space<vmem>>, vector<8x32xf32>
    tpu.vector_store %arg6[%328, %c0_77], %324 {strides = array<i32>} : memref<64x32xf32, #tpu.memory_space<vmem>>, vector<8x32xf32>,
    %330 = arith.index_cast %285 : i32 to index
    %c0_78 = arith.constant 0 : index
    %331 = vector.load %arg7[%330, %c0_78] : memref<64x32xf32, #tpu.memory_space<vmem>>, vector<8x32xf32>
    tpu.vector_store %arg7[%330, %c0_78], %327 {strides = array<i32>} : memref<64x32xf32, #tpu.memory_space<vmem>>, vector<8x32xf32>,
    %332 = tpu.concatenate %324, %327 in 1 : vector<8x32xf32>, vector<8x32xf32> -> vector<8x64xf32>
    %c6_i32 = arith.constant 6 : i32
    %c0_79 = arith.constant 0 : index
    %c0_80 = arith.constant 0 : index
    %333 = vector.load %arg2[%c0_79, %c0_80] : memref<64x256xf32, #tpu.memory_space<vmem>>, vector<64x256xf32>
    %cst_81 = arith.constant dense<0.000000e+00> : vector<8x256xf32>
    %334 = tpu.matmul %332, %333, %cst_81 {dimension_numbers = #tpu.dot_dimension_numbers<[1], [0], [0], [1], [0, 0, 1, 1], [], []>} : vector<8x64xf32>, vector<64x256xf32>, vector<8x256xf32> -> vector<8x256xf32>
    %c8_i32_82 = arith.constant 8 : i32
    %335 = arith.muli %c6_i32, %c8_i32_82 : i32
    %336 = tpu.assume_multiple %335, 8 : i32
    %c7_i32_83 = arith.constant 7 : i32
    %337 = arith.subi %c7_i32_83, %c6_i32 : i32
    %c8_i32_84 = arith.constant 8 : i32
    %338 = arith.muli %337, %c8_i32_84 : i32
    %339 = tpu.assume_multiple %338, 8 : i32
    %340 = arith.index_cast %336 : i32 to index
    %c0_85 = arith.constant 0 : index
    %341 = vector.load %arg5[%340, %c0_85] : memref<64x256xf32, #tpu.memory_space<vmem>>, vector<8x256xf32>
    %342 = arith.index_cast %339 : i32 to index
    %c0_86 = arith.constant 0 : index
    %343 = vector.load %arg5[%342, %c0_86] : memref<64x256xf32, #tpu.memory_space<vmem>>, vector<8x256xf32>
    %344 = vector.extract_strided_slice %341 {offsets = [0, 0], sizes = [8, 128], strides = [1, 1]} : vector<8x256xf32> to vector<8x128xf32>
    %345 = vector.extract_strided_slice %334 {offsets = [0, 0], sizes = [8, 128], strides = [1, 1]} : vector<8x256xf32> to vector<8x128xf32>
    %346 = arith.addf %344, %345 : vector<8x128xf32>
    %347 = vector.extract_strided_slice %343 {offsets = [0, 128], sizes = [8, 128], strides = [1, 1]} : vector<8x256xf32> to vector<8x128xf32>
    %348 = vector.extract_strided_slice %334 {offsets = [0, 128], sizes = [8, 128], strides = [1, 1]} : vector<8x256xf32> to vector<8x128xf32>
    %349 = arith.addf %347, %348 : vector<8x128xf32>
    %350 = vector.extract_strided_slice %346 {offsets = [0, 0], sizes = [8, 96], strides = [1, 1]} : vector<8x128xf32> to vector<8x96xf32>
    %351 = arith.negf %350 : vector<8x96xf32>
    %352 = math.exp %351 : vector<8x96xf32>
    %cst_87 = arith.constant 1.000000e+00 : f32
    %353 = vector.broadcast %cst_87 : f32 to vector<8x96xf32>
    %354 = arith.addf %353, %352 : vector<8x96xf32>
    %355 = arith.divf %353, %354 : vector<8x96xf32>
    %356 = vector.extract_strided_slice %346 {offsets = [0, 96], sizes = [8, 32], strides = [1, 1]} : vector<8x128xf32> to vector<8x32xf32>
    %357 = math.tanh %356 : vector<8x32xf32>
    %358 = vector.extract_strided_slice %349 {offsets = [0, 0], sizes = [8, 96], strides = [1, 1]} : vector<8x128xf32> to vector<8x96xf32>
    %359 = arith.negf %358 : vector<8x96xf32>
    %360 = math.exp %359 : vector<8x96xf32>
    %cst_88 = arith.constant 1.000000e+00 : f32
    %361 = vector.broadcast %cst_88 : f32 to vector<8x96xf32>
    %362 = arith.addf %361, %360 : vector<8x96xf32>
    %363 = arith.divf %361, %362 : vector<8x96xf32>
    %364 = vector.extract_strided_slice %349 {offsets = [0, 96], sizes = [8, 32], strides = [1, 1]} : vector<8x128xf32> to vector<8x32xf32>
    %365 = math.tanh %364 : vector<8x32xf32>
    %366 = vector.extract_strided_slice %355 {offsets = [0, 32], sizes = [8, 32], strides = [1, 1]} : vector<8x96xf32> to vector<8x32xf32>
    %367 = arith.mulf %366, %316 : vector<8x32xf32>
    %368 = vector.extract_strided_slice %355 {offsets = [0, 0], sizes = [8, 32], strides = [1, 1]} : vector<8x96xf32> to vector<8x32xf32>
    %369 = arith.mulf %368, %357 : vector<8x32xf32>
    %370 = arith.addf %367, %369 : vector<8x32xf32>
    %371 = vector.extract_strided_slice %363 {offsets = [0, 32], sizes = [8, 32], strides = [1, 1]} : vector<8x96xf32> to vector<8x32xf32>
    %372 = arith.mulf %371, %321 : vector<8x32xf32>
    %373 = vector.extract_strided_slice %363 {offsets = [0, 0], sizes = [8, 32], strides = [1, 1]} : vector<8x96xf32> to vector<8x32xf32>
    %374 = arith.mulf %373, %365 : vector<8x32xf32>
    %375 = arith.addf %372, %374 : vector<8x32xf32>
    %376 = vector.extract_strided_slice %355 {offsets = [0, 64], sizes = [8, 32], strides = [1, 1]} : vector<8x96xf32> to vector<8x32xf32>
    %377 = math.tanh %370 : vector<8x32xf32>
    %378 = arith.mulf %376, %377 : vector<8x32xf32>
    %379 = vector.extract_strided_slice %363 {offsets = [0, 64], sizes = [8, 32], strides = [1, 1]} : vector<8x96xf32> to vector<8x32xf32>
    %380 = math.tanh %375 : vector<8x32xf32>
    %381 = arith.mulf %379, %380 : vector<8x32xf32>
    %382 = arith.index_cast %336 : i32 to index
    %c0_89 = arith.constant 0 : index
    %383 = vector.load %arg6[%382, %c0_89] : memref<64x32xf32, #tpu.memory_space<vmem>>, vector<8x32xf32>
    tpu.vector_store %arg6[%382, %c0_89], %378 {strides = array<i32>} : memref<64x32xf32, #tpu.memory_space<vmem>>, vector<8x32xf32>,
    %384 = arith.index_cast %339 : i32 to index
    %c0_90 = arith.constant 0 : index
    %385 = vector.load %arg7[%384, %c0_90] : memref<64x32xf32, #tpu.memory_space<vmem>>, vector<8x32xf32>
    tpu.vector_store %arg7[%384, %c0_90], %381 {strides = array<i32>} : memref<64x32xf32, #tpu.memory_space<vmem>>, vector<8x32xf32>,
    %386 = tpu.concatenate %378, %381 in 1 : vector<8x32xf32>, vector<8x32xf32> -> vector<8x64xf32>
    %c7_i32_91 = arith.constant 7 : i32
    %c0_92 = arith.constant 0 : index
    %c0_93 = arith.constant 0 : index
    %387 = vector.load %arg2[%c0_92, %c0_93] : memref<64x256xf32, #tpu.memory_space<vmem>>, vector<64x256xf32>
    %cst_94 = arith.constant dense<0.000000e+00> : vector<8x256xf32>
    %388 = tpu.matmul %386, %387, %cst_94 {dimension_numbers = #tpu.dot_dimension_numbers<[1], [0], [0], [1], [0, 0, 1, 1], [], []>} : vector<8x64xf32>, vector<64x256xf32>, vector<8x256xf32> -> vector<8x256xf32>
    %c8_i32_95 = arith.constant 8 : i32
    %389 = arith.muli %c7_i32_91, %c8_i32_95 : i32
    %390 = tpu.assume_multiple %389, 8 : i32
    %c7_i32_96 = arith.constant 7 : i32
    %391 = arith.subi %c7_i32_96, %c7_i32_91 : i32
    %c8_i32_97 = arith.constant 8 : i32
    %392 = arith.muli %391, %c8_i32_97 : i32
    %393 = tpu.assume_multiple %392, 8 : i32
    %394 = arith.index_cast %390 : i32 to index
    %c0_98 = arith.constant 0 : index
    %395 = vector.load %arg5[%394, %c0_98] : memref<64x256xf32, #tpu.memory_space<vmem>>, vector<8x256xf32>
    %396 = arith.index_cast %393 : i32 to index
    %c0_99 = arith.constant 0 : index
    %397 = vector.load %arg5[%396, %c0_99] : memref<64x256xf32, #tpu.memory_space<vmem>>, vector<8x256xf32>
    %398 = vector.extract_strided_slice %395 {offsets = [0, 0], sizes = [8, 128], strides = [1, 1]} : vector<8x256xf32> to vector<8x128xf32>
    %399 = vector.extract_strided_slice %388 {offsets = [0, 0], sizes = [8, 128], strides = [1, 1]} : vector<8x256xf32> to vector<8x128xf32>
    %400 = arith.addf %398, %399 : vector<8x128xf32>
    %401 = vector.extract_strided_slice %397 {offsets = [0, 128], sizes = [8, 128], strides = [1, 1]} : vector<8x256xf32> to vector<8x128xf32>
    %402 = vector.extract_strided_slice %388 {offsets = [0, 128], sizes = [8, 128], strides = [1, 1]} : vector<8x256xf32> to vector<8x128xf32>
    %403 = arith.addf %401, %402 : vector<8x128xf32>
    %404 = vector.extract_strided_slice %400 {offsets = [0, 0], sizes = [8, 96], strides = [1, 1]} : vector<8x128xf32> to vector<8x96xf32>
    %405 = arith.negf %404 : vector<8x96xf32>
    %406 = math.exp %405 : vector<8x96xf32>
    %cst_100 = arith.constant 1.000000e+00 : f32
    %407 = vector.broadcast %cst_100 : f32 to vector<8x96xf32>
    %408 = arith.addf %407, %406 : vector<8x96xf32>
    %409 = arith.divf %407, %408 : vector<8x96xf32>
    %410 = vector.extract_strided_slice %400 {offsets = [0, 96], sizes = [8, 32], strides = [1, 1]} : vector<8x128xf32> to vector<8x32xf32>
    %411 = math.tanh %410 : vector<8x32xf32>
    %412 = vector.extract_strided_slice %403 {offsets = [0, 0], sizes = [8, 96], strides = [1, 1]} : vector<8x128xf32> to vector<8x96xf32>
    %413 = arith.negf %412 : vector<8x96xf32>
    %414 = math.exp %413 : vector<8x96xf32>
    %cst_101 = arith.constant 1.000000e+00 : f32
    %415 = vector.broadcast %cst_101 : f32 to vector<8x96xf32>
    %416 = arith.addf %415, %414 : vector<8x96xf32>
    %417 = arith.divf %415, %416 : vector<8x96xf32>
    %418 = vector.extract_strided_slice %403 {offsets = [0, 96], sizes = [8, 32], strides = [1, 1]} : vector<8x128xf32> to vector<8x32xf32>
    %419 = math.tanh %418 : vector<8x32xf32>
    %420 = vector.extract_strided_slice %409 {offsets = [0, 32], sizes = [8, 32], strides = [1, 1]} : vector<8x96xf32> to vector<8x32xf32>
    %421 = arith.mulf %420, %370 : vector<8x32xf32>
    %422 = vector.extract_strided_slice %409 {offsets = [0, 0], sizes = [8, 32], strides = [1, 1]} : vector<8x96xf32> to vector<8x32xf32>
    %423 = arith.mulf %422, %411 : vector<8x32xf32>
    %424 = arith.addf %421, %423 : vector<8x32xf32>
    %425 = vector.extract_strided_slice %417 {offsets = [0, 32], sizes = [8, 32], strides = [1, 1]} : vector<8x96xf32> to vector<8x32xf32>
    %426 = arith.mulf %425, %375 : vector<8x32xf32>
    %427 = vector.extract_strided_slice %417 {offsets = [0, 0], sizes = [8, 32], strides = [1, 1]} : vector<8x96xf32> to vector<8x32xf32>
    %428 = arith.mulf %427, %419 : vector<8x32xf32>
    %429 = arith.addf %426, %428 : vector<8x32xf32>
    %430 = vector.extract_strided_slice %409 {offsets = [0, 64], sizes = [8, 32], strides = [1, 1]} : vector<8x96xf32> to vector<8x32xf32>
    %431 = math.tanh %424 : vector<8x32xf32>
    %432 = arith.mulf %430, %431 : vector<8x32xf32>
    %433 = vector.extract_strided_slice %417 {offsets = [0, 64], sizes = [8, 32], strides = [1, 1]} : vector<8x96xf32> to vector<8x32xf32>
    %434 = math.tanh %429 : vector<8x32xf32>
    %435 = arith.mulf %433, %434 : vector<8x32xf32>
    %436 = arith.index_cast %390 : i32 to index
    %c0_102 = arith.constant 0 : index
    %437 = vector.load %arg6[%436, %c0_102] : memref<64x32xf32, #tpu.memory_space<vmem>>, vector<8x32xf32>
    tpu.vector_store %arg6[%436, %c0_102], %432 {strides = array<i32>} : memref<64x32xf32, #tpu.memory_space<vmem>>, vector<8x32xf32>,
    %438 = arith.index_cast %393 : i32 to index
    %c0_103 = arith.constant 0 : index
    %439 = vector.load %arg7[%438, %c0_103] : memref<64x32xf32, #tpu.memory_space<vmem>>, vector<8x32xf32>
    tpu.vector_store %arg7[%438, %c0_103], %435 {strides = array<i32>} : memref<64x32xf32, #tpu.memory_space<vmem>>, vector<8x32xf32>,
    %440 = tpu.concatenate %432, %435 in 1 : vector<8x32xf32>, vector<8x32xf32> -> vector<8x64xf32>
    %c8_i32_104 = arith.constant 8 : i32
    %c0_105 = arith.constant 0 : index
    %c0_106 = arith.constant 0 : index
    %441 = vector.load %arg6[%c0_105, %c0_106] : memref<64x32xf32, #tpu.memory_space<vmem>>, vector<64x32xf32>
    %c0_107 = arith.constant 0 : index
    %c0_108 = arith.constant 0 : index
    %442 = vector.load %arg7[%c0_107, %c0_108] : memref<64x32xf32, #tpu.memory_space<vmem>>, vector<64x32xf32>
    %443 = tpu.concatenate %441, %442 in 1 : vector<64x32xf32>, vector<64x32xf32> -> vector<64x64xf32>
    %c0_109 = arith.constant 0 : index
    %c0_110 = arith.constant 0 : index
    %444 = vector.load %arg4[%c0_109, %c0_110] : memref<64x64xf32, #tpu.memory_space<vmem>>, vector<64x64xf32>
    tpu.vector_store %arg4[%c0_109, %c0_110], %443 {strides = array<i32>} : memref<64x64xf32, #tpu.memory_space<vmem>>, vector<64x64xf32>,
    return
  }
}

module attributes {stable_mosaic.version = 11 : i64} {
  func.func @_last_bilstm_fc_kernel(%arg0: memref<64x64xf32, #tpu.memory_space<vmem>>, %arg1: memref<64x128xf32, #tpu.memory_space<vmem>>, %arg2: memref<32x128xf32, #tpu.memory_space<vmem>>, %arg3: memref<1x128xf32, #tpu.memory_space<vmem>>, %arg4: memref<64x128xf32, #tpu.memory_space<vmem>>, %arg5: memref<1x128xf32, #tpu.memory_space<vmem>>, %arg6: memref<64x6xf32, #tpu.memory_space<vmem>>, %arg7: memref<1x6xf32, #tpu.memory_space<vmem>>, %arg8: memref<8x6xf32, #tpu.memory_space<vmem>>, %arg9: memref<64x128xf32, #tpu.memory_space<vmem>>) attributes {dimension_semantics = [], scalar_prefetch = 0 : i64, scratch_operands = 1 : i64, tpu.core_type = #tpu.core_type<tc>} {
    %c0 = arith.constant 0 : index
    %c0_0 = arith.constant 0 : index
    %0 = vector.load %arg0[%c0, %c0_0] : memref<64x64xf32, #tpu.memory_space<vmem>>, vector<64x64xf32>
    %c0_1 = arith.constant 0 : index
    %c0_2 = arith.constant 0 : index
    %1 = vector.load %arg1[%c0_1, %c0_2] : memref<64x128xf32, #tpu.memory_space<vmem>>, vector<64x128xf32>
    %cst = arith.constant dense<0.000000e+00> : vector<64x128xf32>
    %2 = tpu.matmul %0, %1, %cst {dimension_numbers = #tpu.dot_dimension_numbers<[1], [0], [0], [1], [0, 0, 1, 1], [], []>} : vector<64x64xf32>, vector<64x128xf32>, vector<64x128xf32> -> vector<64x128xf32>
    %c0_3 = arith.constant 0 : index
    %c0_4 = arith.constant 0 : index
    %3 = vector.load %arg3[%c0_3, %c0_4] : memref<1x128xf32, #tpu.memory_space<vmem>>, vector<1x128xf32>
    %4 = vector.broadcast %3 : vector<1x128xf32> to vector<64x128xf32>
    %5 = arith.addf %2, %4 : vector<64x128xf32>
    %c0_5 = arith.constant 0 : index
    %c0_6 = arith.constant 0 : index
    %6 = vector.load %arg9[%c0_5, %c0_6] : memref<64x128xf32, #tpu.memory_space<vmem>>, vector<64x128xf32>
    tpu.vector_store %arg9[%c0_5, %c0_6], %5 {strides = array<i32>} : memref<64x128xf32, #tpu.memory_space<vmem>>, vector<64x128xf32>,
    %cst_7 = arith.constant 0.000000e+00 : f32
    %7 = vector.broadcast %cst_7 : f32 to vector<8x32xf32>
    %c0_i32 = arith.constant 0 : i32
    %c8_i32 = arith.constant 8 : i32
    %8 = arith.muli %c0_i32, %c8_i32 : i32
    %9 = tpu.assume_multiple %8, 8 : i32
    %10 = arith.index_cast %9 : i32 to index
    %c0_8 = arith.constant 0 : index
    %11 = vector.load %arg9[%10, %c0_8] : memref<64x128xf32, #tpu.memory_space<vmem>>, vector<8x128xf32>
    %c0_9 = arith.constant 0 : index
    %c0_10 = arith.constant 0 : index
    %12 = vector.load %arg2[%c0_9, %c0_10] : memref<32x128xf32, #tpu.memory_space<vmem>>, vector<32x128xf32>
    %cst_11 = arith.constant dense<0.000000e+00> : vector<8x128xf32>
    %13 = tpu.matmul %7, %12, %cst_11 {dimension_numbers = #tpu.dot_dimension_numbers<[1], [0], [0], [1], [0, 0, 1, 1], [], []>} : vector<8x32xf32>, vector<32x128xf32>, vector<8x128xf32> -> vector<8x128xf32>
    %14 = arith.addf %11, %13 : vector<8x128xf32>
    %15 = vector.extract_strided_slice %14 {offsets = [0, 0], sizes = [8, 96], strides = [1, 1]} : vector<8x128xf32> to vector<8x96xf32>
    %16 = arith.negf %15 : vector<8x96xf32>
    %17 = math.exp %16 : vector<8x96xf32>
    %cst_12 = arith.constant 1.000000e+00 : f32
    %18 = vector.broadcast %cst_12 : f32 to vector<8x96xf32>
    %19 = arith.addf %18, %17 : vector<8x96xf32>
    %20 = arith.divf %18, %19 : vector<8x96xf32>
    %21 = vector.extract_strided_slice %14 {offsets = [0, 96], sizes = [8, 32], strides = [1, 1]} : vector<8x128xf32> to vector<8x32xf32>
    %22 = math.tanh %21 : vector<8x32xf32>
    %23 = vector.extract_strided_slice %20 {offsets = [0, 32], sizes = [8, 32], strides = [1, 1]} : vector<8x96xf32> to vector<8x32xf32>
    %24 = arith.mulf %23, %7 : vector<8x32xf32>
    %25 = vector.extract_strided_slice %20 {offsets = [0, 0], sizes = [8, 32], strides = [1, 1]} : vector<8x96xf32> to vector<8x32xf32>
    %26 = arith.mulf %25, %22 : vector<8x32xf32>
    %27 = arith.addf %24, %26 : vector<8x32xf32>
    %28 = vector.extract_strided_slice %20 {offsets = [0, 64], sizes = [8, 32], strides = [1, 1]} : vector<8x96xf32> to vector<8x32xf32>
    %29 = math.tanh %27 : vector<8x32xf32>
    %30 = arith.mulf %28, %29 : vector<8x32xf32>
    %c1_i32 = arith.constant 1 : i32
    %c8_i32_13 = arith.constant 8 : i32
    %31 = arith.muli %c1_i32, %c8_i32_13 : i32
    %32 = tpu.assume_multiple %31, 8 : i32
    %33 = arith.index_cast %32 : i32 to index
    %c0_14 = arith.constant 0 : index
    %34 = vector.load %arg9[%33, %c0_14] : memref<64x128xf32, #tpu.memory_space<vmem>>, vector<8x128xf32>
    %c0_15 = arith.constant 0 : index
    %c0_16 = arith.constant 0 : index
    %35 = vector.load %arg2[%c0_15, %c0_16] : memref<32x128xf32, #tpu.memory_space<vmem>>, vector<32x128xf32>
    %cst_17 = arith.constant dense<0.000000e+00> : vector<8x128xf32>
    %36 = tpu.matmul %30, %35, %cst_17 {dimension_numbers = #tpu.dot_dimension_numbers<[1], [0], [0], [1], [0, 0, 1, 1], [], []>} : vector<8x32xf32>, vector<32x128xf32>, vector<8x128xf32> -> vector<8x128xf32>
    %37 = arith.addf %34, %36 : vector<8x128xf32>
    %38 = vector.extract_strided_slice %37 {offsets = [0, 0], sizes = [8, 96], strides = [1, 1]} : vector<8x128xf32> to vector<8x96xf32>
    %39 = arith.negf %38 : vector<8x96xf32>
    %40 = math.exp %39 : vector<8x96xf32>
    %cst_18 = arith.constant 1.000000e+00 : f32
    %41 = vector.broadcast %cst_18 : f32 to vector<8x96xf32>
    %42 = arith.addf %41, %40 : vector<8x96xf32>
    %43 = arith.divf %41, %42 : vector<8x96xf32>
    %44 = vector.extract_strided_slice %37 {offsets = [0, 96], sizes = [8, 32], strides = [1, 1]} : vector<8x128xf32> to vector<8x32xf32>
    %45 = math.tanh %44 : vector<8x32xf32>
    %46 = vector.extract_strided_slice %43 {offsets = [0, 32], sizes = [8, 32], strides = [1, 1]} : vector<8x96xf32> to vector<8x32xf32>
    %47 = arith.mulf %46, %27 : vector<8x32xf32>
    %48 = vector.extract_strided_slice %43 {offsets = [0, 0], sizes = [8, 32], strides = [1, 1]} : vector<8x96xf32> to vector<8x32xf32>
    %49 = arith.mulf %48, %45 : vector<8x32xf32>
    %50 = arith.addf %47, %49 : vector<8x32xf32>
    %51 = vector.extract_strided_slice %43 {offsets = [0, 64], sizes = [8, 32], strides = [1, 1]} : vector<8x96xf32> to vector<8x32xf32>
    %52 = math.tanh %50 : vector<8x32xf32>
    %53 = arith.mulf %51, %52 : vector<8x32xf32>
    %c2_i32 = arith.constant 2 : i32
    %c8_i32_19 = arith.constant 8 : i32
    %54 = arith.muli %c2_i32, %c8_i32_19 : i32
    %55 = tpu.assume_multiple %54, 8 : i32
    %56 = arith.index_cast %55 : i32 to index
    %c0_20 = arith.constant 0 : index
    %57 = vector.load %arg9[%56, %c0_20] : memref<64x128xf32, #tpu.memory_space<vmem>>, vector<8x128xf32>
    %c0_21 = arith.constant 0 : index
    %c0_22 = arith.constant 0 : index
    %58 = vector.load %arg2[%c0_21, %c0_22] : memref<32x128xf32, #tpu.memory_space<vmem>>, vector<32x128xf32>
    %cst_23 = arith.constant dense<0.000000e+00> : vector<8x128xf32>
    %59 = tpu.matmul %53, %58, %cst_23 {dimension_numbers = #tpu.dot_dimension_numbers<[1], [0], [0], [1], [0, 0, 1, 1], [], []>} : vector<8x32xf32>, vector<32x128xf32>, vector<8x128xf32> -> vector<8x128xf32>
    %60 = arith.addf %57, %59 : vector<8x128xf32>
    %61 = vector.extract_strided_slice %60 {offsets = [0, 0], sizes = [8, 96], strides = [1, 1]} : vector<8x128xf32> to vector<8x96xf32>
    %62 = arith.negf %61 : vector<8x96xf32>
    %63 = math.exp %62 : vector<8x96xf32>
    %cst_24 = arith.constant 1.000000e+00 : f32
    %64 = vector.broadcast %cst_24 : f32 to vector<8x96xf32>
    %65 = arith.addf %64, %63 : vector<8x96xf32>
    %66 = arith.divf %64, %65 : vector<8x96xf32>
    %67 = vector.extract_strided_slice %60 {offsets = [0, 96], sizes = [8, 32], strides = [1, 1]} : vector<8x128xf32> to vector<8x32xf32>
    %68 = math.tanh %67 : vector<8x32xf32>
    %69 = vector.extract_strided_slice %66 {offsets = [0, 32], sizes = [8, 32], strides = [1, 1]} : vector<8x96xf32> to vector<8x32xf32>
    %70 = arith.mulf %69, %50 : vector<8x32xf32>
    %71 = vector.extract_strided_slice %66 {offsets = [0, 0], sizes = [8, 32], strides = [1, 1]} : vector<8x96xf32> to vector<8x32xf32>
    %72 = arith.mulf %71, %68 : vector<8x32xf32>
    %73 = arith.addf %70, %72 : vector<8x32xf32>
    %74 = vector.extract_strided_slice %66 {offsets = [0, 64], sizes = [8, 32], strides = [1, 1]} : vector<8x96xf32> to vector<8x32xf32>
    %75 = math.tanh %73 : vector<8x32xf32>
    %76 = arith.mulf %74, %75 : vector<8x32xf32>
    %c3_i32 = arith.constant 3 : i32
    %c8_i32_25 = arith.constant 8 : i32
    %77 = arith.muli %c3_i32, %c8_i32_25 : i32
    %78 = tpu.assume_multiple %77, 8 : i32
    %79 = arith.index_cast %78 : i32 to index
    %c0_26 = arith.constant 0 : index
    %80 = vector.load %arg9[%79, %c0_26] : memref<64x128xf32, #tpu.memory_space<vmem>>, vector<8x128xf32>
    %c0_27 = arith.constant 0 : index
    %c0_28 = arith.constant 0 : index
    %81 = vector.load %arg2[%c0_27, %c0_28] : memref<32x128xf32, #tpu.memory_space<vmem>>, vector<32x128xf32>
    %cst_29 = arith.constant dense<0.000000e+00> : vector<8x128xf32>
    %82 = tpu.matmul %76, %81, %cst_29 {dimension_numbers = #tpu.dot_dimension_numbers<[1], [0], [0], [1], [0, 0, 1, 1], [], []>} : vector<8x32xf32>, vector<32x128xf32>, vector<8x128xf32> -> vector<8x128xf32>
    %83 = arith.addf %80, %82 : vector<8x128xf32>
    %84 = vector.extract_strided_slice %83 {offsets = [0, 0], sizes = [8, 96], strides = [1, 1]} : vector<8x128xf32> to vector<8x96xf32>
    %85 = arith.negf %84 : vector<8x96xf32>
    %86 = math.exp %85 : vector<8x96xf32>
    %cst_30 = arith.constant 1.000000e+00 : f32
    %87 = vector.broadcast %cst_30 : f32 to vector<8x96xf32>
    %88 = arith.addf %87, %86 : vector<8x96xf32>
    %89 = arith.divf %87, %88 : vector<8x96xf32>
    %90 = vector.extract_strided_slice %83 {offsets = [0, 96], sizes = [8, 32], strides = [1, 1]} : vector<8x128xf32> to vector<8x32xf32>
    %91 = math.tanh %90 : vector<8x32xf32>
    %92 = vector.extract_strided_slice %89 {offsets = [0, 32], sizes = [8, 32], strides = [1, 1]} : vector<8x96xf32> to vector<8x32xf32>
    %93 = arith.mulf %92, %73 : vector<8x32xf32>
    %94 = vector.extract_strided_slice %89 {offsets = [0, 0], sizes = [8, 32], strides = [1, 1]} : vector<8x96xf32> to vector<8x32xf32>
    %95 = arith.mulf %94, %91 : vector<8x32xf32>
    %96 = arith.addf %93, %95 : vector<8x32xf32>
    %97 = vector.extract_strided_slice %89 {offsets = [0, 64], sizes = [8, 32], strides = [1, 1]} : vector<8x96xf32> to vector<8x32xf32>
    %98 = math.tanh %96 : vector<8x32xf32>
    %99 = arith.mulf %97, %98 : vector<8x32xf32>
    %c4_i32 = arith.constant 4 : i32
    %c8_i32_31 = arith.constant 8 : i32
    %100 = arith.muli %c4_i32, %c8_i32_31 : i32
    %101 = tpu.assume_multiple %100, 8 : i32
    %102 = arith.index_cast %101 : i32 to index
    %c0_32 = arith.constant 0 : index
    %103 = vector.load %arg9[%102, %c0_32] : memref<64x128xf32, #tpu.memory_space<vmem>>, vector<8x128xf32>
    %c0_33 = arith.constant 0 : index
    %c0_34 = arith.constant 0 : index
    %104 = vector.load %arg2[%c0_33, %c0_34] : memref<32x128xf32, #tpu.memory_space<vmem>>, vector<32x128xf32>
    %cst_35 = arith.constant dense<0.000000e+00> : vector<8x128xf32>
    %105 = tpu.matmul %99, %104, %cst_35 {dimension_numbers = #tpu.dot_dimension_numbers<[1], [0], [0], [1], [0, 0, 1, 1], [], []>} : vector<8x32xf32>, vector<32x128xf32>, vector<8x128xf32> -> vector<8x128xf32>
    %106 = arith.addf %103, %105 : vector<8x128xf32>
    %107 = vector.extract_strided_slice %106 {offsets = [0, 0], sizes = [8, 96], strides = [1, 1]} : vector<8x128xf32> to vector<8x96xf32>
    %108 = arith.negf %107 : vector<8x96xf32>
    %109 = math.exp %108 : vector<8x96xf32>
    %cst_36 = arith.constant 1.000000e+00 : f32
    %110 = vector.broadcast %cst_36 : f32 to vector<8x96xf32>
    %111 = arith.addf %110, %109 : vector<8x96xf32>
    %112 = arith.divf %110, %111 : vector<8x96xf32>
    %113 = vector.extract_strided_slice %106 {offsets = [0, 96], sizes = [8, 32], strides = [1, 1]} : vector<8x128xf32> to vector<8x32xf32>
    %114 = math.tanh %113 : vector<8x32xf32>
    %115 = vector.extract_strided_slice %112 {offsets = [0, 32], sizes = [8, 32], strides = [1, 1]} : vector<8x96xf32> to vector<8x32xf32>
    %116 = arith.mulf %115, %96 : vector<8x32xf32>
    %117 = vector.extract_strided_slice %112 {offsets = [0, 0], sizes = [8, 32], strides = [1, 1]} : vector<8x96xf32> to vector<8x32xf32>
    %118 = arith.mulf %117, %114 : vector<8x32xf32>
    %119 = arith.addf %116, %118 : vector<8x32xf32>
    %120 = vector.extract_strided_slice %112 {offsets = [0, 64], sizes = [8, 32], strides = [1, 1]} : vector<8x96xf32> to vector<8x32xf32>
    %121 = math.tanh %119 : vector<8x32xf32>
    %122 = arith.mulf %120, %121 : vector<8x32xf32>
    %c5_i32 = arith.constant 5 : i32
    %c8_i32_37 = arith.constant 8 : i32
    %123 = arith.muli %c5_i32, %c8_i32_37 : i32
    %124 = tpu.assume_multiple %123, 8 : i32
    %125 = arith.index_cast %124 : i32 to index
    %c0_38 = arith.constant 0 : index
    %126 = vector.load %arg9[%125, %c0_38] : memref<64x128xf32, #tpu.memory_space<vmem>>, vector<8x128xf32>
    %c0_39 = arith.constant 0 : index
    %c0_40 = arith.constant 0 : index
    %127 = vector.load %arg2[%c0_39, %c0_40] : memref<32x128xf32, #tpu.memory_space<vmem>>, vector<32x128xf32>
    %cst_41 = arith.constant dense<0.000000e+00> : vector<8x128xf32>
    %128 = tpu.matmul %122, %127, %cst_41 {dimension_numbers = #tpu.dot_dimension_numbers<[1], [0], [0], [1], [0, 0, 1, 1], [], []>} : vector<8x32xf32>, vector<32x128xf32>, vector<8x128xf32> -> vector<8x128xf32>
    %129 = arith.addf %126, %128 : vector<8x128xf32>
    %130 = vector.extract_strided_slice %129 {offsets = [0, 0], sizes = [8, 96], strides = [1, 1]} : vector<8x128xf32> to vector<8x96xf32>
    %131 = arith.negf %130 : vector<8x96xf32>
    %132 = math.exp %131 : vector<8x96xf32>
    %cst_42 = arith.constant 1.000000e+00 : f32
    %133 = vector.broadcast %cst_42 : f32 to vector<8x96xf32>
    %134 = arith.addf %133, %132 : vector<8x96xf32>
    %135 = arith.divf %133, %134 : vector<8x96xf32>
    %136 = vector.extract_strided_slice %129 {offsets = [0, 96], sizes = [8, 32], strides = [1, 1]} : vector<8x128xf32> to vector<8x32xf32>
    %137 = math.tanh %136 : vector<8x32xf32>
    %138 = vector.extract_strided_slice %135 {offsets = [0, 32], sizes = [8, 32], strides = [1, 1]} : vector<8x96xf32> to vector<8x32xf32>
    %139 = arith.mulf %138, %119 : vector<8x32xf32>
    %140 = vector.extract_strided_slice %135 {offsets = [0, 0], sizes = [8, 32], strides = [1, 1]} : vector<8x96xf32> to vector<8x32xf32>
    %141 = arith.mulf %140, %137 : vector<8x32xf32>
    %142 = arith.addf %139, %141 : vector<8x32xf32>
    %143 = vector.extract_strided_slice %135 {offsets = [0, 64], sizes = [8, 32], strides = [1, 1]} : vector<8x96xf32> to vector<8x32xf32>
    %144 = math.tanh %142 : vector<8x32xf32>
    %145 = arith.mulf %143, %144 : vector<8x32xf32>
    %c6_i32 = arith.constant 6 : i32
    %c8_i32_43 = arith.constant 8 : i32
    %146 = arith.muli %c6_i32, %c8_i32_43 : i32
    %147 = tpu.assume_multiple %146, 8 : i32
    %148 = arith.index_cast %147 : i32 to index
    %c0_44 = arith.constant 0 : index
    %149 = vector.load %arg9[%148, %c0_44] : memref<64x128xf32, #tpu.memory_space<vmem>>, vector<8x128xf32>
    %c0_45 = arith.constant 0 : index
    %c0_46 = arith.constant 0 : index
    %150 = vector.load %arg2[%c0_45, %c0_46] : memref<32x128xf32, #tpu.memory_space<vmem>>, vector<32x128xf32>
    %cst_47 = arith.constant dense<0.000000e+00> : vector<8x128xf32>
    %151 = tpu.matmul %145, %150, %cst_47 {dimension_numbers = #tpu.dot_dimension_numbers<[1], [0], [0], [1], [0, 0, 1, 1], [], []>} : vector<8x32xf32>, vector<32x128xf32>, vector<8x128xf32> -> vector<8x128xf32>
    %152 = arith.addf %149, %151 : vector<8x128xf32>
    %153 = vector.extract_strided_slice %152 {offsets = [0, 0], sizes = [8, 96], strides = [1, 1]} : vector<8x128xf32> to vector<8x96xf32>
    %154 = arith.negf %153 : vector<8x96xf32>
    %155 = math.exp %154 : vector<8x96xf32>
    %cst_48 = arith.constant 1.000000e+00 : f32
    %156 = vector.broadcast %cst_48 : f32 to vector<8x96xf32>
    %157 = arith.addf %156, %155 : vector<8x96xf32>
    %158 = arith.divf %156, %157 : vector<8x96xf32>
    %159 = vector.extract_strided_slice %152 {offsets = [0, 96], sizes = [8, 32], strides = [1, 1]} : vector<8x128xf32> to vector<8x32xf32>
    %160 = math.tanh %159 : vector<8x32xf32>
    %161 = vector.extract_strided_slice %158 {offsets = [0, 32], sizes = [8, 32], strides = [1, 1]} : vector<8x96xf32> to vector<8x32xf32>
    %162 = arith.mulf %161, %142 : vector<8x32xf32>
    %163 = vector.extract_strided_slice %158 {offsets = [0, 0], sizes = [8, 32], strides = [1, 1]} : vector<8x96xf32> to vector<8x32xf32>
    %164 = arith.mulf %163, %160 : vector<8x32xf32>
    %165 = arith.addf %162, %164 : vector<8x32xf32>
    %166 = vector.extract_strided_slice %158 {offsets = [0, 64], sizes = [8, 32], strides = [1, 1]} : vector<8x96xf32> to vector<8x32xf32>
    %167 = math.tanh %165 : vector<8x32xf32>
    %168 = arith.mulf %166, %167 : vector<8x32xf32>
    %c7_i32 = arith.constant 7 : i32
    %c8_i32_49 = arith.constant 8 : i32
    %169 = arith.muli %c7_i32, %c8_i32_49 : i32
    %170 = tpu.assume_multiple %169, 8 : i32
    %171 = arith.index_cast %170 : i32 to index
    %c0_50 = arith.constant 0 : index
    %172 = vector.load %arg9[%171, %c0_50] : memref<64x128xf32, #tpu.memory_space<vmem>>, vector<8x128xf32>
    %c0_51 = arith.constant 0 : index
    %c0_52 = arith.constant 0 : index
    %173 = vector.load %arg2[%c0_51, %c0_52] : memref<32x128xf32, #tpu.memory_space<vmem>>, vector<32x128xf32>
    %cst_53 = arith.constant dense<0.000000e+00> : vector<8x128xf32>
    %174 = tpu.matmul %168, %173, %cst_53 {dimension_numbers = #tpu.dot_dimension_numbers<[1], [0], [0], [1], [0, 0, 1, 1], [], []>} : vector<8x32xf32>, vector<32x128xf32>, vector<8x128xf32> -> vector<8x128xf32>
    %175 = arith.addf %172, %174 : vector<8x128xf32>
    %176 = vector.extract_strided_slice %175 {offsets = [0, 0], sizes = [8, 96], strides = [1, 1]} : vector<8x128xf32> to vector<8x96xf32>
    %177 = arith.negf %176 : vector<8x96xf32>
    %178 = math.exp %177 : vector<8x96xf32>
    %cst_54 = arith.constant 1.000000e+00 : f32
    %179 = vector.broadcast %cst_54 : f32 to vector<8x96xf32>
    %180 = arith.addf %179, %178 : vector<8x96xf32>
    %181 = arith.divf %179, %180 : vector<8x96xf32>
    %182 = vector.extract_strided_slice %175 {offsets = [0, 96], sizes = [8, 32], strides = [1, 1]} : vector<8x128xf32> to vector<8x32xf32>
    %183 = math.tanh %182 : vector<8x32xf32>
    %184 = vector.extract_strided_slice %181 {offsets = [0, 32], sizes = [8, 32], strides = [1, 1]} : vector<8x96xf32> to vector<8x32xf32>
    %185 = arith.mulf %184, %165 : vector<8x32xf32>
    %186 = vector.extract_strided_slice %181 {offsets = [0, 0], sizes = [8, 32], strides = [1, 1]} : vector<8x96xf32> to vector<8x32xf32>
    %187 = arith.mulf %186, %183 : vector<8x32xf32>
    %188 = arith.addf %185, %187 : vector<8x32xf32>
    %189 = vector.extract_strided_slice %181 {offsets = [0, 64], sizes = [8, 32], strides = [1, 1]} : vector<8x96xf32> to vector<8x32xf32>
    %190 = math.tanh %188 : vector<8x32xf32>
    %191 = arith.mulf %189, %190 : vector<8x32xf32>
    %c8_i32_55 = arith.constant 8 : i32
    %c56 = arith.constant 56 : index
    %c0_56 = arith.constant 0 : index
    %192 = vector.load %arg0[%c56, %c0_56] : memref<64x64xf32, #tpu.memory_space<vmem>>, vector<8x64xf32>
    %c0_57 = arith.constant 0 : index
    %c0_58 = arith.constant 0 : index
    %193 = vector.load %arg4[%c0_57, %c0_58] : memref<64x128xf32, #tpu.memory_space<vmem>>, vector<64x128xf32>
    %cst_59 = arith.constant dense<0.000000e+00> : vector<8x128xf32>
    %194 = tpu.matmul %192, %193, %cst_59 {dimension_numbers = #tpu.dot_dimension_numbers<[1], [0], [0], [1], [0, 0, 1, 1], [], []>} : vector<8x64xf32>, vector<64x128xf32>, vector<8x128xf32> -> vector<8x128xf32>
    %c0_60 = arith.constant 0 : index
    %c0_61 = arith.constant 0 : index
    %195 = vector.load %arg5[%c0_60, %c0_61] : memref<1x128xf32, #tpu.memory_space<vmem>>, vector<1x128xf32>
    %196 = vector.broadcast %195 : vector<1x128xf32> to vector<8x128xf32>
    %197 = arith.addf %194, %196 : vector<8x128xf32>
    %198 = vector.extract_strided_slice %197 {offsets = [0, 0], sizes = [8, 96], strides = [1, 1]} : vector<8x128xf32> to vector<8x96xf32>
    %199 = arith.negf %198 : vector<8x96xf32>
    %200 = math.exp %199 : vector<8x96xf32>
    %cst_62 = arith.constant 1.000000e+00 : f32
    %201 = vector.broadcast %cst_62 : f32 to vector<8x96xf32>
    %202 = arith.addf %201, %200 : vector<8x96xf32>
    %203 = arith.divf %201, %202 : vector<8x96xf32>
    %204 = vector.extract_strided_slice %197 {offsets = [0, 96], sizes = [8, 32], strides = [1, 1]} : vector<8x128xf32> to vector<8x32xf32>
    %205 = math.tanh %204 : vector<8x32xf32>
    %206 = vector.extract_strided_slice %203 {offsets = [0, 0], sizes = [8, 32], strides = [1, 1]} : vector<8x96xf32> to vector<8x32xf32>
    %207 = arith.mulf %206, %205 : vector<8x32xf32>
    %208 = vector.extract_strided_slice %203 {offsets = [0, 64], sizes = [8, 32], strides = [1, 1]} : vector<8x96xf32> to vector<8x32xf32>
    %209 = math.tanh %207 : vector<8x32xf32>
    %210 = arith.mulf %208, %209 : vector<8x32xf32>
    %211 = tpu.concatenate %191, %210 in 1 : vector<8x32xf32>, vector<8x32xf32> -> vector<8x64xf32>
    %c0_63 = arith.constant 0 : index
    %c0_64 = arith.constant 0 : index
    %212 = vector.load %arg6[%c0_63, %c0_64] : memref<64x6xf32, #tpu.memory_space<vmem>>, vector<64x6xf32>
    %cst_65 = arith.constant dense<0.000000e+00> : vector<8x6xf32>
    %213 = tpu.matmul %211, %212, %cst_65 {dimension_numbers = #tpu.dot_dimension_numbers<[1], [0], [0], [1], [0, 0, 1, 1], [], []>} : vector<8x64xf32>, vector<64x6xf32>, vector<8x6xf32> -> vector<8x6xf32>
    %c0_66 = arith.constant 0 : index
    %c0_67 = arith.constant 0 : index
    %214 = vector.load %arg7[%c0_66, %c0_67] : memref<1x6xf32, #tpu.memory_space<vmem>>, vector<1x6xf32>
    %215 = vector.broadcast %214 : vector<1x6xf32> to vector<8x6xf32>
    %216 = arith.addf %213, %215 : vector<8x6xf32>
    %c0_68 = arith.constant 0 : index
    %c0_69 = arith.constant 0 : index
    %217 = vector.load %arg8[%c0_68, %c0_69] : memref<8x6xf32, #tpu.memory_space<vmem>>, vector<8x6xf32>
    tpu.vector_store %arg8[%c0_68, %c0_69], %216 {strides = array<i32>} : memref<8x6xf32, #tpu.memory_space<vmem>>, vector<8x6xf32>,
    return
  }
}

</mosaic_0001>

<bundles_post_ra>
// kernel: lstm_model_multistep_forward.3
= control target key start
LH: loop header
LB: loop body
LE: loop exit
PB: predicated region body
PF: predicated region fallthrough
CT: control target
= control target key end

     0   :  { %v1641_v3 = vmov 0.0|0.0   ;;  %vm1642_vm0 = vmmov 0   ;;  %v1643_v4 = vmov 0.0   ;;  %vm52_vm1 = vcmask 523264   ;;  %s1644_s11 = smov 32   ;;  %s1956_s1 = inlined_call_operand.vmem [shape: f32[64,128], index: 1, kind: input, shape index: {}]   ;;  %s1957_s2 = inlined_call_operand.vmem [shape: f32[32,128], index: 2, kind: input, shape index: {}]   ;;  %s1958_s0 = inlined_call_operand.vmem [shape: f32[64,64], index: 0, kind: input, shape index: {}]   ;;  %s1959_s3 = inlined_call_operand.vmem [shape: f32[1,128], index: 3, kind: input, shape index: {}]   ;;  %s1960_s4 = inlined_call_operand.vmem [shape: f32[64,128], index: 4, kind: input, shape index: {}]   ;;  %s1961_s5 = inlined_call_operand.vmem [shape: f32[1,128], index: 5, kind: input, shape index: {}]   ;;  %s1962_s6 = inlined_call_operand.vmem [shape: f32[64,6], index: 6, kind: input, shape index: {}]   ;;  %s1963_s7 = inlined_call_operand.vmem [shape: f32[1,6], index: 7, kind: input, shape index: {}]   ;;  %s1964_s8 = inlined_call_operand.vmem [shape: f32[8,6], index: 8, kind: output, shape index: {}]  }
   0x1   :  { %v37_v0 = vld [vmem:[%s1956_s1] sm:$0xff]  ;;  %v38_v1 = vld [vmem:[%s1956_s1 + $0x8] sm:$0xff]  ;;  %v39_v2 = vld [vmem:[%s1956_s1 + $0x10] sm:$0xff]  ;;  %1491 = vmatprep.subr.bf16.mxu1 %v1641_v3  ;;  %1357 = vmatprep.mubr.msk.f32.mxu1 %vm1642_vm0, %v1643_v4  ;;  %vm195_vm2 = vcmask 261120   ;;  %vm1212_vm3 = vcmask 48128  }
   0x2   :  { %v1475_v5 = vpack.c.bf16 %v38_v1, %v37_v0  ;;  %v40_v6 = vld [vmem:[%s1956_s1 + $0x18] sm:$0xff]  ;;  %v41_v7 = vld [vmem:[%s1956_s1 + $0x20] sm:$0xff]  ;;  %v42_v9 = vld [vmem:[%s1956_s1 + $0x28] sm:$0xff] }
   0x3   :  { %v1479_v8 = vpack.c.bf16 %v40_v6, %v39_v2  ;;  %v191_v10 = vld [vmem:[%s1957_s2] sm:$0xff]  ;;  %v192_v11 = vld [vmem:[%s1957_s2 + $0x8] sm:$0xff]  ;;  %v193_v14 = vld [vmem:[%s1957_s2 + $0x10] sm:$0xff]  ;;  %v1483_v16 = vpack.c.bf16 %v42_v9, %v41_v7 }
   0x4   :  { %1476 = vmatprep.subr.bf16.mxu0 %v1475_v5  ;;  %v1719_v12 = vpack.c.bf16 %v192_v11, %v191_v10  ;;  %v29_v13 = vld [vmem:[%s1958_s0] sm:$0xff]  ;;  %v194_v15 = vld [vmem:[%s1957_s2 + $0x18] sm:$0xff]  ;;  %v43_v18 = vld [vmem:[%s1956_s1 + $0x30] sm:$0xff] }
   0x5   :  { %1478 = vmatpush3.bf16.msra.mxu0 %v1475_v5  ;;  %1337 = vmatprep.mubr.msk.f32.mxu0 %vm52_vm1, %v29_v13  ;;  %v1732_v17 = vpack.c.bf16 %v194_v15, %v193_v14  ;;  %v44_v19 = vld [vmem:[%s1956_s1 + $0x38] sm:$0xff]  ;;  %v30_v21 = vld [vmem:[%s1958_s0 + $0x8] sm:$0xff]  ;;  %v1762_v24 = vld [vmem:[%s1959_s3] ss:$0 sm:$0xff]  ;;  %s1645_s3 = smov 64   ;;  %s1646_s1 = smov 96  }
   0x6   :  { %1480 = vmatprep.subr.bf16.mxu0 %v1479_v8  ;;  %1493 = vmatpush3.bf16.msra.mxu1 %v1719_v12  ;;  %v1487_v20 = vpack.c.bf16 %v44_v19, %v43_v18  ;;  %v31_v57 = vld [vmem:[%s1958_s0 + $0x10] sm:$0xff]  ;;  %v32_v58 = vld [vmem:[%s1958_s0 + $0x18] sm:$0xff]  ;;  %v33_v19 = vld [vmem:[%s1958_s0 + $0x20] sm:$0xff] }
   0x7   :  { %1494 = vmatprep.subr.bf16.mxu1 %v1641_v3 }
   0x9   :  { %1482 = vmatpush3.bf16.msra.mxu0 %v1479_v8 }
   0xa   :  { %1484 = vmatprep.subr.bf16.mxu0 %v1483_v16  ;;  %1496 = vmatpush3.bf16.msra.mxu1 %v1732_v17 }
   0xb   :  { %1497 = vmatprep.subr.bf16.mxu1 %v1641_v3 }
   0xd   :  { %1486 = vmatpush3.bf16.msra.mxu0 %v1483_v16  ;;  %1358 = vmatmul.mubr.f32.vlgmr.msra.gmra.mrb[0].mxu1 %v1643_v4 }
   0xe   :  { %1488 = vmatprep.subr.bf16.mxu0 %v1487_v20  ;;  %1499 = vmatpush3.bf16.msra.mxu1 %v1719_v12 }
   0xf   :  { %1500 = vmatprep.subr.bf16.mxu1 %v1641_v3  ;;  %1368 = vmatprep.mubr.msk.f32.mxu1 %vm1642_vm0, %v1643_v4 }
  0x11   :  { %1490 = vmatpush3.bf16.msra.mxu0 %v1487_v20  ;;  %v34_v20 = vld [vmem:[%s1958_s0 + $0x28] sm:$0xff] }
  0x12   :  { %1502 = vmatpush3.bf16.msra.mxu1 %v1732_v17  ;;  %1509 = vmatprep.subr.bf16.mxu0 %v1641_v3 }
  0x13   :  { %1503 = vmatprep.subr.bf16.mxu1 %v1641_v3 }
  0x14   :  { %1338 = vmatmul.mubr.msk.f32.vlgmr.msra.gmra.mrb[0].mxu0 %vm52_vm1, %v30_v21  ;;  %v35_v21 = vld [vmem:[%s1958_s0 + $0x30] sm:$0xff] }
  0x15   :  { %1511 = vmatpush3.bf16.msra.mxu0 %v1719_v12  ;;  %1340 = vmatprep.mubr.msk.f32.mxu0 %vm52_vm1, %v31_v57 }
  0x16   :  { %1512 = vmatprep.subr.bf16.mxu0 %v1641_v3 }
  0x18   :  { %1341 = vmatmul.mubr.msk.f32.gmra.mrb[2].mxu0 %vm52_vm1, %v32_v58 }
  0x19   :  { %1514 = vmatpush3.bf16.msra.mxu0 %v1732_v17  ;;  %1343 = vmatprep.mubr.msk.f32.mxu0 %vm52_vm1, %v33_v19 }
  0x1a   :  { %1521 = vmatprep.subr.bf16.mxu0 %v1641_v3 }
  0x1c   :  { %1344 = vmatmul.mubr.msk.f32.gmra.mrb[4].mxu0 %vm52_vm1, %v34_v20 }
  0x1d   :  { %1346 = vmatprep.mubr.msk.f32.mxu0 %vm52_vm1, %v35_v21 }
  0xe0   :  { %v265_v22 = vpop.f32.mrb[0].mxu1 }
  0xe1   :  { %v1359_v23 = vpop.f32.mrb[1].mxu1 }
  0xe7   :  { %v1339_v25 = vpop.f32.mrb[0].mxu0 }
  0xe8   :  { %v143_v26 = vpop.f32.mrb[1].mxu0  ;;  %v149_v43 = vadd.f32 %v1339_v25, %v1762_v24 }
  0xe9   :  { %v144_v27 = vadd.f32 %v1762_v24, %v143_v26 }
  0xeb   :  { %v269_v28 = vadd.f32 %v265_v22, %v144_v27  ;;  %v1342_v62 = vpop.f32.mrb[2].mxu0  ;;  %v1814_v22 = vld [vmem:[%s1958_s0 + $0x38] sm:$0xff] }
  0xec   :  { %v153_v63 = vpop.f32.mrb[3].mxu0  ;;  %1347 = vmatmul.mubr.msk.f32.gmra.mrb[6].mxu0 %vm52_vm1, %v1814_v22 }
  0xed   :  { %1569 = vtanh.f32 %v269_v28  ;;  %v1227_v30 = vmul.f32 -1.442695, %v269_v28  ;;  %v154_v1 = vadd.f32 %v1762_v24, %v153_v63  ;;  %1390 = vmatprep.mubr.msk.f32.mxu0 %vm1642_vm0, %v1643_v4 }
  0xef   :  { %1571 = vpow2.f32 %v1227_v30  ;;  %v1822_v27 = vpop.f32.mrb[4].mxu0 }
  0xf0   :  { %v163_v28 = vpop.f32.mrb[5].mxu0 }
  0xf7   :  { %v1570_v29 = vpop.eup %1569 }
  0xf8   :  { %279 = vrot.lane.b32.xlu0 %v1570_v29, %s1644_s11 }
  0xf9   :  { %v1572_v31 = vpop.eup %1571 }
  0xfa   :  { %v273_v32 = vadd.f32 1.0, %v1572_v31 }
  0xfc   :  { %1573 = vrcp.f32 %v273_v32  ;;  %v159_v32 = vadd.f32 %v1342_v62, %v1762_v24 }
 0x106   :  { %v1574_v33 = vpop.eup %1573 }
 0x107   :  { %v277_v36 = vmul.f32 0.0, %v1574_v33 }
 0x16a   :  { %v280_v34 = vpop.permute.xlu0 %279 }
 0x16b   :  { %v282_v35 = vmul.f32 %v1574_v33, %v280_v34 }
 0x16d   :  { %284 = vrot.lane.b32.xlu0 %v282_v35, %s1644_s11 }
 0x1bf   :  { %v1824_v29 = vpop.f32.mrb[6].mxu0 }
 0x1c0   :  { %v1826_v30 = vpop.f32.mrb[7].mxu0 }
 0x1df   :  { %v285_v37 = vpop.permute.xlu0 %284 }
 0x1e0   :  { %v287_v38 = vadd.f32 %v285_v37, %v277_v36 }
 0x1e2   :  { %1575 = vtanh.f32 %v287_v38 }
 0x1ec   :  { %v1576_v39 = vpop.eup %1575 }
 0x1ed   :  { %290 = vrot.lane.b32.xlu1 %v1576_v39, %s1644_s11 }
 0x25f   :  { %v291_v40 = vpop.permute.xlu1 %290 }
 0x260   :  { %v293_v41 = vmul.f32 %v1574_v33, %v291_v40 }
 0x262   :  { %297 = vrot.lane.b32.xlu1 %v293_v41, %s1645_s3 }
 0x2d4   :  { %v298_v42 = vpop.permute.xlu1 %297 }
 0x2d5   :  { %1369 = vmatmul.mubr.msk.f32.vlgmr.msra.gmra.mrb[2].mxu1 %vm195_vm2, %v298_v42 }
 0x2d6   :  { %1505 = vmatpush3.bf16.msra.mxu1 %v1719_v12  ;;  %1379 = vmatprep.mubr.msk.f32.mxu1 %vm1642_vm0, %v1643_v4 }
 0x2d7   :  { %1506 = vmatprep.subr.bf16.mxu1 %v1641_v3 }
 0x2da   :  { %1508 = vmatpush3.bf16.msra.mxu1 %v1732_v17 }
 0x2db   :  { %1515 = vmatprep.subr.bf16.mxu1 %v1641_v3 }
 0x3a8   :  { %v367_v44 = vpop.f32.mrb[2].mxu1 }
 0x3a9   :  { %v371_v45 = vadd.f32 %v367_v44, %v149_v43  ;;  %v1370_v46 = vpop.f32.mrb[3].mxu1 }
 0x3ab   :  { %1577 = vtanh.f32 %v371_v45  ;;  %v1229_v48 = vmul.f32 -1.442695, %v371_v45 }
 0x3ad   :  { %1579 = vpow2.f32 %v1229_v48 }
 0x3b5   :  { %v1578_v47 = vpop.eup %1577 }
 0x3b6   :  { %381 = vrot.lane.b32.xlu0 %v1578_v47, %s1644_s11 }
 0x3b7   :  { %v1580_v49 = vpop.eup %1579 }
 0x3b8   :  { %v375_v50 = vadd.f32 1.0, %v1580_v49 }
 0x3ba   :  { %1581 = vrcp.f32 %v375_v50  ;;  %v164_v50 = vadd.f32 %v1762_v24, %v163_v28 }
 0x3c4   :  { %v1582_v51 = vpop.eup %1581 }
 0x3c5   :  { %v379_v54 = vmul.f32 %v1582_v51, %v287_v38 }
 0x428   :  { %v382_v52 = vpop.permute.xlu0 %381 }
 0x429   :  { %v384_v53 = vmul.f32 %v1582_v51, %v382_v52 }
 0x42b   :  { %386 = vrot.lane.b32.xlu1 %v384_v53, %s1644_s11 }
 0x49d   :  { %v387_v55 = vpop.permute.xlu1 %386 }
 0x49e   :  { %v389_v56 = vadd.f32 %v387_v55, %v379_v54 }
 0x4a0   :  { %1583 = vtanh.f32 %v389_v56 }
 0x4aa   :  { %v1584_v59 = vpop.eup %1583 }
 0x4ab   :  { %392 = vrot.lane.b32.xlu0 %v1584_v59, %s1644_s11 }
 0x51d   :  { %v393_v60 = vpop.permute.xlu0 %392 }
 0x51e   :  { %v395_v61 = vmul.f32 %v1582_v51, %v393_v60 }
 0x520   :  { %399 = vrot.lane.b32.xlu1 %v395_v61, %s1645_s3 }
 0x592   :  { %v400_v0 = vpop.permute.xlu1 %399 }
 0x593   :  { %1380 = vmatmul.mubr.msk.f32.vlgmr.msra.gmra.mrb[4].mxu1 %vm195_vm2, %v400_v0 }
 0x594   :  { %1517 = vmatpush3.bf16.msra.mxu1 %v1719_v12  ;;  %1401 = vmatprep.mubr.msk.f32.mxu1 %vm1642_vm0, %v1643_v4 }
 0x595   :  { %1518 = vmatprep.subr.bf16.mxu1 %v1641_v3 }
 0x598   :  { %1520 = vmatpush3.bf16.msra.mxu1 %v1732_v17 }
 0x599   :  { %1527 = vmatprep.subr.bf16.mxu1 %v1641_v3 }
 0x666   :  { %v469_v2 = vpop.f32.mrb[4].mxu1 }
 0x667   :  { %v473_v5 = vadd.f32 %v469_v2, %v154_v1  ;;  %v1381_v6 = vpop.f32.mrb[5].mxu1 }
 0x668   :  { %v169_v6 = vadd.f32 %v1822_v27, %v1762_v24 }
 0x669   :  { %1585 = vtanh.f32 %v473_v5  ;;  %v1231_v8 = vmul.f32 -1.442695, %v473_v5 }
 0x66b   :  { %1587 = vpow2.f32 %v1231_v8 }
 0x673   :  { %v1586_v7 = vpop.eup %1585 }
 0x674   :  { %483 = vrot.lane.b32.xlu0 %v1586_v7, %s1644_s11 }
 0x675   :  { %v1588_v9 = vpop.eup %1587 }
 0x676   :  { %v477_v10 = vadd.f32 1.0, %v1588_v9 }
 0x678   :  { %1589 = vrcp.f32 %v477_v10 }
 0x682   :  { %v1590_v11 = vpop.eup %1589 }
 0x683   :  { %v481_v15 = vmul.f32 %v1590_v11, %v389_v56 }
 0x6e6   :  { %v484_v13 = vpop.permute.xlu0 %483 }
 0x6e7   :  { %v486_v14 = vmul.f32 %v1590_v11, %v484_v13 }
 0x6e9   :  { %488 = vrot.lane.b32.xlu1 %v486_v14, %s1644_s11 }
 0x75b   :  { %v489_v16 = vpop.permute.xlu1 %488 }
 0x75c   :  { %v491_v18 = vadd.f32 %v489_v16, %v481_v15 }
 0x75e   :  { %1591 = vtanh.f32 %v491_v18 }
 0x768   :  { %v1592_v23 = vpop.eup %1591 }
 0x769   :  { %494 = vrot.lane.b32.xlu0 %v1592_v23, %s1644_s11 }
 0x7db   :  { %v495_v25 = vpop.permute.xlu0 %494 }
 0x7dc   :  { %v497_v26 = vmul.f32 %v1590_v11, %v495_v25 }
 0x7de   :  { %501 = vrot.lane.b32.xlu1 %v497_v26, %s1645_s3  ;;  %v174_v26 = vadd.f32 %v1762_v24, %v1826_v30 }
 0x850   :  { %v502_v31 = vpop.permute.xlu1 %501 }
 0x851   :  { %1391 = vmatmul.mubr.msk.f32.vlgmr.msra.gmra.mrb[8].mxu0 %vm195_vm2, %v502_v31 }
 0x852   :  { %1523 = vmatpush3.bf16.msra.mxu0 %v1719_v12  ;;  %1412 = vmatprep.mubr.msk.f32.mxu0 %vm1642_vm0, %v1643_v4 }
 0x853   :  { %1524 = vmatprep.subr.bf16.mxu0 %v1641_v3 }
 0x856   :  { %1526 = vmatpush3.bf16.msra.mxu0 %v1732_v17 }
 0x857   :  { %1533 = vmatprep.subr.bf16.mxu0 %v1641_v3 }
 0x924   :  { %v571_v33 = vpop.f32.mrb[8].mxu0 }
 0x925   :  { %v575_v34 = vadd.f32 %v571_v33, %v159_v32  ;;  %v1392_v35 = vpop.f32.mrb[9].mxu0 }
 0x927   :  { %1593 = vtanh.f32 %v575_v34  ;;  %v1233_v37 = vmul.f32 -1.442695, %v575_v34 }
 0x929   :  { %1595 = vpow2.f32 %v1233_v37 }
 0x931   :  { %v1594_v36 = vpop.eup %1593 }
 0x932   :  { %585 = vrot.lane.b32.xlu0 %v1594_v36, %s1644_s11 }
 0x933   :  { %v1596_v38 = vpop.eup %1595 }
 0x934   :  { %v579_v39 = vadd.f32 1.0, %v1596_v38 }
 0x936   :  { %1597 = vrcp.f32 %v579_v39 }
 0x940   :  { %v1598_v40 = vpop.eup %1597 }
 0x941   :  { %v583_v43 = vmul.f32 %v1598_v40, %v491_v18 }
 0x9a4   :  { %v586_v41 = vpop.permute.xlu0 %585 }
 0x9a5   :  { %v588_v42 = vmul.f32 %v1598_v40, %v586_v41  ;;  %v1009_v41 = vld [vmem:[%s1960_s4] sm:$0xff] }
 0x9a7   :  { %590 = vrot.lane.b32.xlu1 %v588_v42, %s1644_s11  ;;  %v1010_v42 = vld [vmem:[%s1960_s4 + $0x8] sm:$0xff] }
 0xa19   :  { %v591_v44 = vpop.permute.xlu1 %590 }
 0xa1a   :  { %v593_v45 = vadd.f32 %v591_v44, %v583_v43  ;;  %v1011_v43 = vld [vmem:[%s1960_s4 + $0x10] sm:$0xff]  ;;  %v1540_v44 = vpack.c.bf16 %v1010_v42, %v1009_v41 }
 0xa1c   :  { %1599 = vtanh.f32 %v593_v45 }
 0xa26   :  { %v1600_v46 = vpop.eup %1599 }
 0xa27   :  { %596 = vrot.lane.b32.xlu0 %v1600_v46, %s1644_s11 }
 0xa99   :  { %v597_v47 = vpop.permute.xlu0 %596 }
 0xa9a   :  { %v599_v48 = vmul.f32 %v1598_v40, %v597_v47  ;;  %v1013_v47 = vld [vmem:[%s1960_s4 + $0x20] sm:$0xff] }
 0xa9c   :  { %603 = vrot.lane.b32.xlu1 %v599_v48, %s1645_s3  ;;  %v1014_v48 = vld [vmem:[%s1960_s4 + $0x28] sm:$0xff] }
 0xb0e   :  { %v604_v49 = vpop.permute.xlu1 %603 }
 0xb0f   :  { %1402 = vmatmul.mubr.msk.f32.vlgmr.msra.gmra.mrb[6].mxu1 %vm195_vm2, %v604_v49  ;;  %v1546_v49 = vpack.c.bf16 %v1014_v48, %v1013_v47 }
 0xb10   :  { %1529 = vmatpush3.bf16.msra.mxu1 %v1719_v12  ;;  %1423 = vmatprep.mubr.msk.f32.mxu1 %vm1642_vm0, %v1643_v4 }
 0xb11   :  { %1530 = vmatprep.subr.bf16.mxu1 %v1641_v3 }
 0xb14   :  { %1532 = vmatpush3.bf16.msra.mxu1 %v1732_v17 }
 0xb15   :  { %1539 = vmatprep.subr.bf16.mxu1 %v1641_v3 }
 0xbe2   :  { %v673_v51 = vpop.f32.mrb[6].mxu1 }
 0xbe3   :  { %v677_v52 = vadd.f32 %v673_v51, %v164_v50  ;;  %v1403_v53 = vpop.f32.mrb[7].mxu1  ;;  %v1015_v51 = vld [vmem:[%s1960_s4 + $0x30] sm:$0xff] }
 0xbe5   :  { %1601 = vtanh.f32 %v677_v52  ;;  %v1235_v55 = vmul.f32 -1.442695, %v677_v52  ;;  %v1016_v52 = vld [vmem:[%s1960_s4 + $0x38] sm:$0xff] }
 0xbe6   :  { %v1549_v53 = vpack.c.bf16 %v1016_v52, %v1015_v51 }
 0xbe7   :  { %1603 = vpow2.f32 %v1235_v55 }
 0xbef   :  { %v1602_v54 = vpop.eup %1601 }
 0xbf0   :  { %687 = vrot.lane.b32.xlu0 %v1602_v54, %s1644_s11 }
 0xbf1   :  { %v1604_v56 = vpop.eup %1603 }
 0xbf2   :  { %v681_v57 = vadd.f32 1.0, %v1604_v56 }
 0xbf4   :  { %1605 = vrcp.f32 %v681_v57 }
 0xbfe   :  { %v1606_v58 = vpop.eup %1605 }
 0xbff   :  { %v685_v61 = vmul.f32 %v1606_v58, %v593_v45  ;;  %v1012_v45 = vld [vmem:[%s1960_s4 + $0x18] sm:$0xff] }
 0xc00   :  { %v1543_v46 = vpack.c.bf16 %v1012_v45, %v1011_v43 }
 0xc62   :  { %v688_v59 = vpop.permute.xlu0 %687 }
 0xc63   :  { %v690_v60 = vmul.f32 %v1606_v58, %v688_v59  ;;  %v1242_v59 = vld [vmem:[%s1961_s5] ss:$0 sm:$0xff] }
 0xc65   :  { %692 = vrot.lane.b32.xlu1 %v690_v60, %s1644_s11  ;;  %v179_v60 = vadd.f32 %v1824_v29, %v1762_v24 }
 0xcd7   :  { %v693_v62 = vpop.permute.xlu1 %692 }
 0xcd8   :  { %v695_v63 = vadd.f32 %v693_v62, %v685_v61 }
 0xcda   :  { %1607 = vtanh.f32 %v695_v63 }
 0xce4   :  { %v1608_v0 = vpop.eup %1607 }
 0xce5   :  { %698 = vrot.lane.b32.xlu0 %v1608_v0, %s1644_s11 }
 0xd57   :  { %v699_v1 = vpop.permute.xlu0 %698 }
 0xd58   :  { %v701_v2 = vmul.f32 %v1606_v58, %v699_v1 }
 0xd5a   :  { %705 = vrot.lane.b32.xlu1 %v701_v2, %s1645_s3 }
 0xdcc   :  { %v706_v5 = vpop.permute.xlu1 %705 }
 0xdcd   :  { %1413 = vmatmul.mubr.msk.f32.vlgmr.msra.gmra.mrb[10].mxu0 %vm195_vm2, %v706_v5 }
 0xdce   :  { %1535 = vmatpush3.bf16.msra.mxu0 %v1719_v12  ;;  %1434 = vmatprep.mubr.msk.f32.mxu0 %vm1642_vm0, %v1643_v4 }
 0xdcf   :  { %1536 = vmatprep.subr.bf16.mxu0 %v1641_v3 }
 0xdd2   :  { %1538 = vmatpush3.bf16.msra.mxu0 %v1732_v17 }
 0xdd3   :  { %1551 = vmatprep.subr.bf16.mxu0 %v1641_v3 }
 0xea0   :  { %v775_v7 = vpop.f32.mrb[10].mxu0 }
 0xea1   :  { %v779_v8 = vadd.f32 %v775_v7, %v169_v6  ;;  %v1414_v9 = vpop.f32.mrb[11].mxu0 }
 0xea3   :  { %1609 = vtanh.f32 %v779_v8  ;;  %v1237_v12 = vmul.f32 -1.442695, %v779_v8 }
 0xea5   :  { %1611 = vpow2.f32 %v1237_v12 }
 0xead   :  { %v1610_v10 = vpop.eup %1609 }
 0xeae   :  { %789 = vrot.lane.b32.xlu0 %v1610_v10, %s1644_s11 }
 0xeaf   :  { %v1612_v11 = vpop.eup %1611 }
 0xeb0   :  { %v783_v13 = vadd.f32 1.0, %v1612_v11 }
 0xeb2   :  { %1613 = vrcp.f32 %v783_v13 }
 0xebc   :  { %v1614_v14 = vpop.eup %1613 }
 0xebd   :  { %v787_v16 = vmul.f32 %v1614_v14, %v695_v63 }
 0xf20   :  { %v790_v15 = vpop.permute.xlu0 %789 }
 0xf21   :  { %v792_v17 = vmul.f32 %v1614_v14, %v790_v15 }
 0xf23   :  { %794 = vrot.lane.b32.xlu1 %v792_v17, %s1644_s11 }
 0xf95   :  { %v795_v18 = vpop.permute.xlu1 %794 }
 0xf96   :  { %v797_v19 = vadd.f32 %v795_v18, %v787_v16  ;;  %v1124_v16 = vld [vmem:[%s1962_s6] sm:$0xff]  ;;  %v1125_v18 = vld [vmem:[%s1962_s6 + $0x8] sm:$0xff] }
 0xf98   :  { %1615 = vtanh.f32 %v797_v19 }
 0xfa2   :  { %v1616_v20 = vpop.eup %1615 }
 0xfa3   :  { %800 = vrot.lane.b32.xlu0 %v1616_v20, %s1644_s11  ;;  %v1552_v20 = vpack.c.bf16 %v1125_v18, %v1124_v16 }
0x1015   :  { %v801_v21 = vpop.permute.xlu0 %800 }
0x1016   :  { %v803_v23 = vmul.f32 %v1614_v14, %v801_v21  ;;  %v1127_v21 = vld [vmem:[%s1962_s6 + $0x18] sm:$0xff] }
0x1018   :  { %807 = vrot.lane.b32.xlu1 %v803_v23, %s1645_s3 }
0x108a   :  { %v808_v25 = vpop.permute.xlu1 %807 }
0x108b   :  { %1424 = vmatmul.mubr.msk.f32.vlgmr.msra.gmra.mrb[8].mxu1 %vm195_vm2, %v808_v25  ;;  %v1128_v25 = vld [vmem:[%s1962_s6 + $0x20] sm:$0xff] }
0x108c   :  { %1453 = vmatprep.mubr.msk.f32.mxu1 %vm1642_vm0, %v1643_v4  ;;  %1541 = vmatpush3.bf16.msra.mxu1 %v1540_v44 }
0x108d   :  { %1542 = vmatprep.subr.bf16.mxu1 %v1641_v3 }
0x1090   :  { %1544 = vmatpush3.bf16.msra.mxu1 %v1543_v46 }
0x1091   :  { %1545 = vmatprep.subr.bf16.mxu1 %v1641_v3 }
0x1094   :  { %1547 = vmatpush3.bf16.msra.mxu1 %v1546_v49 }
0x1095   :  { %1548 = vmatprep.subr.bf16.mxu1 %v1641_v3 }
0x1098   :  { %1550 = vmatpush3.bf16.msra.mxu1 %v1549_v53 }
0x109b   :  { %1454 = vmatmul.mubr.msk.f32.vlgmr.msra.gmra.mrb[10].mxu1 %vm52_vm1, %v1814_v22 }
0x115e   :  { %v877_v27 = vpop.f32.mrb[8].mxu1 }
0x115f   :  { %v881_v28 = vadd.f32 %v877_v27, %v174_v26  ;;  %v1425_v31 = vpop.f32.mrb[9].mxu1  ;;  %v1129_v26 = vld [vmem:[%s1962_s6 + $0x28] sm:$0xff] }
0x1160   :  { %v1558_v27 = vpack.c.bf16 %v1129_v26, %v1128_v25  ;;  %v1130_v31 = vld [vmem:[%s1962_s6 + $0x30] sm:$0xff] }
0x1161   :  { %1617 = vtanh.f32 %v881_v28  ;;  %v1239_v33 = vmul.f32 -1.442695, %v881_v28 }
0x1163   :  { %1619 = vpow2.f32 %v1239_v33 }
0x116b   :  { %v1618_v32 = vpop.eup %1617 }
0x116c   :  { %891 = vrot.lane.b32.xlu0 %v1618_v32, %s1644_s11  ;;  %v1131_v32 = vld [vmem:[%s1962_s6 + $0x38] sm:$0xff] }
0x116d   :  { %v1620_v34 = vpop.eup %1619 }
0x116e   :  { %v885_v35 = vadd.f32 1.0, %v1620_v34  ;;  %v1093_v57 = vpop.f32.mrb[10].mxu1 }
0x116f   :  { %v1455_v58 = vpop.f32.mrb[11].mxu1  ;;  %v1094_v63 = vadd.f32 %v1242_v59, %v1093_v57 }
0x1170   :  { %1621 = vrcp.f32 %v885_v35  ;;  %v1561_v35 = vpack.c.bf16 %v1131_v32, %v1130_v31 }
0x1171   :  { %v1244_v2 = vmul.f32 -1.442695, %v1094_v63 }
0x117a   :  { %v1622_v36 = vpop.eup %1621 }
0x117b   :  { %v889_v39 = vmul.f32 %v1622_v36, %v797_v19  ;;  %v1126_v19 = vld [vmem:[%s1962_s6 + $0x10] sm:$0xff] }
0x117c   :  { %v1555_v23 = vpack.c.bf16 %v1127_v21, %v1126_v19 }
0x11de   :  { %v892_v37 = vpop.permute.xlu0 %891 }
0x11df   :  { %v894_v38 = vmul.f32 %v1622_v36, %v892_v37 }
0x11e1   :  { %896 = vrot.lane.b32.xlu1 %v894_v38, %s1644_s11 }
0x1253   :  { %v897_v40 = vpop.permute.xlu1 %896 }
0x1254   :  { %v1872_v30 = vadd.f32 %v897_v40, %v889_v39 }
0x1256   :  { %1623 = vtanh.f32 %v1872_v30 }
0x1260   :  { %v1624_v50 = vpop.eup %1623 }
0x1261   :  { %902 = vrot.lane.b32.xlu0 %v1624_v50, %s1644_s11 }
0x12d3   :  { %v903_v54 = vpop.permute.xlu0 %902 }
0x12d4   :  { %v905_v55 = vmul.f32 %v1622_v36, %v903_v54 }
0x12d6   :  { %909 = vrot.lane.b32.xlu1 %v905_v55, %s1645_s3 }
0x1348   :  { %v910_v56 = vpop.permute.xlu1 %909 }
0x1349   :  { %1435 = vmatmul.mubr.msk.f32.vlgmr.msra.gmra.mrb[12].mxu0 %vm195_vm2, %v910_v56 }
0x134a   :  { %1472 = vmatprep.mubr.msk.f32.mxu0 %vm1642_vm0, %v1643_v4  ;;  %1553 = vmatpush3.bf16.msra.mxu0 %v1552_v20 }
0x134b   :  { %1554 = vmatprep.subr.bf16.mxu0 %v1641_v3 }
0x134e   :  { %1556 = vmatpush3.bf16.msra.mxu0 %v1555_v23 }
0x134f   :  { %1557 = vmatprep.subr.bf16.mxu0 %v1641_v3 }
0x1352   :  { %1559 = vmatpush3.bf16.msra.mxu0 %v1558_v27 }
0x1353   :  { %1560 = vmatprep.subr.bf16.mxu0 %v1641_v3 }
0x1356   :  { %1562 = vmatpush3.bf16.msra.mxu0 %v1561_v35 }
0x141c   :  { %v979_v22 = vpop.f32.mrb[12].mxu0 }
0x141d   :  { %v983_v61 = vadd.f32 %v979_v22, %v179_v60  ;;  %v1436_v62 = vpop.f32.mrb[13].mxu0 }
0x141f   :  { %1625 = vtanh.f32 %v983_v61  ;;  %v1241_v4 = vmul.f32 -1.442695, %v983_v61 }
0x1420   :  { %1627 = vtanh.f32 %v1094_v63 }
0x1421   :  { %1629 = vpow2.f32 %v1241_v4 }
0x1422   :  { %1631 = vpow2.f32 %v1244_v2 }
0x1429   :  { %v1626_v0 = vpop.eup %1625 }
0x142a   :  { %993 = vrot.lane.b32.xlu0 %v1626_v0, %s1644_s11  ;;  %v1628_v1 = vpop.eup %1627 }
0x142b   :  { %v1630_v5 = vpop.eup %1629 }
0x142c   :  { %v1632_v6 = vpop.eup %1631  ;;  %v987_v7 = vadd.f32 1.0, %v1630_v5 }
0x142d   :  { %v1100_v24 = vadd.f32 1.0, %v1632_v6 }
0x142e   :  { %1105 = vrot.lane.b32.xlu0 %v1628_v1, %s1644_s11  ;;  %1633 = vrcp.f32 %v987_v7 }
0x142f   :  { %1635 = vrcp.f32 %v1100_v24 }
0x1438   :  { %v1634_v29 = vpop.eup %1633 }
0x1439   :  { %v1636_v10 = vpop.eup %1635  ;;  %v991_v14 = vmul.f32 %v1634_v29, %v1872_v30  ;;  %v1245_v30 = vld [vmem:[%s1963_s7] ss:$0 sm:$0xff] }
0x149c   :  { %v994_v8 = vpop.permute.xlu0 %993 }
0x149d   :  { %v996_v9 = vmul.f32 %v1634_v29, %v994_v8 }
0x149f   :  { %998 = vrot.lane.b32.xlu1 %v996_v9, %s1644_s11 }
0x14a0   :  { %v1106_v12 = vpop.permute.xlu0 %1105 }
0x14a1   :  { %v1108_v11 = vmul.f32 %v1636_v10, %v1106_v12 }
0x14a3   :  { %1637 = vtanh.f32 %v1108_v11 }
0x14ad   :  { %v1638_v13 = vpop.eup %1637 }
0x14ae   :  { %1111 = vrot.lane.b32.xlu0 %v1638_v13, %s1645_s3 }
0x1511   :  { %v999_v15 = vpop.permute.xlu1 %998 }
0x1512   :  { %v1001_v17 = vadd.f32 %v999_v15, %v991_v14 }
0x1514   :  { %1639 = vtanh.f32 %v1001_v17 }
0x151e   :  { %v1640_v28 = vpop.eup %1639 }
0x151f   :  { %1004 = vrot.lane.b32.xlu1 %v1640_v28, %s1644_s11 }
0x1520   :  { %v1112_v33 = vpop.permute.xlu0 %1111 }
0x1521   :  { %v1114_v34 = vmul.f32 %v1636_v10, %v1112_v33 }
0x1523   :  { %1120 = vrot.lane.b32.xlu0 %v1114_v34, %s1646_s1 }
0x1591   :  { %v1005_v36 = vpop.permute.xlu1 %1004 }
0x1592   :  { %v1007_v37 = vmul.f32 %v1634_v29, %v1005_v36 }
0x1594   :  { %1116 = vrot.lane.b32.xlu1 %v1007_v37, %s1645_s3 }
0x1595   :  { %v1121_v38 = vpop.permute.xlu0 %1120 }
0x1606   :  { %v1117_v39 = vpop.permute.xlu1 %1116 }
0x1607   :  { %v1123_v40 = vsel %vm195_vm2, %v1117_v39, %v1121_v38 }
0x1608   :  { %1473 = vmatmul.mubr.msk.f32.vlgmr.msra.gmra.mrb[14].mxu0 %vm52_vm1, %v1123_v40 }
0x16db   :  { %v1208_v41 = vpop.f32.mrb[14].mxu0 }
0x16dc   :  { %v1209_v3 = vadd.f32 %v1245_v30, %v1208_v41  ;;  %v1474_v42 = vpop.f32.mrb[15].mxu0 }
0x16de   :  { %1213 = vst.msk [vmem:[%s1964_s8] sm:$0xff] %vm1212_vm3, %v1209_v3 }

// kernel: lstm_model_multistep_forward.2
= control target key start
LH: loop header
LB: loop body
LE: loop exit
PB: predicated region body
PF: predicated region fallthrough
CT: control target
= control target key end

     0   :  { %vm65_vm0 = vcmask 1043456   ;;  %v1852_v3 = vmov 0.0   ;;  %vm40_vm1 = vcmask 31744   ;;  %v28_v35 = vlaneseq  ;;  %s1855_s13 = smov 96   ;;  %s2323_s1 = inlined_call_operand.vmem [shape: f32[4,256], index: 1, kind: input, shape index: {}]   ;;  %s2324_s2 = inlined_call_operand.vmem [shape: f32[64,256], index: 2, kind: input, shape index: {}]   ;;  %s2325_s0 = inlined_call_operand.vmem [shape: f32[64,4], index: 0, kind: input, shape index: {}]   ;;  %s2326_s3 = inlined_call_operand.vmem [shape: f32[1,256], index: 3, kind: input, shape index: {}]   ;;  %s2327_s4 = inlined_call_operand.vmem [shape: f32[64,64], index: 4, kind: output, shape index: {}]  }
   0x1   :  { %v25_v0 = vld [vmem:[%s2323_s1] sm:$0xff]  ;;  %v200_v1 = vld [vmem:[%s2324_s2 + $0x8] sm:$0xff]  ;;  %v202_v2 = vld [vmem:[%s2324_s2 + $0x18] sm:$0xff]  ;;  %134 = vmatprep.mubr.f32.mxu0 %v1852_v3  ;;  %283 = vmatprep.mubr.f32.mxu1 %v1852_v3  ;;  %vm352_vm2 = vcmask 261120   ;;  %vm215_vm3 = vcmask 523264  }
   0x2   :  { %v39_v4 = vcombine.high %v25_v0, %v25_v0  ;;  %v1892_v5 = vpack.c.bf16 %v202_v2, %v200_v1  ;;  %v199_v6 = vld [vmem:[%s2324_s2] sm:$0xff]  ;;  %v201_v7 = vld [vmem:[%s2324_s2 + $0x10] sm:$0xff]  ;;  %v204_v10 = vld [vmem:[%s2324_s2 + $0x28] sm:$0xff]  ;;  %v29_v36 = vshrl.u32 %v28_v35, 7 }
   0x3   :  { %v17_v8 = vld [vmem:[%s2325_s0] sm:$0xff]  ;;  %v1903_v9 = vpack.c.bf16 %v201_v7, %v199_v6  ;;  %v206_v11 = vld [vmem:[%s2324_s2 + $0x38] sm:$0xff]  ;;  %v205_v14 = vld [vmem:[%s2324_s2 + $0x30] sm:$0xff] }
   0x4   :  { %v203_v12 = vld [vmem:[%s2324_s2 + $0x20] sm:$0xff]  ;;  %1558 = vmatprep.subr.msk.mxu0 %vm65_vm0, %v39_v4  ;;  %1592 = vmatprep.subr.bf16.mxu1 %v1892_v5  ;;  %v1916_v13 = vpack.c.bf16 %v206_v11, %v204_v10  ;;  %v208_v15 = vld [vmem:[%s2324_s2 + $0x48] sm:$0xff]  ;;  %v210_v17 = vld [vmem:[%s2324_s2 + $0x58] sm:$0xff]  ;;  %v34_v37 = vsub.s32 1, %v29_v36  ;;  %v30_v40 = vsub.s32 0, %v29_v36 }
   0x5   :  { %1559 = vmatpush1.msk.msra.mxu0 %vm65_vm0, %v25_v0  ;;  %1594 = vmatpush1.bf16.msra.mxu1 %v1903_v9  ;;  %v1926_v16 = vpack.c.bf16 %v205_v14, %v203_v12  ;;  %v1933_v18 = vpack.c.bf16 %v210_v17, %v208_v15  ;;  %v207_v19 = vld [vmem:[%s2324_s2 + $0x40] sm:$0xff]  ;;  %v209_v20 = vld [vmem:[%s2324_s2 + $0x50] sm:$0xff]  ;;  %v18_v21 = vld [vmem:[%s2325_s0 + $0x8] sm:$0xff] }
   0x6   :  { %1560 = vmatmul.mubr.msk.f32.vlgmr.msra.gmra.mrb[0].mxu0 %vm40_vm1, %v17_v8  ;;  %1596 = vmatprep.subr.bf16.mxu1 %v1916_v13  ;;  %v212_v22 = vld [vmem:[%s2324_s2 + $0x68] sm:$0xff]  ;;  %v214_v23 = vld [vmem:[%s2324_s2 + $0x78] sm:$0xff]  ;;  %v1954_v24 = vpack.c.bf16 %v209_v20, %v207_v19  ;;  %v211_v26 = vld [vmem:[%s2324_s2 + $0x60] sm:$0xff] }
   0x7   :  { %140 = vmatprep.mubr.f32.mxu0 %v1852_v3  ;;  %1624 = vmatprep.subr.bf16.mxu0 %v1892_v5  ;;  %v1959_v25 = vpack.c.bf16 %v214_v23, %v212_v22  ;;  %v213_v27 = vld [vmem:[%s2324_s2 + $0x70] sm:$0xff]  ;;  %v20_v30 = vld [vmem:[%s2325_s0 + $0x18] sm:$0xff]  ;;  %v21_v31 = vld [vmem:[%s2325_s0 + $0x20] sm:$0xff] }
   0x8   :  { %1626 = vmatpush1.bf16.msra.mxu0 %v1903_v9  ;;  %v19_v28 = vld [vmem:[%s2325_s0 + $0x10] sm:$0xff]  ;;  %v1973_v29 = vpack.c.bf16 %v213_v27, %v211_v26  ;;  %v22_v32 = vld [vmem:[%s2325_s0 + $0x28] sm:$0xff]  ;;  %v24_v34 = vld [vmem:[%s2325_s0 + $0x38] sm:$0xff] }
   0x9   :  { %1598 = vmatpush1.bf16.msra.mxu1 %v1926_v16  ;;  %1628 = vmatprep.subr.bf16.mxu0 %v1916_v13  ;;  %v23_v33 = vld [vmem:[%s2325_s0 + $0x30] sm:$0xff]  ;;  %v26_v38 = vld [vmem:[%s2326_s3] sm:$0x3]  ;;  %s1853_s0 = smov 32   ;;  %s1854_s3 = smov 64  }
   0xa   :  { %1561 = vmatmul.mubr.msk.f32.gmra.mrb[2].mxu0 %vm40_vm1, %v18_v21  ;;  %1600 = vmatprep.subr.bf16.mxu1 %v1933_v18  ;;  %v35_v39 = vrot.slane %v26_v38, %v34_v37  ;;  %v31_v44 = vrot.slane %v26_v38, %v30_v40 }
   0xb   :  { %146 = vmatprep.mubr.f32.mxu0 %v1852_v3 }
   0xc   :  { %1630 = vmatpush1.bf16.msra.mxu0 %v1926_v16 }
   0xd   :  { %1602 = vmatpush1.bf16.msra.mxu1 %v1954_v24  ;;  %1632 = vmatprep.subr.bf16.mxu0 %v1933_v18 }
   0xe   :  { %1562 = vmatmul.mubr.msk.f32.gmra.mrb[4].mxu0 %vm40_vm1, %v19_v28  ;;  %1604 = vmatprep.subr.bf16.mxu1 %v1959_v25 }
   0xf   :  { %152 = vmatprep.mubr.f32.mxu0 %v1852_v3 }
  0x10   :  { %1634 = vmatpush1.bf16.msra.mxu0 %v1954_v24 }
  0x11   :  { %1606 = vmatpush1.bf16.msra.mxu1 %v1973_v29  ;;  %1636 = vmatprep.subr.bf16.mxu0 %v1959_v25 }
  0x12   :  { %1563 = vmatmul.mubr.msk.f32.gmra.mrb[6].mxu0 %vm40_vm1, %v20_v30  ;;  %1608 = vmatprep.subr.bf16.mxu1 %v1892_v5 }
  0x13   :  { %158 = vmatprep.mubr.f32.mxu0 %v1852_v3 }
  0x14   :  { %284 = vmatmul.mubr.f32.vlgmr.msra.gmra.mrb[0].mxu1 %v1852_v3  ;;  %1638 = vmatpush1.bf16.msra.mxu0 %v1973_v29 }
  0x15   :  { %1610 = vmatpush1.bf16.msra.mxu1 %v1903_v9  ;;  %447 = vmatprep.mubr.f32.mxu1 %v1852_v3 }
  0x16   :  { %1564 = vmatmul.mubr.msk.f32.gmra.mrb[8].mxu0 %vm40_vm1, %v21_v31  ;;  %1612 = vmatprep.subr.bf16.mxu1 %v1916_v13 }
  0x17   :  { %164 = vmatprep.mubr.f32.mxu0 %v1852_v3  ;;  %1656 = vmatprep.subr.bf16.mxu0 %v1892_v5 }
  0x19   :  { %1614 = vmatpush1.bf16.msra.mxu1 %v1926_v16 }
  0x1a   :  { %1565 = vmatmul.mubr.msk.f32.gmra.mrb[10].mxu0 %vm40_vm1, %v22_v32  ;;  %1616 = vmatprep.subr.bf16.mxu1 %v1933_v18 }
  0x1b   :  { %170 = vmatprep.mubr.f32.mxu0 %v1852_v3 }
  0x1d   :  { %1618 = vmatpush1.bf16.msra.mxu1 %v1954_v24 }
  0x1e   :  { %1566 = vmatmul.mubr.msk.f32.gmra.mrb[12].mxu0 %vm40_vm1, %v23_v33  ;;  %1620 = vmatprep.subr.bf16.mxu1 %v1959_v25 }
  0x1f   :  { %176 = vmatprep.mubr.f32.mxu0 %v1852_v3 }
  0x21   :  { %1622 = vmatpush1.bf16.msra.mxu1 %v1973_v29 }
  0x22   :  { %1567 = vmatmul.mubr.msk.f32.gmra.mrb[14].mxu0 %vm40_vm1, %v24_v34  ;;  %1640 = vmatprep.subr.bf16.mxu1 %v1892_v5 }
  0x23   :  { %611 = vmatprep.mubr.f32.mxu0 %v1852_v3 }
  0xd9   :  { %v136_v41 = vpop.f32.mrb[0].mxu0 }
  0xda   :  { %v138_v42 = vpop.f32.mrb[1].mxu0  ;;  %v137_v54 = vadd.f32 %v136_v41, %v31_v44 }
  0xdb   :  { %v2023_v43 = vadd.f32 %v138_v42, %v35_v39 }
  0xdd   :  { %v142_v45 = vpop.f32.mrb[2].mxu0 }
  0xde   :  { %v2025_v46 = vadd.f32 %v142_v45, %v31_v44  ;;  %v144_v47 = vpop.f32.mrb[3].mxu0 }
  0xdf   :  { %v2027_v48 = vadd.f32 %v144_v47, %v35_v39 }
  0xe1   :  { %v148_v49 = vpop.f32.mrb[4].mxu0 }
  0xe2   :  { %v2029_v50 = vadd.f32 %v148_v49, %v31_v44  ;;  %v150_v51 = vpop.f32.mrb[5].mxu0 }
  0xe3   :  { %v2031_v52 = vadd.f32 %v150_v51, %v35_v39 }
  0xe5   :  { %v154_v53 = vpop.f32.mrb[6].mxu0 }
  0xe6   :  { %v2033_v55 = vadd.f32 %v154_v53, %v31_v44  ;;  %v156_v56 = vpop.f32.mrb[7].mxu0 }
  0xe7   :  { %v2035_v57 = vadd.f32 %v156_v56, %v35_v39  ;;  %v285_v58 = vpop.f32.mrb[0].mxu1 }
  0xe8   :  { %v298_v59 = vadd.f32 %v285_v58, %v137_v54  ;;  %v287_v60 = vpop.f32.mrb[1].mxu1 }
  0xe9   :  { %v160_v61 = vpop.f32.mrb[8].mxu0 }
  0xea   :  { %1724 = vtanh.f32 %v298_v59  ;;  %v2037_v62 = vadd.f32 %v160_v61, %v31_v44  ;;  %v162_v63 = vpop.f32.mrb[9].mxu0  ;;  %v1568_v22 = vmul.f32 -1.442695, %v298_v59 }
  0xeb   :  { %v2039_v0 = vadd.f32 %v162_v63, %v35_v39 }
  0xed   :  { %v166_v1 = vpop.f32.mrb[10].mxu0 }
  0xee   :  { %v2041_v2 = vadd.f32 %v166_v1, %v31_v44  ;;  %v168_v4 = vpop.f32.mrb[11].mxu0 }
  0xef   :  { %v2043_v6 = vadd.f32 %v168_v4, %v35_v39 }
  0xf1   :  { %v172_v7 = vpop.f32.mrb[12].mxu0 }
  0xf2   :  { %v2045_v8 = vadd.f32 %v172_v7, %v31_v44  ;;  %v174_v10 = vpop.f32.mrb[13].mxu0 }
  0xf3   :  { %v2047_v11 = vadd.f32 %v174_v10, %v35_v39 }
  0xf4   :  { %v1725_v12 = vpop.eup %1724 }
  0xf5   :  { %v178_v14 = vpop.f32.mrb[14].mxu0  ;;  %316 = vrot.lane.b32.xlu0 %v1725_v12, %s1853_s0 }
  0xf6   :  { %v2050_v15 = vadd.f32 %v178_v14, %v31_v44  ;;  %v180_v17 = vpop.f32.mrb[15].mxu0 }
  0xf7   :  { %v181_v19 = vadd.f32 %v180_v17, %v35_v39 }
  0xf9   :  { %v299_v20 = vadd.f32 %v287_v60, %v181_v19 }
  0xfb   :  { %1726 = vtanh.f32 %v299_v20  ;;  %v1569_v27 = vmul.f32 -1.442695, %v299_v20 }
  0xfc   :  { %1728 = vpow2.f32 %v1568_v22 }
 0x105   :  { %v1727_v21 = vpop.eup %1726 }
 0x106   :  { %327 = vrot.lane.b32.xlu0 %v1727_v21, %s1853_s0  ;;  %v1729_v23 = vpop.eup %1728 }
 0x107   :  { %v303_v26 = vadd.f32 1.0, %v1729_v23 }
 0x109   :  { %1730 = vrcp.f32 %v303_v26 }
 0x10a   :  { %1732 = vpow2.f32 %v1569_v27 }
 0x113   :  { %v1731_v28 = vpop.eup %1730 }
 0x114   :  { %v1733_v30 = vpop.eup %1732  ;;  %v314_v37 = vmul.f32 0.0, %v1731_v28 }
 0x115   :  { %v310_v33 = vadd.f32 1.0, %v1733_v30 }
 0x117   :  { %1734 = vrcp.f32 %v310_v33 }
 0x121   :  { %v1735_v34 = vpop.eup %1734 }
 0x122   :  { %v325_v41 = vmul.f32 0.0, %v1735_v34 }
 0x167   :  { %v317_v31 = vpop.permute.xlu0 %316 }
 0x168   :  { %v319_v32 = vmul.f32 %v1731_v28, %v317_v31 }
 0x16a   :  { %321 = vrot.lane.b32.xlu1 %v319_v32, %s1853_s0 }
 0x178   :  { %v328_v35 = vpop.permute.xlu0 %327 }
 0x179   :  { %v330_v36 = vmul.f32 %v1735_v34, %v328_v35 }
 0x17b   :  { %332 = vrot.lane.b32.xlu1 %v330_v36, %s1853_s0 }
 0x1dc   :  { %v322_v38 = vpop.permute.xlu1 %321 }
 0x1dd   :  { %v324_v39 = vadd.f32 %v322_v38, %v314_v37 }
 0x1df   :  { %1736 = vtanh.f32 %v324_v39 }
 0x1e9   :  { %v1737_v40 = vpop.eup %1736 }
 0x1ea   :  { %338 = vrot.lane.b32.xlu0 %v1737_v40, %s1853_s0 }
 0x1ed   :  { %v333_v42 = vpop.permute.xlu1 %332 }
 0x1ee   :  { %v335_v44 = vadd.f32 %v333_v42, %v325_v41 }
 0x1f0   :  { %1738 = vtanh.f32 %v335_v44 }
 0x1fa   :  { %v1739_v45 = vpop.eup %1738 }
 0x1fb   :  { %344 = vrot.lane.b32.xlu1 %v1739_v45, %s1853_s0 }
 0x25c   :  { %v339_v47 = vpop.permute.xlu0 %338 }
 0x25d   :  { %v341_v49 = vmul.f32 %v1731_v28, %v339_v47 }
 0x25f   :  { %349 = vrot.lane.b32.xlu0 %v341_v49, %s1854_s3 }
 0x26d   :  { %v345_v51 = vpop.permute.xlu1 %344 }
 0x26e   :  { %v2058_v53 = vmul.f32 %v1735_v34, %v345_v51 }
 0x270   :  { %360 = vrot.lane.b32.xlu1 %v2058_v53, %s1855_s13 }
 0x2d1   :  { %v350_v54 = vpop.permute.xlu0 %349 }
 0x2d2   :  { %353 = vst.msk [vmem:[#allocation3] sm:$0xff] %vm352_vm2, %v350_v54 }
 0x2e2   :  { %v361_v56 = vpop.permute.xlu1 %360 }
 0x2e3   :  { %v363_v58 = vsel %vm352_vm2, %v350_v54, %v361_v56 }
 0x2e4   :  { %1570 = vmatmul.mubr.msk.f32.vlgmr.msra.gmra.mrb[2].mxu1 %vm215_vm3, %v363_v58 }
 0x2e5   :  { %1642 = vmatpush1.bf16.msra.mxu1 %v1903_v9  ;;  %775 = vmatprep.mubr.f32.mxu1 %v1852_v3 }
 0x2e6   :  { %1644 = vmatprep.subr.bf16.mxu1 %v1916_v13 }
 0x2e9   :  { %1646 = vmatpush1.bf16.msra.mxu1 %v1926_v16 }
 0x2ea   :  { %1648 = vmatprep.subr.bf16.mxu1 %v1933_v18 }
 0x2ed   :  { %1650 = vmatpush1.bf16.msra.mxu1 %v1954_v24 }
 0x2ee   :  { %1652 = vmatprep.subr.bf16.mxu1 %v1959_v25 }
 0x2f1   :  { %1654 = vmatpush1.bf16.msra.mxu1 %v1973_v29 }
 0x2f2   :  { %1672 = vmatprep.subr.bf16.mxu1 %v1892_v5 }
 0x3b7   :  { %v449_v59 = vpop.f32.mrb[2].mxu1 }
 0x3b8   :  { %v462_v60 = vadd.f32 %v449_v59, %v2025_v46  ;;  %v451_v61 = vpop.f32.mrb[3].mxu1 }
 0x3b9   :  { %v463_v63 = vadd.f32 %v451_v61, %v2047_v11 }
 0x3ba   :  { %1740 = vtanh.f32 %v462_v60  ;;  %v1571_v7 = vmul.f32 -1.442695, %v462_v60 }
 0x3bb   :  { %1742 = vtanh.f32 %v463_v63  ;;  %v1572_v10 = vmul.f32 -1.442695, %v463_v63 }
 0x3bc   :  { %1744 = vpow2.f32 %v1571_v7 }
 0x3bd   :  { %1746 = vpow2.f32 %v1572_v10 }
 0x3c4   :  { %v1741_v1 = vpop.eup %1740 }
 0x3c5   :  { %v1743_v4 = vpop.eup %1742  ;;  %480 = vrot.lane.b32.xlu0 %v1741_v1, %s1853_s0 }
 0x3c6   :  { %491 = vrot.lane.b32.xlu1 %v1743_v4, %s1853_s0  ;;  %v1745_v12 = vpop.eup %1744 }
 0x3c7   :  { %v1747_v5 = vpop.eup %1746  ;;  %v467_v14 = vadd.f32 1.0, %v1745_v12 }
 0x3c8   :  { %v474_v17 = vadd.f32 1.0, %v1747_v5 }
 0x3c9   :  { %1748 = vrcp.f32 %v467_v14 }
 0x3ca   :  { %1750 = vrcp.f32 %v474_v17 }
 0x3d3   :  { %v1749_v46 = vpop.eup %1748 }
 0x3d4   :  { %v1751_v19 = vpop.eup %1750  ;;  %v478_v23 = vmul.f32 %v1749_v46, %v324_v39 }
 0x3d5   :  { %v489_v27 = vmul.f32 %v1751_v19, %v335_v44 }
 0x437   :  { %v481_v11 = vpop.permute.xlu0 %480 }
 0x438   :  { %v483_v20 = vmul.f32 %v1749_v46, %v481_v11  ;;  %v492_v21 = vpop.permute.xlu1 %491 }
 0x439   :  { %v494_v22 = vmul.f32 %v1751_v19, %v492_v21 }
 0x43a   :  { %485 = vrot.lane.b32.xlu0 %v483_v20, %s1853_s0 }
 0x43b   :  { %496 = vrot.lane.b32.xlu1 %v494_v22, %s1853_s0 }
 0x4ac   :  { %v486_v26 = vpop.permute.xlu0 %485 }
 0x4ad   :  { %v488_v28 = vadd.f32 %v486_v26, %v478_v23  ;;  %v497_v30 = vpop.permute.xlu1 %496 }
 0x4ae   :  { %v499_v31 = vadd.f32 %v497_v30, %v489_v27 }
 0x4af   :  { %1752 = vtanh.f32 %v488_v28 }
 0x4b0   :  { %1754 = vtanh.f32 %v499_v31 }
 0x4b9   :  { %v1753_v32 = vpop.eup %1752 }
 0x4ba   :  { %v1755_v33 = vpop.eup %1754  ;;  %502 = vrot.lane.b32.xlu0 %v1753_v32, %s1853_s0 }
 0x4bb   :  { %508 = vrot.lane.b32.xlu1 %v1755_v33, %s1853_s0 }
 0x52c   :  { %v503_v34 = vpop.permute.xlu0 %502 }
 0x52d   :  { %v505_v35 = vmul.f32 %v1749_v46, %v503_v34  ;;  %v509_v36 = vpop.permute.xlu1 %508 }
 0x52e   :  { %v2082_v37 = vmul.f32 %v1751_v19, %v509_v36 }
 0x52f   :  { %513 = vrot.lane.b32.xlu0 %v505_v35, %s1854_s3 }
 0x530   :  { %524 = vrot.lane.b32.xlu1 %v2082_v37, %s1855_s13 }
 0x5a1   :  { %v514_v38 = vpop.permute.xlu0 %513 }
 0x5a2   :  { %517 = vst.msk [vmem:[#allocation3 + $0x8] sm:$0xff] %vm352_vm2, %v514_v38  ;;  %v525_v39 = vpop.permute.xlu1 %524 }
 0x5a3   :  { %v527_v40 = vsel %vm352_vm2, %v514_v38, %v525_v39 }
 0x5a4   :  { %1573 = vmatmul.mubr.msk.f32.vlgmr.msra.gmra.mrb[16].mxu0 %vm215_vm3, %v527_v40 }
 0x5a5   :  { %1658 = vmatpush1.bf16.msra.mxu0 %v1903_v9  ;;  %939 = vmatprep.mubr.f32.mxu0 %v1852_v3 }
 0x5a6   :  { %1660 = vmatprep.subr.bf16.mxu0 %v1916_v13 }
 0x5a9   :  { %1662 = vmatpush1.bf16.msra.mxu0 %v1926_v16 }
 0x5aa   :  { %1664 = vmatprep.subr.bf16.mxu0 %v1933_v18 }
 0x5ad   :  { %1666 = vmatpush1.bf16.msra.mxu0 %v1954_v24 }
 0x5ae   :  { %1668 = vmatprep.subr.bf16.mxu0 %v1959_v25 }
 0x5b1   :  { %1670 = vmatpush1.bf16.msra.mxu0 %v1973_v29 }
 0x677   :  { %v613_v41 = vpop.f32.mrb[16].mxu0 }
 0x678   :  { %v626_v42 = vadd.f32 %v613_v41, %v2029_v50  ;;  %v615_v44 = vpop.f32.mrb[17].mxu0 }
 0x679   :  { %v627_v45 = vadd.f32 %v615_v44, %v2043_v6 }
 0x67a   :  { %1756 = vtanh.f32 %v626_v42  ;;  %v1574_v51 = vmul.f32 -1.442695, %v626_v42 }
 0x67b   :  { %1758 = vtanh.f32 %v627_v45  ;;  %v1575_v54 = vmul.f32 -1.442695, %v627_v45 }
 0x67c   :  { %1760 = vpow2.f32 %v1574_v51 }
 0x67d   :  { %1762 = vpow2.f32 %v1575_v54 }
 0x684   :  { %v1757_v47 = vpop.eup %1756 }
 0x685   :  { %v1759_v49 = vpop.eup %1758  ;;  %644 = vrot.lane.b32.xlu0 %v1757_v47, %s1853_s0 }
 0x686   :  { %655 = vrot.lane.b32.xlu1 %v1759_v49, %s1853_s0  ;;  %v1761_v56 = vpop.eup %1760 }
 0x687   :  { %v1763_v58 = vpop.eup %1762  ;;  %v631_v59 = vadd.f32 1.0, %v1761_v56 }
 0x688   :  { %v638_v60 = vadd.f32 1.0, %v1763_v58 }
 0x689   :  { %1764 = vrcp.f32 %v631_v59 }
 0x68a   :  { %1766 = vrcp.f32 %v638_v60 }
 0x693   :  { %v1765_v50 = vpop.eup %1764 }
 0x694   :  { %v1767_v61 = vpop.eup %1766  ;;  %v642_v7 = vmul.f32 %v1765_v50, %v488_v28 }
 0x695   :  { %v653_v12 = vmul.f32 %v1767_v61, %v499_v31 }
 0x6f7   :  { %v645_v6 = vpop.permute.xlu0 %644 }
 0x6f8   :  { %v647_v63 = vmul.f32 %v1765_v50, %v645_v6  ;;  %v656_v1 = vpop.permute.xlu1 %655 }
 0x6f9   :  { %v658_v4 = vmul.f32 %v1767_v61, %v656_v1 }
 0x6fa   :  { %649 = vrot.lane.b32.xlu0 %v647_v63, %s1853_s0 }
 0x6fb   :  { %660 = vrot.lane.b32.xlu1 %v658_v4, %s1853_s0 }
 0x76c   :  { %v650_v10 = vpop.permute.xlu0 %649 }
 0x76d   :  { %v652_v5 = vadd.f32 %v650_v10, %v642_v7  ;;  %v661_v14 = vpop.permute.xlu1 %660 }
 0x76e   :  { %v663_v17 = vadd.f32 %v661_v14, %v653_v12 }
 0x76f   :  { %1768 = vtanh.f32 %v652_v5 }
 0x770   :  { %1770 = vtanh.f32 %v663_v17 }
 0x779   :  { %v1769_v46 = vpop.eup %1768 }
 0x77a   :  { %v1771_v11 = vpop.eup %1770  ;;  %666 = vrot.lane.b32.xlu0 %v1769_v46, %s1853_s0 }
 0x77b   :  { %672 = vrot.lane.b32.xlu1 %v1771_v11, %s1853_s0 }
 0x7ec   :  { %v667_v19 = vpop.permute.xlu0 %666 }
 0x7ed   :  { %v669_v20 = vmul.f32 %v1765_v50, %v667_v19  ;;  %v673_v21 = vpop.permute.xlu1 %672 }
 0x7ee   :  { %v2106_v22 = vmul.f32 %v1767_v61, %v673_v21 }
 0x7ef   :  { %677 = vrot.lane.b32.xlu0 %v669_v20, %s1854_s3 }
 0x7f0   :  { %688 = vrot.lane.b32.xlu1 %v2106_v22, %s1855_s13 }
 0x861   :  { %v678_v23 = vpop.permute.xlu0 %677 }
 0x862   :  { %681 = vst.msk [vmem:[#allocation3 + $0x10] sm:$0xff] %vm352_vm2, %v678_v23  ;;  %v689_v26 = vpop.permute.xlu1 %688 }
 0x863   :  { %v691_v27 = vsel %vm352_vm2, %v678_v23, %v689_v26 }
 0x864   :  { %1576 = vmatmul.mubr.msk.f32.vlgmr.msra.gmra.mrb[4].mxu1 %vm215_vm3, %v691_v27 }
 0x865   :  { %1674 = vmatpush1.bf16.msra.mxu1 %v1903_v9  ;;  %1097 = vmatprep.mubr.f32.mxu1 %v1852_v3 }
 0x866   :  { %1676 = vmatprep.subr.bf16.mxu1 %v1916_v13 }
 0x869   :  { %1678 = vmatpush1.bf16.msra.mxu1 %v1926_v16 }
 0x86a   :  { %1680 = vmatprep.subr.bf16.mxu1 %v1933_v18 }
 0x86d   :  { %1682 = vmatpush1.bf16.msra.mxu1 %v1954_v24 }
 0x86e   :  { %1684 = vmatprep.subr.bf16.mxu1 %v1959_v25 }
 0x871   :  { %1686 = vmatpush1.bf16.msra.mxu1 %v1973_v29 }
 0x937   :  { %v777_v28 = vpop.f32.mrb[4].mxu1 }
 0x938   :  { %v790_v30 = vadd.f32 %v777_v28, %v2033_v55  ;;  %v779_v31 = vpop.f32.mrb[5].mxu1 }
 0x939   :  { %v791_v9 = vadd.f32 %v779_v31, %v2039_v0 }
 0x93a   :  { %1772 = vtanh.f32 %v790_v30  ;;  %v1577_v16 = vmul.f32 -1.442695, %v790_v30 }
 0x93b   :  { %1774 = vtanh.f32 %v791_v9  ;;  %v1578_v18 = vmul.f32 -1.442695, %v791_v9 }
 0x93c   :  { %1776 = vpow2.f32 %v1577_v16 }
 0x93d   :  { %1778 = vpow2.f32 %v1578_v18 }
 0x944   :  { %v1773_v32 = vpop.eup %1772 }
 0x945   :  { %v1775_v13 = vpop.eup %1774  ;;  %808 = vrot.lane.b32.xlu0 %v1773_v32, %s1853_s0 }
 0x946   :  { %819 = vrot.lane.b32.xlu1 %v1775_v13, %s1853_s0  ;;  %v1777_v24 = vpop.eup %1776 }
 0x947   :  { %v1779_v33 = vpop.eup %1778  ;;  %v795_v34 = vadd.f32 1.0, %v1777_v24 }
 0x948   :  { %v802_v35 = vadd.f32 1.0, %v1779_v33 }
 0x949   :  { %1780 = vrcp.f32 %v795_v34 }
 0x94a   :  { %1782 = vrcp.f32 %v802_v35 }
 0x953   :  { %v1781_v55 = vpop.eup %1780 }
 0x954   :  { %v1783_v36 = vpop.eup %1782  ;;  %v806_v41 = vmul.f32 %v1781_v55, %v652_v5 }
 0x955   :  { %v817_v44 = vmul.f32 %v1783_v36, %v663_v17 }
 0x9b7   :  { %v809_v0 = vpop.permute.xlu0 %808 }
 0x9b8   :  { %v811_v38 = vmul.f32 %v1781_v55, %v809_v0  ;;  %v820_v39 = vpop.permute.xlu1 %819 }
 0x9b9   :  { %v822_v40 = vmul.f32 %v1783_v36, %v820_v39 }
 0x9ba   :  { %813 = vrot.lane.b32.xlu0 %v811_v38, %s1853_s0 }
 0x9bb   :  { %824 = vrot.lane.b32.xlu1 %v822_v40, %s1853_s0 }
 0xa2c   :  { %v814_v42 = vpop.permute.xlu0 %813 }
 0xa2d   :  { %v816_v45 = vadd.f32 %v814_v42, %v806_v41  ;;  %v825_v47 = vpop.permute.xlu1 %824 }
 0xa2e   :  { %v827_v49 = vadd.f32 %v825_v47, %v817_v44 }
 0xa2f   :  { %1784 = vtanh.f32 %v816_v45 }
 0xa30   :  { %1786 = vtanh.f32 %v827_v49 }
 0xa39   :  { %v1785_v51 = vpop.eup %1784 }
 0xa3a   :  { %v1787_v54 = vpop.eup %1786  ;;  %830 = vrot.lane.b32.xlu0 %v1785_v51, %s1853_s0 }
 0xa3b   :  { %836 = vrot.lane.b32.xlu1 %v1787_v54, %s1853_s0 }
 0xaac   :  { %v831_v56 = vpop.permute.xlu0 %830 }
 0xaad   :  { %v833_v58 = vmul.f32 %v1781_v55, %v831_v56  ;;  %v837_v59 = vpop.permute.xlu1 %836 }
 0xaae   :  { %v2130_v60 = vmul.f32 %v1783_v36, %v837_v59 }
 0xaaf   :  { %841 = vrot.lane.b32.xlu0 %v833_v58, %s1854_s3 }
 0xab0   :  { %852 = vrot.lane.b32.xlu1 %v2130_v60, %s1855_s13 }
 0xb21   :  { %v842_v50 = vpop.permute.xlu0 %841 }
 0xb22   :  { %845 = vst.msk [vmem:[#allocation3 + $0x18] sm:$0xff] %vm352_vm2, %v842_v50  ;;  %v853_v6 = vpop.permute.xlu1 %852 }
 0xb23   :  { %v855_v61 = vsel %vm352_vm2, %v842_v50, %v853_v6 }
 0xb24   :  { %1579 = vmatmul.mubr.msk.f32.vlgmr.msra.gmra.mrb[18].mxu0 %vm215_vm3, %v855_v61 }
 0xb25   :  { %1255 = vmatprep.mubr.f32.mxu0 %v1852_v3 }
 0xbf7   :  { %v941_v63 = vpop.f32.mrb[18].mxu0 }
 0xbf8   :  { %v948_v1 = vadd.f32 %v941_v63, %v2037_v62  ;;  %v943_v4 = vpop.f32.mrb[19].mxu0 }
 0xbf9   :  { %v949_v7 = vadd.f32 %v943_v4, %v2035_v57 }
 0xbfa   :  { %1788 = vtanh.f32 %v948_v1  ;;  %v1580_v5 = vmul.f32 -1.442695, %v948_v1 }
 0xbfb   :  { %1790 = vtanh.f32 %v949_v7  ;;  %v1581_v14 = vmul.f32 -1.442695, %v949_v7  ;;  %v1173_v7 = vld [vmem:[%s2324_s2 + $0x8] sm:$0xff] }
 0xbfc   :  { %1792 = vpow2.f32 %v1580_v5 }
 0xbfd   :  { %1794 = vpow2.f32 %v1581_v14  ;;  %v1174_v14 = vld [vmem:[%s2324_s2 + $0x10] sm:$0xff] }
 0xc04   :  { %v1789_v10 = vpop.eup %1788 }
 0xc05   :  { %v1791_v12 = vpop.eup %1790  ;;  %966 = vrot.lane.b32.xlu0 %v1789_v10, %s1853_s0  ;;  %v1175_v10 = vld [vmem:[%s2324_s2 + $0x18] sm:$0xff] }
 0xc06   :  { %977 = vrot.lane.b32.xlu1 %v1791_v12, %s1853_s0  ;;  %v1793_v17 = vpop.eup %1792  ;;  %v1172_v12 = vld [vmem:[%s2324_s2] sm:$0xff]  ;;  %v1687_v5 = vpack.c.bf16 %v1175_v10, %v1173_v7 }
 0xc07   :  { %v1795_v46 = vpop.eup %1794  ;;  %v953_v11 = vadd.f32 1.0, %v1793_v17  ;;  %v1177_v17 = vld [vmem:[%s2324_s2 + $0x28] sm:$0xff] }
 0xc08   :  { %v960_v19 = vadd.f32 1.0, %v1795_v46  ;;  %v1179_v46 = vld [vmem:[%s2324_s2 + $0x38] sm:$0xff]  ;;  %1688 = vmatprep.subr.bf16.mxu0 %v1687_v5  ;;  %1704 = vmatprep.subr.bf16.mxu1 %v1687_v5 }
 0xc09   :  { %1796 = vrcp.f32 %v953_v11  ;;  %v1689_v11 = vpack.c.bf16 %v1174_v14, %v1172_v12 }
 0xc0a   :  { %1798 = vrcp.f32 %v960_v19  ;;  %v1691_v19 = vpack.c.bf16 %v1179_v46, %v1177_v17 }
 0xc0b   :  { %1690 = vmatpush1.bf16.msra.mxu0 %v1689_v11 }
 0xc0c   :  { %1692 = vmatprep.subr.bf16.mxu0 %v1691_v19 }
 0xc13   :  { %v1797_v62 = vpop.eup %1796 }
 0xc14   :  { %v1799_v20 = vpop.eup %1798  ;;  %v964_v27 = vmul.f32 %v1797_v62, %v816_v45 }
 0xc15   :  { %v975_v30 = vmul.f32 %v1799_v20, %v827_v49 }
 0xc77   :  { %v967_v57 = vpop.permute.xlu0 %966 }
 0xc78   :  { %v969_v21 = vmul.f32 %v1797_v62, %v967_v57  ;;  %v978_v23 = vpop.permute.xlu1 %977  ;;  %v1178_v57 = vld [vmem:[%s2324_s2 + $0x30] sm:$0xff] }
 0xc79   :  { %v980_v26 = vmul.f32 %v1799_v20, %v978_v23 }
 0xc7a   :  { %971 = vrot.lane.b32.xlu0 %v969_v21, %s1853_s0  ;;  %v1183_v21 = vld [vmem:[%s2324_s2 + $0x58] sm:$0xff] }
 0xc7b   :  { %982 = vrot.lane.b32.xlu1 %v980_v26, %s1853_s0 }
 0xcec   :  { %v972_v28 = vpop.permute.xlu0 %971 }
 0xced   :  { %v974_v31 = vadd.f32 %v972_v28, %v964_v27  ;;  %v983_v9 = vpop.permute.xlu1 %982  ;;  %v1180_v27 = vld [vmem:[%s2324_s2 + $0x40] sm:$0xff]  ;;  %v1182_v28 = vld [vmem:[%s2324_s2 + $0x50] sm:$0xff] }
 0xcee   :  { %v985_v32 = vadd.f32 %v983_v9, %v975_v30  ;;  %v1697_v30 = vpack.c.bf16 %v1182_v28, %v1180_v27 }
 0xcef   :  { %1800 = vtanh.f32 %v974_v31 }
 0xcf0   :  { %1802 = vtanh.f32 %v985_v32 }
 0xcf9   :  { %v1801_v13 = vpop.eup %1800 }
 0xcfa   :  { %v1803_v16 = vpop.eup %1802  ;;  %988 = vrot.lane.b32.xlu0 %v1801_v13, %s1853_s0 }
 0xcfb   :  { %994 = vrot.lane.b32.xlu1 %v1803_v16, %s1853_s0 }
 0xd6c   :  { %v989_v18 = vpop.permute.xlu0 %988 }
 0xd6d   :  { %v991_v24 = vmul.f32 %v1797_v62, %v989_v18  ;;  %v995_v33 = vpop.permute.xlu1 %994  ;;  %v1176_v62 = vld [vmem:[%s2324_s2 + $0x20] sm:$0xff] }
 0xd6e   :  { %v2147_v34 = vmul.f32 %v1799_v20, %v995_v33  ;;  %v1181_v20 = vld [vmem:[%s2324_s2 + $0x48] sm:$0xff]  ;;  %v1693_v23 = vpack.c.bf16 %v1178_v57, %v1176_v62 }
 0xd6f   :  { %999 = vrot.lane.b32.xlu0 %v991_v24, %s1854_s3  ;;  %v1695_v26 = vpack.c.bf16 %v1183_v21, %v1181_v20 }
 0xd70   :  { %1010 = vrot.lane.b32.xlu1 %v2147_v34, %s1855_s13  ;;  %1694 = vmatpush1.bf16.msra.mxu0 %v1693_v23 }
 0xd71   :  { %1696 = vmatprep.subr.bf16.mxu0 %v1695_v26 }
 0xd74   :  { %1698 = vmatpush1.bf16.msra.mxu0 %v1697_v30 }
 0xd75   :  { %1700 = vmatprep.subr.bf16.mxu0 %v1959_v25 }
 0xd78   :  { %1702 = vmatpush1.bf16.msra.mxu0 %v1973_v29 }
 0xde1   :  { %v1000_v35 = vpop.permute.xlu0 %999 }
 0xde2   :  { %1003 = vst.msk [vmem:[#allocation3 + $0x20] sm:$0xff] %vm352_vm2, %v1000_v35  ;;  %v1011_v55 = vpop.permute.xlu1 %1010 }
 0xde3   :  { %v1013_v0 = vsel %vm352_vm2, %v1000_v35, %v1011_v55 }
 0xde4   :  { %1582 = vmatmul.mubr.msk.f32.vlgmr.msra.gmra.mrb[6].mxu1 %vm215_vm3, %v1013_v0 }
 0xde5   :  { %1413 = vmatprep.mubr.f32.mxu1 %v1852_v3  ;;  %1706 = vmatpush1.bf16.msra.mxu1 %v1689_v11 }
 0xde6   :  { %1708 = vmatprep.subr.bf16.mxu1 %v1691_v19 }
 0xde9   :  { %1710 = vmatpush1.bf16.msra.mxu1 %v1693_v23 }
 0xdea   :  { %1712 = vmatprep.subr.bf16.mxu1 %v1695_v26 }
 0xded   :  { %1714 = vmatpush1.bf16.msra.mxu1 %v1697_v30 }
 0xeb7   :  { %v1099_v36 = vpop.f32.mrb[6].mxu1 }
 0xeb8   :  { %v1106_v38 = vadd.f32 %v1099_v36, %v2041_v2  ;;  %v1101_v39 = vpop.f32.mrb[7].mxu1 }
 0xeb9   :  { %v1107_v40 = vadd.f32 %v1101_v39, %v2031_v52 }
 0xeba   :  { %1804 = vtanh.f32 %v1106_v38  ;;  %v1583_v44 = vmul.f32 -1.442695, %v1106_v38 }
 0xebb   :  { %1806 = vtanh.f32 %v1107_v40  ;;  %v1584_v45 = vmul.f32 -1.442695, %v1107_v40 }
 0xebc   :  { %1808 = vpow2.f32 %v1583_v44 }
 0xebd   :  { %1810 = vpow2.f32 %v1584_v45 }
 0xec4   :  { %v1805_v41 = vpop.eup %1804 }
 0xec5   :  { %v1807_v42 = vpop.eup %1806  ;;  %1124 = vrot.lane.b32.xlu0 %v1805_v41, %s1853_s0 }
 0xec6   :  { %1135 = vrot.lane.b32.xlu1 %v1807_v42, %s1853_s0  ;;  %v1809_v47 = vpop.eup %1808 }
 0xec7   :  { %v1811_v3 = vpop.eup %1810  ;;  %v1111_v49 = vadd.f32 1.0, %v1809_v47 }
 0xec8   :  { %v1118_v51 = vadd.f32 1.0, %v1811_v3 }
 0xec9   :  { %1812 = vrcp.f32 %v1111_v49 }
 0xeca   :  { %1814 = vrcp.f32 %v1118_v51 }
 0xed3   :  { %v1813_v2 = vpop.eup %1812 }
 0xed4   :  { %v1815_v54 = vpop.eup %1814  ;;  %v1122_v50 = vmul.f32 %v1813_v2, %v974_v31 }
 0xed5   :  { %v1133_v61 = vmul.f32 %v1815_v54, %v985_v32 }
 0xf37   :  { %v1125_v52 = vpop.permute.xlu0 %1124 }
 0xf38   :  { %v1127_v56 = vmul.f32 %v1813_v2, %v1125_v52  ;;  %v1136_v58 = vpop.permute.xlu1 %1135 }
 0xf39   :  { %v1138_v59 = vmul.f32 %v1815_v54, %v1136_v58 }
 0xf3a   :  { %1129 = vrot.lane.b32.xlu0 %v1127_v56, %s1853_s0 }
 0xf3b   :  { %1140 = vrot.lane.b32.xlu1 %v1138_v59, %s1853_s0 }
 0xfac   :  { %v1130_v6 = vpop.permute.xlu0 %1129 }
 0xfad   :  { %v2162_v63 = vadd.f32 %v1130_v6, %v1122_v50  ;;  %v1141_v1 = vpop.permute.xlu1 %1140  ;;  %v1343_v50 = vld [vmem:[%s2324_s2 + $0x68] sm:$0xff]  ;;  %v1345_v6 = vld [vmem:[%s2324_s2 + $0x78] sm:$0xff] }
 0xfae   :  { %v2164_v4 = vadd.f32 %v1141_v1, %v1133_v61  ;;  %v1342_v61 = vld [vmem:[%s2324_s2 + $0x60] sm:$0xff]  ;;  %v1344_v1 = vld [vmem:[%s2324_s2 + $0x70] sm:$0xff] }
 0xfaf   :  { %1816 = vtanh.f32 %v2162_v63 }
 0xfb0   :  { %1818 = vtanh.f32 %v2164_v4 }
 0xfb9   :  { %v1817_v31 = vpop.eup %1816 }
 0xfba   :  { %v1819_v9 = vpop.eup %1818  ;;  %1146 = vrot.lane.b32.xlu0 %v1817_v31, %s1853_s0 }
 0xfbb   :  { %1152 = vrot.lane.b32.xlu1 %v1819_v9, %s1853_s0 }
0x102c   :  { %v1147_v32 = vpop.permute.xlu0 %1146 }
0x102d   :  { %v1149_v13 = vmul.f32 %v1813_v2, %v1147_v32  ;;  %v1153_v16 = vpop.permute.xlu1 %1152 }
0x102e   :  { %v2208_v18 = vmul.f32 %v1815_v54, %v1153_v16 }
0x102f   :  { %1157 = vrot.lane.b32.xlu0 %v1149_v13, %s1854_s3 }
0x1030   :  { %1168 = vrot.lane.b32.xlu1 %v2208_v18, %s1855_s13 }
0x10a1   :  { %v1158_v24 = vpop.permute.xlu0 %1157 }
0x10a2   :  { %1161 = vst.msk [vmem:[#allocation3 + $0x28] sm:$0xff] %vm352_vm2, %v1158_v24  ;;  %v1169_v33 = vpop.permute.xlu1 %1168 }
0x10a3   :  { %v1171_v35 = vsel %vm352_vm2, %v1158_v24, %v1169_v33 }
0x10a4   :  { %1585 = vmatmul.mubr.msk.f32.vlgmr.msra.gmra.mrb[20].mxu0 %vm215_vm3, %v1171_v35 }
0x1177   :  { %v1257_v25 = vpop.f32.mrb[20].mxu0 }
0x1178   :  { %v1264_v29 = vadd.f32 %v1257_v25, %v2045_v8  ;;  %v1259_v55 = vpop.f32.mrb[21].mxu0 }
0x1179   :  { %v1265_v0 = vadd.f32 %v1259_v55, %v2027_v48 }
0x117a   :  { %1820 = vtanh.f32 %v1264_v29  ;;  %v1586_v39 = vmul.f32 -1.442695, %v1264_v29 }
0x117b   :  { %1822 = vtanh.f32 %v1265_v0  ;;  %v1587_v40 = vmul.f32 -1.442695, %v1265_v0 }
0x117c   :  { %1824 = vpow2.f32 %v1586_v39 }
0x117d   :  { %1826 = vpow2.f32 %v1587_v40 }
0x1184   :  { %v1821_v36 = vpop.eup %1820 }
0x1185   :  { %v1823_v38 = vpop.eup %1822  ;;  %1282 = vrot.lane.b32.xlu0 %v1821_v36, %s1853_s0 }
0x1186   :  { %1293 = vrot.lane.b32.xlu1 %v1823_v38, %s1853_s0  ;;  %v1825_v41 = vpop.eup %1824 }
0x1187   :  { %v1827_v42 = vpop.eup %1826  ;;  %v1269_v44 = vadd.f32 1.0, %v1825_v41 }
0x1188   :  { %v1276_v45 = vadd.f32 1.0, %v1827_v42 }
0x1189   :  { %1828 = vrcp.f32 %v1269_v44 }
0x118a   :  { %1830 = vrcp.f32 %v1276_v45 }
0x1193   :  { %v1829_v8 = vpop.eup %1828 }
0x1194   :  { %v1831_v47 = vpop.eup %1830  ;;  %v1280_v2 = vmul.f32 %v1829_v8, %v2162_v63  ;;  %v1715_v63 = vpack.c.bf16 %v1345_v6, %v1343_v50  ;;  %v1487_v6 = vld [vmem:[#allocation3 + $0x20] sm:$0xff] }
0x1195   :  { %v1291_v54 = vmul.f32 %v1831_v47, %v2164_v4  ;;  %v1717_v4 = vpack.c.bf16 %v1344_v1, %v1342_v61  ;;  %v1484_v1 = vld [vmem:[#allocation3 + $0x8] sm:$0xff] }
0x1196   :  { %1716 = vmatprep.subr.bf16.mxu1 %v1715_v63 }
0x1197   :  { %1718 = vmatpush1.bf16.msra.mxu1 %v1717_v4 }
0x11f7   :  { %v1283_v48 = vpop.permute.xlu0 %1282 }
0x11f8   :  { %v1285_v3 = vmul.f32 %v1829_v8, %v1283_v48  ;;  %v1294_v49 = vpop.permute.xlu1 %1293 }
0x11f9   :  { %v1296_v51 = vmul.f32 %v1831_v47, %v1294_v49 }
0x11fa   :  { %1287 = vrot.lane.b32.xlu0 %v1285_v3, %s1853_s0 }
0x11fb   :  { %1298 = vrot.lane.b32.xlu1 %v1296_v51, %s1853_s0 }
0x126c   :  { %v1288_v52 = vpop.permute.xlu0 %1287 }
0x126d   :  { %v1290_v56 = vadd.f32 %v1288_v52, %v1280_v2  ;;  %v1299_v58 = vpop.permute.xlu1 %1298 }
0x126e   :  { %v1301_v59 = vadd.f32 %v1299_v58, %v1291_v54  ;;  %v1485_v58 = vld [vmem:[#allocation3 + $0x10] sm:$0xff] }
0x126f   :  { %1832 = vtanh.f32 %v1290_v56 }
0x1270   :  { %1834 = vtanh.f32 %v1301_v59 }
0x1279   :  { %v1833_v7 = vpop.eup %1832 }
0x127a   :  { %v1835_v10 = vpop.eup %1834  ;;  %1304 = vrot.lane.b32.xlu0 %v1833_v7, %s1853_s0 }
0x127b   :  { %1310 = vrot.lane.b32.xlu1 %v1835_v10, %s1853_s0  ;;  %v1486_v10 = vld [vmem:[#allocation3 + $0x18] sm:$0xff] }
0x12ec   :  { %v1305_v12 = vpop.permute.xlu0 %1304 }
0x12ed   :  { %v1307_v5 = vmul.f32 %v1829_v8, %v1305_v12  ;;  %v1311_v14 = vpop.permute.xlu1 %1310 }
0x12ee   :  { %v1313_v17 = vmul.f32 %v1831_v47, %v1311_v14  ;;  %v1488_v14 = vld [vmem:[#allocation3 + $0x28] sm:$0xff] }
0x12ef   :  { %1315 = vrot.lane.b32.xlu0 %v1307_v5, %s1854_s3 }
0x12f0   :  { %1326 = vrot.lane.b32.xlu1 %v1313_v17, %s1855_s13 }
0x1361   :  { %v1316_v46 = vpop.permute.xlu0 %1315 }
0x1362   :  { %1319 = vst.msk [vmem:[#allocation3 + $0x30] sm:$0xff] %vm352_vm2, %v1316_v46  ;;  %v1327_v11 = vpop.permute.xlu1 %1326 }
0x1363   :  { %v1329_v19 = vsel %vm352_vm2, %v1316_v46, %v1327_v11 }
0x1364   :  { %1588 = vmatmul.mubr.msk.f32.vlgmr.msra.gmra.mrb[8].mxu1 %vm215_vm3, %v1329_v19 }
0x1437   :  { %v1415_v62 = vpop.f32.mrb[8].mxu1 }
0x1438   :  { %v1422_v57 = vadd.f32 %v1415_v62, %v2050_v15  ;;  %v1417_v20 = vpop.f32.mrb[9].mxu1 }
0x1439   :  { %v1423_v21 = vadd.f32 %v1417_v20, %v2023_v43  ;;  %v1483_v20 = vld [vmem:[#allocation3] sm:$0xff] }
0x143a   :  { %1836 = vtanh.f32 %v1422_v57  ;;  %v1589_v27 = vmul.f32 -1.442695, %v1422_v57 }
0x143b   :  { %1838 = vtanh.f32 %v1423_v21  ;;  %v1590_v28 = vmul.f32 -1.442695, %v1423_v21 }
0x143c   :  { %1840 = vpow2.f32 %v1589_v27 }
0x143d   :  { %1842 = vpow2.f32 %v1590_v28 }
0x1444   :  { %v1837_v23 = vpop.eup %1836 }
0x1445   :  { %v1839_v26 = vpop.eup %1838  ;;  %1440 = vrot.lane.b32.xlu1 %v1837_v23, %s1853_s0  ;;  %v1489_v23 = vld [vmem:[#allocation3 + $0x30] sm:$0xff] }
0x1446   :  { %1451 = vrot.lane.b32.xlu0 %v1839_v26, %s1853_s0  ;;  %v1841_v30 = vpop.eup %1840 }
0x1447   :  { %v1843_v31 = vpop.eup %1842  ;;  %v1427_v9 = vadd.f32 1.0, %v1841_v30 }
0x1448   :  { %v1434_v32 = vadd.f32 1.0, %v1843_v31 }
0x1449   :  { %1844 = vrcp.f32 %v1427_v9 }
0x144a   :  { %1846 = vrcp.f32 %v1434_v32 }
0x1453   :  { %v1845_v15 = vpop.eup %1844 }
0x1454   :  { %v1847_v13 = vpop.eup %1846  ;;  %v1438_v35 = vmul.f32 %v1845_v15, %v1290_v56 }
0x1455   :  { %v1449_v29 = vmul.f32 %v1847_v13, %v1301_v59 }
0x14b7   :  { %v1441_v43 = vpop.permute.xlu1 %1440 }
0x14b8   :  { %v1443_v16 = vmul.f32 %v1845_v15, %v1441_v43  ;;  %v1452_v24 = vpop.permute.xlu0 %1451 }
0x14b9   :  { %v1454_v33 = vmul.f32 %v1847_v13, %v1452_v24 }
0x14ba   :  { %1445 = vrot.lane.b32.xlu1 %v1443_v16, %s1853_s0 }
0x14bb   :  { %1456 = vrot.lane.b32.xlu0 %v1454_v33, %s1853_s0 }
0x152c   :  { %v1446_v25 = vpop.permute.xlu1 %1445 }
0x152d   :  { %v1448_v55 = vadd.f32 %v1446_v25, %v1438_v35  ;;  %v1457_v0 = vpop.permute.xlu0 %1456 }
0x152e   :  { %v1459_v36 = vadd.f32 %v1457_v0, %v1449_v29 }
0x152f   :  { %1848 = vtanh.f32 %v1448_v55 }
0x1530   :  { %1850 = vtanh.f32 %v1459_v36 }
0x1539   :  { %v1849_v38 = vpop.eup %1848 }
0x153a   :  { %v1851_v39 = vpop.eup %1850  ;;  %1462 = vrot.lane.b32.xlu1 %v1849_v38, %s1853_s0 }
0x153b   :  { %1468 = vrot.lane.b32.xlu0 %v1851_v39, %s1853_s0 }
0x153e   :  { %519 = vrot.lane.b32.xlu1 %v2082_v37, %s1854_s3 }
0x153f   :  { %355 = vrot.lane.b32.xlu0 %v2058_v53, %s1854_s3 }
0x1542   :  { %847 = vrot.lane.b32.xlu1 %v2130_v60, %s1854_s3 }
0x1543   :  { %683 = vrot.lane.b32.xlu0 %v2106_v22, %s1854_s3 }
0x1546   :  { %1163 = vrot.lane.b32.xlu1 %v2208_v18, %s1854_s3 }
0x1547   :  { %1005 = vrot.lane.b32.xlu0 %v2147_v34, %s1854_s3 }
0x154b   :  { %1321 = vrot.lane.b32.xlu0 %v1313_v17, %s1854_s3 }
0x15ac   :  { %v1463_v40 = vpop.permute.xlu1 %1462 }
0x15ad   :  { %v1465_v41 = vmul.f32 %v1845_v15, %v1463_v40  ;;  %v1469_v37 = vpop.permute.xlu0 %1468 }
0x15ae   :  { %v1471_v42 = vmul.f32 %v1847_v13, %v1469_v37 }
0x15af   :  { %1473 = vrot.lane.b32.xlu0 %v1465_v41, %s1854_s3 }
0x15b0   :  { %v520_v53 = vpop.permute.xlu1 %519  ;;  %1479 = vrot.lane.b32.xlu1 %v1471_v42, %s1854_s3 }
0x15b1   :  { %523 = vst.msk [vmem:[#allocation4 + $0x30] sm:$0xff] %vm352_vm2, %v520_v53  ;;  %v356_v22 = vpop.permute.xlu0 %355 }
0x15b2   :  { %359 = vst.msk [vmem:[#allocation4 + $0x38] sm:$0xff] %vm352_vm2, %v356_v22 }
0x15b4   :  { %v848_v60 = vpop.permute.xlu1 %847 }
0x15b5   :  { %851 = vst.msk [vmem:[#allocation4 + $0x20] sm:$0xff] %vm352_vm2, %v848_v60  ;;  %v684_v34 = vpop.permute.xlu0 %683 }
0x15b6   :  { %687 = vst.msk [vmem:[#allocation4 + $0x28] sm:$0xff] %vm352_vm2, %v684_v34 }
0x15b8   :  { %v1164_v18 = vpop.permute.xlu1 %1163  ;;  %v1497_v56 = vld [vmem:[#allocation4 + $0x30] sm:$0xff] }
0x15b9   :  { %1167 = vst.msk [vmem:[#allocation4 + $0x10] sm:$0xff] %vm352_vm2, %v1164_v18  ;;  %v1006_v44 = vpop.permute.xlu0 %1005  ;;  %v1498_v51 = vld [vmem:[#allocation4 + $0x38] sm:$0xff] }
0x15ba   :  { %1009 = vst.msk [vmem:[#allocation4 + $0x18] sm:$0xff] %vm352_vm2, %v1006_v44 }
0x15bc   :  { %v1495_v48 = vld [vmem:[#allocation4 + $0x20] sm:$0xff] }
0x15bd   :  { %v1322_v45 = vpop.permute.xlu0 %1321  ;;  %v1496_v49 = vld [vmem:[#allocation4 + $0x28] sm:$0xff] }
0x15be   :  { %1325 = vst.msk [vmem:[#allocation4 + $0x8] sm:$0xff] %vm352_vm2, %v1322_v45 }
0x15c0   :  { %v1493_v8 = vld [vmem:[#allocation4 + $0x10] sm:$0xff] }
0x15c1   :  { %1511 = vrot.lane.b32.xlu1 %v1493_v8, %s1853_s0  ;;  %v1494_v3 = vld [vmem:[#allocation4 + $0x18] sm:$0xff] }
0x15c5   :  { %1515 = vrot.lane.b32.xlu1 %v1495_v48, %s1853_s0  ;;  %v1492_v47 = vld [vmem:[#allocation4 + $0x8] sm:$0xff] }
0x15c6   :  { %1509 = vrot.lane.b32.xlu0 %v1492_v47, %s1853_s0 }
0x15ca   :  { %1513 = vrot.lane.b32.xlu0 %v1494_v3, %s1853_s0 }
0x15ce   :  { %1517 = vrot.lane.b32.xlu0 %v1496_v49, %s1853_s0 }
0x15d2   :  { %1521 = vrot.lane.b32.xlu0 %v1498_v51, %s1853_s0 }
0x1621   :  { %v1474_v2 = vpop.permute.xlu0 %1473 }
0x1622   :  { %1477 = vst.msk [vmem:[#allocation3 + $0x38] sm:$0xff] %vm352_vm2, %v1474_v2  ;;  %v1480_v52 = vpop.permute.xlu1 %1479 }
0x1623   :  { %1482 = vst.msk [vmem:[#allocation4] sm:$0xff] %vm352_vm2, %v1480_v52 }
0x1629   :  { %v1490_v11 = vld [vmem:[#allocation3 + $0x38] sm:$0xff] }
0x162a   :  { %v1491_v54 = vld [vmem:[#allocation4] sm:$0xff] }
0x162b   :  { %1507 = vrot.lane.b32.xlu1 %v1491_v54, %s1853_s0 }
0x162f   :  { %1519 = vrot.lane.b32.xlu1 %v1497_v56, %s1853_s0 }
0x1633   :  { %v1512_v59 = vpop.permute.xlu1 %1511 }
0x1634   :  { %v1533_v50 = vsel %vm352_vm2, %v1485_v58, %v1512_v59 }
0x1635   :  { %1541 = vst.msk [vmem:[%s2327_s4 + $0x10] sm:$0xff] %vm215_vm3, %v1533_v50 }
0x1637   :  { %v1516_v61 = vpop.permute.xlu1 %1515 }
0x1638   :  { %v1535_v63 = vsel %vm352_vm2, %v1487_v6, %v1516_v61  ;;  %v1510_v4 = vpop.permute.xlu0 %1509 }
0x1639   :  { %1543 = vst.msk [vmem:[%s2327_s4 + $0x20] sm:$0xff] %vm215_vm3, %v1535_v63  ;;  %v1532_v7 = vsel %vm352_vm2, %v1484_v1, %v1510_v4 }
0x163a   :  { %1540 = vst.msk [vmem:[%s2327_s4 + $0x8] sm:$0xff] %vm215_vm3, %v1532_v7 }
0x163c   :  { %v1514_v12 = vpop.permute.xlu0 %1513 }
0x163d   :  { %v1534_v5 = vsel %vm352_vm2, %v1486_v10, %v1514_v12 }
0x163e   :  { %1542 = vst.msk [vmem:[%s2327_s4 + $0x18] sm:$0xff] %vm215_vm3, %v1534_v5 }
0x1640   :  { %v1518_v17 = vpop.permute.xlu0 %1517 }
0x1641   :  { %v1536_v46 = vsel %vm352_vm2, %v1488_v14, %v1518_v17 }
0x1642   :  { %1544 = vst.msk [vmem:[%s2327_s4 + $0x28] sm:$0xff] %vm215_vm3, %v1536_v46 }
0x1644   :  { %v1522_v19 = vpop.permute.xlu0 %1521 }
0x1645   :  { %v1538_v62 = vsel %vm352_vm2, %v1490_v11, %v1522_v19 }
0x1646   :  { %1546 = vst.msk [vmem:[%s2327_s4 + $0x38] sm:$0xff] %vm215_vm3, %v1538_v62 }
0x169d   :  { %v1508_v57 = vpop.permute.xlu1 %1507 }
0x169e   :  { %v1531_v21 = vsel %vm352_vm2, %v1483_v20, %v1508_v57 }
0x169f   :  { %1539 = vst.msk [vmem:[%s2327_s4] sm:$0xff] %vm215_vm3, %v1531_v21 }
0x16a1   :  { %v1520_v26 = vpop.permute.xlu1 %1519 }
0x16a2   :  { %v1537_v27 = vsel %vm352_vm2, %v1489_v23, %v1520_v26 }
0x16a3   :  { %1545 = vst.msk [vmem:[%s2327_s4 + $0x30] sm:$0xff] %vm215_vm3, %v1537_v27 }

</bundles_post_ra>
